<compile_context>
chip_gen: v7x
topology: tpu7x:2x2x1
jax: 0.10.0
libtpu: 0.0.40
codegen_flags: <defaults>
</compile_context>

<pallas_src>
import functools

import jax
import jax.numpy as jnp
from jax.experimental import pallas as pl
from jax.experimental.pallas import tpu as pltpu


def _round_up(x, m):
    return ((x + m - 1) // m) * m


# ----------------------------------------------------------------------------
# Fused kernel: GRU stack (unrolled over time) -> Linear -> LogSoftmax
# ----------------------------------------------------------------------------
def _make_fused_kernel(T, Bp, Hp, num_layers):
    """Builds the fused kernel body for static (T, Bp, Hp, num_layers)."""

    def kernel(*refs):
        # refs = [x_ref,
        #         4 * num_layers per-layer weight refs
        #           (w_ih_cat, w_hh_cat, b_cat, b_hn),
        #         lin_w_ref, lin_b_ref,
        #         out_ref, hn_ref,
        #         seq_scratch]
        x_ref = refs[0]
        w_refs = refs[1:1 + 4 * num_layers]
        lin_w_ref = refs[1 + 4 * num_layers]
        lin_b_ref = refs[2 + 4 * num_layers]
        out_ref = refs[3 + 4 * num_layers]
        hn_ref = refs[4 + 4 * num_layers]
        seq_scratch = refs[5 + 4 * num_layers]

        # Layer-0 input: all timesteps flattened to (T*Bp, I).
        x2 = x_ref[...].astype(jnp.float32)

        for layer in range(num_layers):
            w_ih_ref, w_hh_ref, b_cat_ref, b_hn_ref = \
                w_refs[4 * layer:4 * (layer + 1)]

            # Batched input projection for ALL gates and ALL timesteps at
            # once: a single MXU matmul per layer, hoisted off the serial
            # recurrence.  Gate blocks live at 128-lane tile boundaries.
            gi = jnp.dot(x2, w_ih_ref[...],
                         preferred_element_type=jnp.float32) + b_cat_ref[...]

            # Hoist recurrent weights / bias broadcast out of the time loop.
            whh = w_hh_ref[...]                                   # (Hp, 3*Hp)
            b_hn = jnp.broadcast_to(b_hn_ref[...], (Bp, Hp))      # (Bp, Hp)

            h = jnp.zeros((Bp, Hp), jnp.float32)
            # Time recurrence, fully unrolled at trace time (static T).  Only
            # one h @ W_hh matmul + gate nonlinearities remain serial.
            for t in range(T):
                lo = t * Bp
                gh = jnp.dot(h, whh, preferred_element_type=jnp.float32)
                gi_t = gi[lo:lo + Bp, :]
                # Slices below are at 128-lane vreg boundaries (no shuffles).
                r = jax.nn.sigmoid(gi_t[:, 0:Hp] + gh[:, 0:Hp])
                z = jax.nn.sigmoid(gi_t[:, Hp:2 * Hp] + gh[:, Hp:2 * Hp])
                n = jnp.tanh(gi_t[:, 2 * Hp:3 * Hp]
                             + r * (gh[:, 2 * Hp:3 * Hp] + b_hn))
                h = (1.0 - z) * n + z * h
                seq_scratch[lo:lo + Bp, :] = h        # lane-dense (Hp) store

            # Last hidden state of this layer -> h_n output row (lane-dense).
            hn_ref[layer] = h.astype(hn_ref.dtype)
            # Full hidden sequence of this layer feeds next layer / head.
            x2 = seq_scratch[...]

        # Linear head + LogSoftmax over the last dim on the whole (T*Bp, Hp)
        # slab: one batched matmul.  Padded columns carry -1e30 bias so they
        # contribute exp(.)=0 to the logsumexp and are sliced off outside.
        logits = jnp.dot(x2, lin_w_ref[...],
                         preferred_element_type=jnp.float32) + lin_b_ref[...]
        m = jnp.max(logits, axis=-1, keepdims=True)
        s = logits - m
        lse = jnp.log(jnp.sum(jnp.exp(s), axis=-1, keepdims=True))
        out_ref[...] = (s - lse).astype(out_ref.dtype)

    return kernel


def _fused_forward(x2, flat_weights, *, T, Bp, Hp, Op, num_layers, out_dtype):
    kernel = _make_fused_kernel(T, Bp, Hp, num_layers)
    n_in = 1 + len(flat_weights)
    vmem = lambda: pl.BlockSpec(memory_space=pltpu.MemorySpace.VMEM)
    out2, hn = pl.pallas_call(
        kernel,
        out_shape=(jax.ShapeDtypeStruct((T * Bp, Op), out_dtype),
                   jax.ShapeDtypeStruct((num_layers, Bp, Hp), out_dtype)),
        in_specs=[vmem() for _ in range(n_in)],
        out_specs=(vmem(), vmem()),
        scratch_shapes=[pltpu.VMEM((T * Bp, Hp), jnp.float32)],
    )(x2, *flat_weights)
    return out2, hn


# ----------------------------------------------------------------------------
# Parameter init (PyTorch-native layout) and kernel-layout preparation
# ----------------------------------------------------------------------------
def init_params(key, input_size, hid_size, hid_layers, output_size):
    """PyTorch nn.GRU / nn.Linear layout, U(-1/sqrt(H), 1/sqrt(H)) init."""
    bound = 1.0 / float(hid_size) ** 0.5
    params = {"gru": []}
    for layer in range(hid_layers):
        in_sz = input_size if layer == 0 else hid_size
        key, k1, k2, k3, k4 = jax.random.split(key, 5)
        w_ih = jax.random.uniform(k1, (3 * hid_size, in_sz), jnp.float32,
                                  -bound, bound)
        w_hh = jax.random.uniform(k2, (3 * hid_size, hid_size), jnp.float32,
                                  -bound, bound)
        b_ih = jax.random.uniform(k3, (3 * hid_size,), jnp.float32,
                                  -bound, bound)
        b_hh = jax.random.uniform(k4, (3 * hid_size,), jnp.float32,
                                  -bound, bound)
        params["gru"].append((w_ih, w_hh, b_ih, b_hh))
    key, k5, k6 = jax.random.split(key, 3)
    params["lin_w"] = jax.random.uniform(k5, (output_size, hid_size),
                                         jnp.float32, -bound, bound)
    params["lin_b"] = jax.random.uniform(k6, (output_size,), jnp.float32,
                                         -bound, bound)
    return params


def prepare_params(params, hid_size, output_size):
    """Repack PyTorch weights for the kernel (done once, off the hot path):
       - split fused (3H, .) matrices per gate and transpose for right-mult,
       - zero-pad hidden dim to Hp (multiple of 128) for lane-dense layout,
       - concatenate the 3 gates along columns at 128-lane block boundaries,
       - pre-sum r/z biases, fold b_ih_n into the projection bias,
       - pad the Linear head to Op columns (zero weights, -1e30 bias)."""
    H = hid_size
    Hp = _round_up(H, 128)
    O = output_size
    Op = _round_up(O, 128)

    layers = []
    for li, (w_ih, w_hh, b_ih, b_hh) in enumerate(params["gru"]):
        in_sz = w_ih.shape[1]
        in_p = in_sz if li == 0 else Hp    # layer>0 consumes padded hidden
        w_ih_cat = jnp.zeros((in_p, 3 * Hp), jnp.float32)
        w_hh_cat = jnp.zeros((Hp, 3 * Hp), jnp.float32)
        b_cat = jnp.zeros((1, 3 * Hp), jnp.float32)
        b_hn = jnp.zeros((1, Hp), jnp.float32)
        for g in range(3):                 # PyTorch gate order: r, z, n
            wi = w_ih[g * H:(g + 1) * H, :].T          # (in_sz, H)
            wh = w_hh[g * H:(g + 1) * H, :].T          # (H, H)
            w_ih_cat = w_ih_cat.at[:in_sz, g * Hp:g * Hp + H].set(wi)
            w_hh_cat = w_hh_cat.at[:H, g * Hp:g * Hp + H].set(wh)
            if g < 2:   # r, z: both biases fold into the projection bias
                b_cat = b_cat.at[0, g * Hp:g * Hp + H].set(
                    b_ih[g * H:(g + 1) * H] + b_hh[g * H:(g + 1) * H])
            else:       # n: only b_ih folds; b_hh_n stays inside r * (.)
                b_cat = b_cat.at[0, g * Hp:g * Hp + H].set(
                    b_ih[g * H:(g + 1) * H])
        b_hn = b_hn.at[0, :H].set(b_hh[2 * H:3 * H])
        layers.append((w_ih_cat, w_hh_cat, b_cat, b_hn))

    lin_w_p = jnp.zeros((Hp, Op), jnp.float32).at[:H, :O].set(
        params["lin_w"].T)
    lin_b_p = jnp.full((1, Op), -1e30, jnp.float32).at[0, :O].set(
        params["lin_b"])
    return {"layers": layers, "lin_w": lin_w_p, "lin_b": lin_b_p}


# ----------------------------------------------------------------------------
# Full forward (jitted): pad batch to sublane multiple, run fused kernel
# ----------------------------------------------------------------------------
@functools.partial(jax.jit, static_argnames=("H", "O"))
def gru_nn_forward(prepped, input_data, *, H, O):
    T, B, I = input_data.shape
    layers = prepped["layers"]
    num_layers = len(layers)
    Hp = layers[0][1].shape[0]          # w_hh_cat is (Hp, 3*Hp)
    Op = prepped["lin_w"].shape[1]
    Bp = ((B + 7) // 8) * 8             # pad batch to a sublane multiple (>=8)

    x_pad = jnp.pad(input_data, ((0, 0), (0, Bp - B), (0, 0)))
    x2 = x_pad.reshape(T * Bp, I).astype(jnp.float32)

    flat = []
    for lp in layers:
        flat.extend(lp)
    flat.extend([prepped["lin_w"], prepped["lin_b"]])

    out2, hn = _fused_forward(x2, tuple(flat), T=T, Bp=Bp, Hp=Hp, Op=Op,
                              num_layers=num_layers,
                              out_dtype=input_data.dtype)
    out = out2.reshape(T, Bp, Op)[:, :B, :O]
    h_n = hn[:, :B, :H]
    return out, h_n


# ----------------------------------------------------------------------------
# Pure-JAX reference (PyTorch eval-mode semantics) for correctness checking
# ----------------------------------------------------------------------------
def gru_nn_reference(params, x):
    hp = jax.lax.Precision.HIGHEST
    H = params["gru"][0][1].shape[1]
    out = x
    h_last = []
    for (w_ih, w_hh, b_ih, b_hh) in params["gru"]:
        T, B, _ = out.shape
        h = jnp.zeros((B, H), jnp.float32)
        ys = []
        for t in range(T):
            gi = jnp.dot(out[t], w_ih.T, precision=hp) + b_ih
            gh = jnp.dot(h, w_hh.T, precision=hp) + b_hh
            i_r, i_z, i_n = jnp.split(gi, 3, axis=-1)
            h_r, h_z, h_nn = jnp.split(gh, 3, axis=-1)
            r = jax.nn.sigmoid(i_r + h_r)
            z = jax.nn.sigmoid(i_z + h_z)
            n = jnp.tanh(i_n + r * h_nn)
            h = (1.0 - z) * n + z * h
            ys.append(h)
        out = jnp.stack(ys, axis=0)
        h_last.append(h)
    h_n = jnp.stack(h_last, axis=0)
    logits = jnp.dot(out, params["lin_w"].T, precision=hp) + params["lin_b"]
    return jax.nn.log_softmax(logits, axis=2), h_n


if __name__ == "__main__":
    # small shapes consistent with the module
    seq_len = 8
    batch = 2
    input_size = 16
    hid_size = 32
    hid_layers = 2
    output_size = 8

    key = jax.random.PRNGKey(0)
    key, k_in = jax.random.split(key)
    input_data = jax.random.normal(k_in, (seq_len, batch, input_size),
                                   jnp.float32)

    params = init_params(key, input_size, hid_size, hid_layers, output_size)
    prepped = prepare_params(params, hid_size, output_size)

    out, h_n = gru_nn_forward(prepped, input_data, H=hid_size, O=output_size)
    jax.block_until_ready((out, h_n))

    assert out.shape == (seq_len, batch, output_size)
    assert h_n.shape == (hid_layers, batch, hid_size)
    # log_softmax rows must exp-sum to 1
    assert jnp.allclose(jnp.sum(jnp.exp(out), axis=-1), 1.0, atol=1e-4)

    # numerical check against a pure-JAX reference of the PyTorch forward
    out_ref, h_n_ref = gru_nn_reference(params, input_data)
    assert jnp.allclose(out, out_ref, atol=5e-3, rtol=1e-3), "output mismatch"
    assert jnp.allclose(h_n, h_n_ref, atol=5e-3, rtol=1e-3), "h_n mismatch"

    print("KERNEL_OK")
</pallas_src>

<mosaic_0001>
module attributes {stable_mosaic.version = 11 : i64} {
  func.func @kernel(%arg0: memref<64x16xf32, #tpu.memory_space<vmem>>, %arg1: memref<16x384xf32, #tpu.memory_space<vmem>>, %arg2: memref<128x384xf32, #tpu.memory_space<vmem>>, %arg3: memref<1x384xf32, #tpu.memory_space<vmem>>, %arg4: memref<1x128xf32, #tpu.memory_space<vmem>>, %arg5: memref<128x384xf32, #tpu.memory_space<vmem>>, %arg6: memref<128x384xf32, #tpu.memory_space<vmem>>, %arg7: memref<1x384xf32, #tpu.memory_space<vmem>>, %arg8: memref<1x128xf32, #tpu.memory_space<vmem>>, %arg9: memref<128x128xf32, #tpu.memory_space<vmem>>, %arg10: memref<1x128xf32, #tpu.memory_space<vmem>>, %arg11: memref<64x128xf32, #tpu.memory_space<vmem>>, %arg12: memref<2x8x128xf32, #tpu.memory_space<vmem>>, %arg13: memref<64x128xf32, #tpu.memory_space<vmem>>) attributes {dimension_semantics = [], scalar_prefetch = 0 : i64, scratch_operands = 1 : i64, tpu.core_type = #tpu.core_type<tc>} {
    %c0 = arith.constant 0 : index
    %c0_0 = arith.constant 0 : index
    %0 = vector.load %arg0[%c0, %c0_0] : memref<64x16xf32, #tpu.memory_space<vmem>>, vector<64x16xf32>
    %c0_1 = arith.constant 0 : index
    %c0_2 = arith.constant 0 : index
    %1 = vector.load %arg1[%c0_1, %c0_2] : memref<16x384xf32, #tpu.memory_space<vmem>>, vector<16x384xf32>
    %cst = arith.constant dense<0.000000e+00> : vector<64x384xf32>
    %2 = tpu.matmul %0, %1, %cst {dimension_numbers = #tpu.dot_dimension_numbers<[1], [0], [0], [1], [0, 0, 1, 1], [], []>} : vector<64x16xf32>, vector<16x384xf32>, vector<64x384xf32> -> vector<64x384xf32>
    %c0_3 = arith.constant 0 : index
    %c0_4 = arith.constant 0 : index
    %3 = vector.load %arg3[%c0_3, %c0_4] : memref<1x384xf32, #tpu.memory_space<vmem>>, vector<1x384xf32>
    %4 = vector.broadcast %3 : vector<1x384xf32> to vector<64x384xf32>
    %5 = arith.addf %2, %4 : vector<64x384xf32>
    %c0_5 = arith.constant 0 : index
    %c0_6 = arith.constant 0 : index
    %6 = vector.load %arg2[%c0_5, %c0_6] : memref<128x384xf32, #tpu.memory_space<vmem>>, vector<128x384xf32>
    %c0_7 = arith.constant 0 : index
    %c0_8 = arith.constant 0 : index
    %7 = vector.load %arg4[%c0_7, %c0_8] : memref<1x128xf32, #tpu.memory_space<vmem>>, vector<1x128xf32>
    %8 = vector.shape_cast %7 : vector<1x128xf32> to vector<1x128xf32>
    %9 = vector.broadcast %8 : vector<1x128xf32> to vector<8x128xf32>
    %cst_9 = arith.constant 0.000000e+00 : f32
    %10 = vector.broadcast %cst_9 : f32 to vector<8x128xf32>
    %cst_10 = arith.constant dense<0.000000e+00> : vector<8x384xf32>
    %11 = tpu.matmul %10, %6, %cst_10 {dimension_numbers = #tpu.dot_dimension_numbers<[1], [0], [0], [1], [0, 0, 1, 1], [], []>} : vector<8x128xf32>, vector<128x384xf32>, vector<8x384xf32> -> vector<8x384xf32>
    %12 = vector.extract_strided_slice %5 {offsets = [0, 0], sizes = [8, 384], strides = [1, 1]} : vector<64x384xf32> to vector<8x384xf32>
    %13 = vector.extract_strided_slice %12 {offsets = [0, 0], sizes = [8, 128], strides = [1, 1]} : vector<8x384xf32> to vector<8x128xf32>
    %14 = vector.extract_strided_slice %11 {offsets = [0, 0], sizes = [8, 128], strides = [1, 1]} : vector<8x384xf32> to vector<8x128xf32>
    %15 = arith.addf %13, %14 : vector<8x128xf32>
    %16 = arith.negf %15 : vector<8x128xf32>
    %17 = math.exp %16 : vector<8x128xf32>
    %cst_11 = arith.constant 1.000000e+00 : f32
    %18 = vector.broadcast %cst_11 : f32 to vector<8x128xf32>
    %19 = arith.addf %18, %17 : vector<8x128xf32>
    %20 = arith.divf %18, %19 : vector<8x128xf32>
    %21 = vector.extract_strided_slice %12 {offsets = [0, 128], sizes = [8, 128], strides = [1, 1]} : vector<8x384xf32> to vector<8x128xf32>
    %22 = vector.extract_strided_slice %11 {offsets = [0, 128], sizes = [8, 128], strides = [1, 1]} : vector<8x384xf32> to vector<8x128xf32>
    %23 = arith.addf %21, %22 : vector<8x128xf32>
    %24 = arith.negf %23 : vector<8x128xf32>
    %25 = math.exp %24 : vector<8x128xf32>
    %cst_12 = arith.constant 1.000000e+00 : f32
    %26 = vector.broadcast %cst_12 : f32 to vector<8x128xf32>
    %27 = arith.addf %26, %25 : vector<8x128xf32>
    %28 = arith.divf %26, %27 : vector<8x128xf32>
    %29 = vector.extract_strided_slice %12 {offsets = [0, 256], sizes = [8, 128], strides = [1, 1]} : vector<8x384xf32> to vector<8x128xf32>
    %30 = vector.extract_strided_slice %11 {offsets = [0, 256], sizes = [8, 128], strides = [1, 1]} : vector<8x384xf32> to vector<8x128xf32>
    %31 = arith.addf %30, %9 : vector<8x128xf32>
    %32 = arith.mulf %20, %31 : vector<8x128xf32>
    %33 = arith.addf %29, %32 : vector<8x128xf32>
    %34 = math.tanh %33 : vector<8x128xf32>
    %cst_13 = arith.constant 1.000000e+00 : f32
    %35 = vector.broadcast %cst_13 : f32 to vector<8x128xf32>
    %36 = arith.subf %35, %28 : vector<8x128xf32>
    %37 = arith.mulf %36, %34 : vector<8x128xf32>
    %38 = arith.mulf %28, %10 : vector<8x128xf32>
    %39 = arith.addf %37, %38 : vector<8x128xf32>
    %c0_14 = arith.constant 0 : index
    %c0_15 = arith.constant 0 : index
    %40 = vector.load %arg13[%c0_14, %c0_15] : memref<64x128xf32, #tpu.memory_space<vmem>>, vector<8x128xf32>
    tpu.vector_store %arg13[%c0_14, %c0_15], %39 {strides = array<i32>} : memref<64x128xf32, #tpu.memory_space<vmem>>, vector<8x128xf32>,
    %cst_16 = arith.constant dense<0.000000e+00> : vector<8x384xf32>
    %41 = tpu.matmul %39, %6, %cst_16 {dimension_numbers = #tpu.dot_dimension_numbers<[1], [0], [0], [1], [0, 0, 1, 1], [], []>} : vector<8x128xf32>, vector<128x384xf32>, vector<8x384xf32> -> vector<8x384xf32>
    %42 = vector.extract_strided_slice %5 {offsets = [8, 0], sizes = [8, 384], strides = [1, 1]} : vector<64x384xf32> to vector<8x384xf32>
    %43 = vector.extract_strided_slice %42 {offsets = [0, 0], sizes = [8, 128], strides = [1, 1]} : vector<8x384xf32> to vector<8x128xf32>
    %44 = vector.extract_strided_slice %41 {offsets = [0, 0], sizes = [8, 128], strides = [1, 1]} : vector<8x384xf32> to vector<8x128xf32>
    %45 = arith.addf %43, %44 : vector<8x128xf32>
    %46 = arith.negf %45 : vector<8x128xf32>
    %47 = math.exp %46 : vector<8x128xf32>
    %cst_17 = arith.constant 1.000000e+00 : f32
    %48 = vector.broadcast %cst_17 : f32 to vector<8x128xf32>
    %49 = arith.addf %48, %47 : vector<8x128xf32>
    %50 = arith.divf %48, %49 : vector<8x128xf32>
    %51 = vector.extract_strided_slice %42 {offsets = [0, 128], sizes = [8, 128], strides = [1, 1]} : vector<8x384xf32> to vector<8x128xf32>
    %52 = vector.extract_strided_slice %41 {offsets = [0, 128], sizes = [8, 128], strides = [1, 1]} : vector<8x384xf32> to vector<8x128xf32>
    %53 = arith.addf %51, %52 : vector<8x128xf32>
    %54 = arith.negf %53 : vector<8x128xf32>
    %55 = math.exp %54 : vector<8x128xf32>
    %cst_18 = arith.constant 1.000000e+00 : f32
    %56 = vector.broadcast %cst_18 : f32 to vector<8x128xf32>
    %57 = arith.addf %56, %55 : vector<8x128xf32>
    %58 = arith.divf %56, %57 : vector<8x128xf32>
    %59 = vector.extract_strided_slice %42 {offsets = [0, 256], sizes = [8, 128], strides = [1, 1]} : vector<8x384xf32> to vector<8x128xf32>
    %60 = vector.extract_strided_slice %41 {offsets = [0, 256], sizes = [8, 128], strides = [1, 1]} : vector<8x384xf32> to vector<8x128xf32>
    %61 = arith.addf %60, %9 : vector<8x128xf32>
    %62 = arith.mulf %50, %61 : vector<8x128xf32>
    %63 = arith.addf %59, %62 : vector<8x128xf32>
    %64 = math.tanh %63 : vector<8x128xf32>
    %cst_19 = arith.constant 1.000000e+00 : f32
    %65 = vector.broadcast %cst_19 : f32 to vector<8x128xf32>
    %66 = arith.subf %65, %58 : vector<8x128xf32>
    %67 = arith.mulf %66, %64 : vector<8x128xf32>
    %68 = arith.mulf %58, %39 : vector<8x128xf32>
    %69 = arith.addf %67, %68 : vector<8x128xf32>
    %c8 = arith.constant 8 : index
    %c0_20 = arith.constant 0 : index
    %70 = vector.load %arg13[%c8, %c0_20] : memref<64x128xf32, #tpu.memory_space<vmem>>, vector<8x128xf32>
    tpu.vector_store %arg13[%c8, %c0_20], %69 {strides = array<i32>} : memref<64x128xf32, #tpu.memory_space<vmem>>, vector<8x128xf32>,
    %cst_21 = arith.constant dense<0.000000e+00> : vector<8x384xf32>
    %71 = tpu.matmul %69, %6, %cst_21 {dimension_numbers = #tpu.dot_dimension_numbers<[1], [0], [0], [1], [0, 0, 1, 1], [], []>} : vector<8x128xf32>, vector<128x384xf32>, vector<8x384xf32> -> vector<8x384xf32>
    %72 = vector.extract_strided_slice %5 {offsets = [16, 0], sizes = [8, 384], strides = [1, 1]} : vector<64x384xf32> to vector<8x384xf32>
    %73 = vector.extract_strided_slice %72 {offsets = [0, 0], sizes = [8, 128], strides = [1, 1]} : vector<8x384xf32> to vector<8x128xf32>
    %74 = vector.extract_strided_slice %71 {offsets = [0, 0], sizes = [8, 128], strides = [1, 1]} : vector<8x384xf32> to vector<8x128xf32>
    %75 = arith.addf %73, %74 : vector<8x128xf32>
    %76 = arith.negf %75 : vector<8x128xf32>
    %77 = math.exp %76 : vector<8x128xf32>
    %cst_22 = arith.constant 1.000000e+00 : f32
    %78 = vector.broadcast %cst_22 : f32 to vector<8x128xf32>
    %79 = arith.addf %78, %77 : vector<8x128xf32>
    %80 = arith.divf %78, %79 : vector<8x128xf32>
    %81 = vector.extract_strided_slice %72 {offsets = [0, 128], sizes = [8, 128], strides = [1, 1]} : vector<8x384xf32> to vector<8x128xf32>
    %82 = vector.extract_strided_slice %71 {offsets = [0, 128], sizes = [8, 128], strides = [1, 1]} : vector<8x384xf32> to vector<8x128xf32>
    %83 = arith.addf %81, %82 : vector<8x128xf32>
    %84 = arith.negf %83 : vector<8x128xf32>
    %85 = math.exp %84 : vector<8x128xf32>
    %cst_23 = arith.constant 1.000000e+00 : f32
    %86 = vector.broadcast %cst_23 : f32 to vector<8x128xf32>
    %87 = arith.addf %86, %85 : vector<8x128xf32>
    %88 = arith.divf %86, %87 : vector<8x128xf32>
    %89 = vector.extract_strided_slice %72 {offsets = [0, 256], sizes = [8, 128], strides = [1, 1]} : vector<8x384xf32> to vector<8x128xf32>
    %90 = vector.extract_strided_slice %71 {offsets = [0, 256], sizes = [8, 128], strides = [1, 1]} : vector<8x384xf32> to vector<8x128xf32>
    %91 = arith.addf %90, %9 : vector<8x128xf32>
    %92 = arith.mulf %80, %91 : vector<8x128xf32>
    %93 = arith.addf %89, %92 : vector<8x128xf32>
    %94 = math.tanh %93 : vector<8x128xf32>
    %cst_24 = arith.constant 1.000000e+00 : f32
    %95 = vector.broadcast %cst_24 : f32 to vector<8x128xf32>
    %96 = arith.subf %95, %88 : vector<8x128xf32>
    %97 = arith.mulf %96, %94 : vector<8x128xf32>
    %98 = arith.mulf %88, %69 : vector<8x128xf32>
    %99 = arith.addf %97, %98 : vector<8x128xf32>
    %c16 = arith.constant 16 : index
    %c0_25 = arith.constant 0 : index
    %100 = vector.load %arg13[%c16, %c0_25] : memref<64x128xf32, #tpu.memory_space<vmem>>, vector<8x128xf32>
    tpu.vector_store %arg13[%c16, %c0_25], %99 {strides = array<i32>} : memref<64x128xf32, #tpu.memory_space<vmem>>, vector<8x128xf32>,
    %cst_26 = arith.constant dense<0.000000e+00> : vector<8x384xf32>
    %101 = tpu.matmul %99, %6, %cst_26 {dimension_numbers = #tpu.dot_dimension_numbers<[1], [0], [0], [1], [0, 0, 1, 1], [], []>} : vector<8x128xf32>, vector<128x384xf32>, vector<8x384xf32> -> vector<8x384xf32>
    %102 = vector.extract_strided_slice %5 {offsets = [24, 0], sizes = [8, 384], strides = [1, 1]} : vector<64x384xf32> to vector<8x384xf32>
    %103 = vector.extract_strided_slice %102 {offsets = [0, 0], sizes = [8, 128], strides = [1, 1]} : vector<8x384xf32> to vector<8x128xf32>
    %104 = vector.extract_strided_slice %101 {offsets = [0, 0], sizes = [8, 128], strides = [1, 1]} : vector<8x384xf32> to vector<8x128xf32>
    %105 = arith.addf %103, %104 : vector<8x128xf32>
    %106 = arith.negf %105 : vector<8x128xf32>
    %107 = math.exp %106 : vector<8x128xf32>
    %cst_27 = arith.constant 1.000000e+00 : f32
    %108 = vector.broadcast %cst_27 : f32 to vector<8x128xf32>
    %109 = arith.addf %108, %107 : vector<8x128xf32>
    %110 = arith.divf %108, %109 : vector<8x128xf32>
    %111 = vector.extract_strided_slice %102 {offsets = [0, 128], sizes = [8, 128], strides = [1, 1]} : vector<8x384xf32> to vector<8x128xf32>
    %112 = vector.extract_strided_slice %101 {offsets = [0, 128], sizes = [8, 128], strides = [1, 1]} : vector<8x384xf32> to vector<8x128xf32>
    %113 = arith.addf %111, %112 : vector<8x128xf32>
    %114 = arith.negf %113 : vector<8x128xf32>
    %115 = math.exp %114 : vector<8x128xf32>
    %cst_28 = arith.constant 1.000000e+00 : f32
    %116 = vector.broadcast %cst_28 : f32 to vector<8x128xf32>
    %117 = arith.addf %116, %115 : vector<8x128xf32>
    %118 = arith.divf %116, %117 : vector<8x128xf32>
    %119 = vector.extract_strided_slice %102 {offsets = [0, 256], sizes = [8, 128], strides = [1, 1]} : vector<8x384xf32> to vector<8x128xf32>
    %120 = vector.extract_strided_slice %101 {offsets = [0, 256], sizes = [8, 128], strides = [1, 1]} : vector<8x384xf32> to vector<8x128xf32>
    %121 = arith.addf %120, %9 : vector<8x128xf32>
    %122 = arith.mulf %110, %121 : vector<8x128xf32>
    %123 = arith.addf %119, %122 : vector<8x128xf32>
    %124 = math.tanh %123 : vector<8x128xf32>
    %cst_29 = arith.constant 1.000000e+00 : f32
    %125 = vector.broadcast %cst_29 : f32 to vector<8x128xf32>
    %126 = arith.subf %125, %118 : vector<8x128xf32>
    %127 = arith.mulf %126, %124 : vector<8x128xf32>
    %128 = arith.mulf %118, %99 : vector<8x128xf32>
    %129 = arith.addf %127, %128 : vector<8x128xf32>
    %c24 = arith.constant 24 : index
    %c0_30 = arith.constant 0 : index
    %130 = vector.load %arg13[%c24, %c0_30] : memref<64x128xf32, #tpu.memory_space<vmem>>, vector<8x128xf32>
    tpu.vector_store %arg13[%c24, %c0_30], %129 {strides = array<i32>} : memref<64x128xf32, #tpu.memory_space<vmem>>, vector<8x128xf32>,
    %cst_31 = arith.constant dense<0.000000e+00> : vector<8x384xf32>
    %131 = tpu.matmul %129, %6, %cst_31 {dimension_numbers = #tpu.dot_dimension_numbers<[1], [0], [0], [1], [0, 0, 1, 1], [], []>} : vector<8x128xf32>, vector<128x384xf32>, vector<8x384xf32> -> vector<8x384xf32>
    %132 = vector.extract_strided_slice %5 {offsets = [32, 0], sizes = [8, 384], strides = [1, 1]} : vector<64x384xf32> to vector<8x384xf32>
    %133 = vector.extract_strided_slice %132 {offsets = [0, 0], sizes = [8, 128], strides = [1, 1]} : vector<8x384xf32> to vector<8x128xf32>
    %134 = vector.extract_strided_slice %131 {offsets = [0, 0], sizes = [8, 128], strides = [1, 1]} : vector<8x384xf32> to vector<8x128xf32>
    %135 = arith.addf %133, %134 : vector<8x128xf32>
    %136 = arith.negf %135 : vector<8x128xf32>
    %137 = math.exp %136 : vector<8x128xf32>
    %cst_32 = arith.constant 1.000000e+00 : f32
    %138 = vector.broadcast %cst_32 : f32 to vector<8x128xf32>
    %139 = arith.addf %138, %137 : vector<8x128xf32>
    %140 = arith.divf %138, %139 : vector<8x128xf32>
    %141 = vector.extract_strided_slice %132 {offsets = [0, 128], sizes = [8, 128], strides = [1, 1]} : vector<8x384xf32> to vector<8x128xf32>
    %142 = vector.extract_strided_slice %131 {offsets = [0, 128], sizes = [8, 128], strides = [1, 1]} : vector<8x384xf32> to vector<8x128xf32>
    %143 = arith.addf %141, %142 : vector<8x128xf32>
    %144 = arith.negf %143 : vector<8x128xf32>
    %145 = math.exp %144 : vector<8x128xf32>
    %cst_33 = arith.constant 1.000000e+00 : f32
    %146 = vector.broadcast %cst_33 : f32 to vector<8x128xf32>
    %147 = arith.addf %146, %145 : vector<8x128xf32>
    %148 = arith.divf %146, %147 : vector<8x128xf32>
    %149 = vector.extract_strided_slice %132 {offsets = [0, 256], sizes = [8, 128], strides = [1, 1]} : vector<8x384xf32> to vector<8x128xf32>
    %150 = vector.extract_strided_slice %131 {offsets = [0, 256], sizes = [8, 128], strides = [1, 1]} : vector<8x384xf32> to vector<8x128xf32>
    %151 = arith.addf %150, %9 : vector<8x128xf32>
    %152 = arith.mulf %140, %151 : vector<8x128xf32>
    %153 = arith.addf %149, %152 : vector<8x128xf32>
    %154 = math.tanh %153 : vector<8x128xf32>
    %cst_34 = arith.constant 1.000000e+00 : f32
    %155 = vector.broadcast %cst_34 : f32 to vector<8x128xf32>
    %156 = arith.subf %155, %148 : vector<8x128xf32>
    %157 = arith.mulf %156, %154 : vector<8x128xf32>
    %158 = arith.mulf %148, %129 : vector<8x128xf32>
    %159 = arith.addf %157, %158 : vector<8x128xf32>
    %c32 = arith.constant 32 : index
    %c0_35 = arith.constant 0 : index
    %160 = vector.load %arg13[%c32, %c0_35] : memref<64x128xf32, #tpu.memory_space<vmem>>, vector<8x128xf32>
    tpu.vector_store %arg13[%c32, %c0_35], %159 {strides = array<i32>} : memref<64x128xf32, #tpu.memory_space<vmem>>, vector<8x128xf32>,
    %cst_36 = arith.constant dense<0.000000e+00> : vector<8x384xf32>
    %161 = tpu.matmul %159, %6, %cst_36 {dimension_numbers = #tpu.dot_dimension_numbers<[1], [0], [0], [1], [0, 0, 1, 1], [], []>} : vector<8x128xf32>, vector<128x384xf32>, vector<8x384xf32> -> vector<8x384xf32>
    %162 = vector.extract_strided_slice %5 {offsets = [40, 0], sizes = [8, 384], strides = [1, 1]} : vector<64x384xf32> to vector<8x384xf32>
    %163 = vector.extract_strided_slice %162 {offsets = [0, 0], sizes = [8, 128], strides = [1, 1]} : vector<8x384xf32> to vector<8x128xf32>
    %164 = vector.extract_strided_slice %161 {offsets = [0, 0], sizes = [8, 128], strides = [1, 1]} : vector<8x384xf32> to vector<8x128xf32>
    %165 = arith.addf %163, %164 : vector<8x128xf32>
    %166 = arith.negf %165 : vector<8x128xf32>
    %167 = math.exp %166 : vector<8x128xf32>
    %cst_37 = arith.constant 1.000000e+00 : f32
    %168 = vector.broadcast %cst_37 : f32 to vector<8x128xf32>
    %169 = arith.addf %168, %167 : vector<8x128xf32>
    %170 = arith.divf %168, %169 : vector<8x128xf32>
    %171 = vector.extract_strided_slice %162 {offsets = [0, 128], sizes = [8, 128], strides = [1, 1]} : vector<8x384xf32> to vector<8x128xf32>
    %172 = vector.extract_strided_slice %161 {offsets = [0, 128], sizes = [8, 128], strides = [1, 1]} : vector<8x384xf32> to vector<8x128xf32>
    %173 = arith.addf %171, %172 : vector<8x128xf32>
    %174 = arith.negf %173 : vector<8x128xf32>
    %175 = math.exp %174 : vector<8x128xf32>
    %cst_38 = arith.constant 1.000000e+00 : f32
    %176 = vector.broadcast %cst_38 : f32 to vector<8x128xf32>
    %177 = arith.addf %176, %175 : vector<8x128xf32>
    %178 = arith.divf %176, %177 : vector<8x128xf32>
    %179 = vector.extract_strided_slice %162 {offsets = [0, 256], sizes = [8, 128], strides = [1, 1]} : vector<8x384xf32> to vector<8x128xf32>
    %180 = vector.extract_strided_slice %161 {offsets = [0, 256], sizes = [8, 128], strides = [1, 1]} : vector<8x384xf32> to vector<8x128xf32>
    %181 = arith.addf %180, %9 : vector<8x128xf32>
    %182 = arith.mulf %170, %181 : vector<8x128xf32>
    %183 = arith.addf %179, %182 : vector<8x128xf32>
    %184 = math.tanh %183 : vector<8x128xf32>
    %cst_39 = arith.constant 1.000000e+00 : f32
    %185 = vector.broadcast %cst_39 : f32 to vector<8x128xf32>
    %186 = arith.subf %185, %178 : vector<8x128xf32>
    %187 = arith.mulf %186, %184 : vector<8x128xf32>
    %188 = arith.mulf %178, %159 : vector<8x128xf32>
    %189 = arith.addf %187, %188 : vector<8x128xf32>
    %c40 = arith.constant 40 : index
    %c0_40 = arith.constant 0 : index
    %190 = vector.load %arg13[%c40, %c0_40] : memref<64x128xf32, #tpu.memory_space<vmem>>, vector<8x128xf32>
    tpu.vector_store %arg13[%c40, %c0_40], %189 {strides = array<i32>} : memref<64x128xf32, #tpu.memory_space<vmem>>, vector<8x128xf32>,
    %cst_41 = arith.constant dense<0.000000e+00> : vector<8x384xf32>
    %191 = tpu.matmul %189, %6, %cst_41 {dimension_numbers = #tpu.dot_dimension_numbers<[1], [0], [0], [1], [0, 0, 1, 1], [], []>} : vector<8x128xf32>, vector<128x384xf32>, vector<8x384xf32> -> vector<8x384xf32>
    %192 = vector.extract_strided_slice %5 {offsets = [48, 0], sizes = [8, 384], strides = [1, 1]} : vector<64x384xf32> to vector<8x384xf32>
    %193 = vector.extract_strided_slice %192 {offsets = [0, 0], sizes = [8, 128], strides = [1, 1]} : vector<8x384xf32> to vector<8x128xf32>
    %194 = vector.extract_strided_slice %191 {offsets = [0, 0], sizes = [8, 128], strides = [1, 1]} : vector<8x384xf32> to vector<8x128xf32>
    %195 = arith.addf %193, %194 : vector<8x128xf32>
    %196 = arith.negf %195 : vector<8x128xf32>
    %197 = math.exp %196 : vector<8x128xf32>
    %cst_42 = arith.constant 1.000000e+00 : f32
    %198 = vector.broadcast %cst_42 : f32 to vector<8x128xf32>
    %199 = arith.addf %198, %197 : vector<8x128xf32>
    %200 = arith.divf %198, %199 : vector<8x128xf32>
    %201 = vector.extract_strided_slice %192 {offsets = [0, 128], sizes = [8, 128], strides = [1, 1]} : vector<8x384xf32> to vector<8x128xf32>
    %202 = vector.extract_strided_slice %191 {offsets = [0, 128], sizes = [8, 128], strides = [1, 1]} : vector<8x384xf32> to vector<8x128xf32>
    %203 = arith.addf %201, %202 : vector<8x128xf32>
    %204 = arith.negf %203 : vector<8x128xf32>
    %205 = math.exp %204 : vector<8x128xf32>
    %cst_43 = arith.constant 1.000000e+00 : f32
    %206 = vector.broadcast %cst_43 : f32 to vector<8x128xf32>
    %207 = arith.addf %206, %205 : vector<8x128xf32>
    %208 = arith.divf %206, %207 : vector<8x128xf32>
    %209 = vector.extract_strided_slice %192 {offsets = [0, 256], sizes = [8, 128], strides = [1, 1]} : vector<8x384xf32> to vector<8x128xf32>
    %210 = vector.extract_strided_slice %191 {offsets = [0, 256], sizes = [8, 128], strides = [1, 1]} : vector<8x384xf32> to vector<8x128xf32>
    %211 = arith.addf %210, %9 : vector<8x128xf32>
    %212 = arith.mulf %200, %211 : vector<8x128xf32>
    %213 = arith.addf %209, %212 : vector<8x128xf32>
    %214 = math.tanh %213 : vector<8x128xf32>
    %cst_44 = arith.constant 1.000000e+00 : f32
    %215 = vector.broadcast %cst_44 : f32 to vector<8x128xf32>
    %216 = arith.subf %215, %208 : vector<8x128xf32>
    %217 = arith.mulf %216, %214 : vector<8x128xf32>
    %218 = arith.mulf %208, %189 : vector<8x128xf32>
    %219 = arith.addf %217, %218 : vector<8x128xf32>
    %c48 = arith.constant 48 : index
    %c0_45 = arith.constant 0 : index
    %220 = vector.load %arg13[%c48, %c0_45] : memref<64x128xf32, #tpu.memory_space<vmem>>, vector<8x128xf32>
    tpu.vector_store %arg13[%c48, %c0_45], %219 {strides = array<i32>} : memref<64x128xf32, #tpu.memory_space<vmem>>, vector<8x128xf32>,
    %cst_46 = arith.constant dense<0.000000e+00> : vector<8x384xf32>
    %221 = tpu.matmul %219, %6, %cst_46 {dimension_numbers = #tpu.dot_dimension_numbers<[1], [0], [0], [1], [0, 0, 1, 1], [], []>} : vector<8x128xf32>, vector<128x384xf32>, vector<8x384xf32> -> vector<8x384xf32>
    %222 = vector.extract_strided_slice %5 {offsets = [56, 0], sizes = [8, 384], strides = [1, 1]} : vector<64x384xf32> to vector<8x384xf32>
    %223 = vector.extract_strided_slice %222 {offsets = [0, 0], sizes = [8, 128], strides = [1, 1]} : vector<8x384xf32> to vector<8x128xf32>
    %224 = vector.extract_strided_slice %221 {offsets = [0, 0], sizes = [8, 128], strides = [1, 1]} : vector<8x384xf32> to vector<8x128xf32>
    %225 = arith.addf %223, %224 : vector<8x128xf32>
    %226 = arith.negf %225 : vector<8x128xf32>
    %227 = math.exp %226 : vector<8x128xf32>
    %cst_47 = arith.constant 1.000000e+00 : f32
    %228 = vector.broadcast %cst_47 : f32 to vector<8x128xf32>
    %229 = arith.addf %228, %227 : vector<8x128xf32>
    %230 = arith.divf %228, %229 : vector<8x128xf32>
    %231 = vector.extract_strided_slice %222 {offsets = [0, 128], sizes = [8, 128], strides = [1, 1]} : vector<8x384xf32> to vector<8x128xf32>
    %232 = vector.extract_strided_slice %221 {offsets = [0, 128], sizes = [8, 128], strides = [1, 1]} : vector<8x384xf32> to vector<8x128xf32>
    %233 = arith.addf %231, %232 : vector<8x128xf32>
    %234 = arith.negf %233 : vector<8x128xf32>
    %235 = math.exp %234 : vector<8x128xf32>
    %cst_48 = arith.constant 1.000000e+00 : f32
    %236 = vector.broadcast %cst_48 : f32 to vector<8x128xf32>
    %237 = arith.addf %236, %235 : vector<8x128xf32>
    %238 = arith.divf %236, %237 : vector<8x128xf32>
    %239 = vector.extract_strided_slice %222 {offsets = [0, 256], sizes = [8, 128], strides = [1, 1]} : vector<8x384xf32> to vector<8x128xf32>
    %240 = vector.extract_strided_slice %221 {offsets = [0, 256], sizes = [8, 128], strides = [1, 1]} : vector<8x384xf32> to vector<8x128xf32>
    %241 = arith.addf %240, %9 : vector<8x128xf32>
    %242 = arith.mulf %230, %241 : vector<8x128xf32>
    %243 = arith.addf %239, %242 : vector<8x128xf32>
    %244 = math.tanh %243 : vector<8x128xf32>
    %cst_49 = arith.constant 1.000000e+00 : f32
    %245 = vector.broadcast %cst_49 : f32 to vector<8x128xf32>
    %246 = arith.subf %245, %238 : vector<8x128xf32>
    %247 = arith.mulf %246, %244 : vector<8x128xf32>
    %248 = arith.mulf %238, %219 : vector<8x128xf32>
    %249 = arith.addf %247, %248 : vector<8x128xf32>
    %c56 = arith.constant 56 : index
    %c0_50 = arith.constant 0 : index
    %250 = vector.load %arg13[%c56, %c0_50] : memref<64x128xf32, #tpu.memory_space<vmem>>, vector<8x128xf32>
    tpu.vector_store %arg13[%c56, %c0_50], %249 {strides = array<i32>} : memref<64x128xf32, #tpu.memory_space<vmem>>, vector<8x128xf32>,
    %c0_51 = arith.constant 0 : index
    %c0_52 = arith.constant 0 : index
    %c0_53 = arith.constant 0 : index
    %251 = vector.load %arg12[%c0_51, %c0_52, %c0_53] : memref<2x8x128xf32, #tpu.memory_space<vmem>>, vector<1x8x128xf32>
    %252 = vector.shape_cast %251 : vector<1x8x128xf32> to vector<8x128xf32>
    %253 = vector.shape_cast %249 : vector<8x128xf32> to vector<1x8x128xf32>
    tpu.vector_store %arg12[%c0_51, %c0_52, %c0_53], %253 {strides = array<i32>} : memref<2x8x128xf32, #tpu.memory_space<vmem>>, vector<1x8x128xf32>,
    %c0_54 = arith.constant 0 : index
    %c0_55 = arith.constant 0 : index
    %254 = vector.load %arg13[%c0_54, %c0_55] : memref<64x128xf32, #tpu.memory_space<vmem>>, vector<64x128xf32>
    %c0_56 = arith.constant 0 : index
    %c0_57 = arith.constant 0 : index
    %255 = vector.load %arg5[%c0_56, %c0_57] : memref<128x384xf32, #tpu.memory_space<vmem>>, vector<128x384xf32>
    %cst_58 = arith.constant dense<0.000000e+00> : vector<64x384xf32>
    %256 = tpu.matmul %254, %255, %cst_58 {dimension_numbers = #tpu.dot_dimension_numbers<[1], [0], [0], [1], [0, 0, 1, 1], [], []>} : vector<64x128xf32>, vector<128x384xf32>, vector<64x384xf32> -> vector<64x384xf32>
    %c0_59 = arith.constant 0 : index
    %c0_60 = arith.constant 0 : index
    %257 = vector.load %arg7[%c0_59, %c0_60] : memref<1x384xf32, #tpu.memory_space<vmem>>, vector<1x384xf32>
    %258 = vector.broadcast %257 : vector<1x384xf32> to vector<64x384xf32>
    %259 = arith.addf %256, %258 : vector<64x384xf32>
    %c0_61 = arith.constant 0 : index
    %c0_62 = arith.constant 0 : index
    %260 = vector.load %arg6[%c0_61, %c0_62] : memref<128x384xf32, #tpu.memory_space<vmem>>, vector<128x384xf32>
    %c0_63 = arith.constant 0 : index
    %c0_64 = arith.constant 0 : index
    %261 = vector.load %arg8[%c0_63, %c0_64] : memref<1x128xf32, #tpu.memory_space<vmem>>, vector<1x128xf32>
    %262 = vector.shape_cast %261 : vector<1x128xf32> to vector<1x128xf32>
    %263 = vector.broadcast %262 : vector<1x128xf32> to vector<8x128xf32>
    %cst_65 = arith.constant 0.000000e+00 : f32
    %264 = vector.broadcast %cst_65 : f32 to vector<8x128xf32>
    %cst_66 = arith.constant dense<0.000000e+00> : vector<8x384xf32>
    %265 = tpu.matmul %264, %260, %cst_66 {dimension_numbers = #tpu.dot_dimension_numbers<[1], [0], [0], [1], [0, 0, 1, 1], [], []>} : vector<8x128xf32>, vector<128x384xf32>, vector<8x384xf32> -> vector<8x384xf32>
    %266 = vector.extract_strided_slice %259 {offsets = [0, 0], sizes = [8, 384], strides = [1, 1]} : vector<64x384xf32> to vector<8x384xf32>
    %267 = vector.extract_strided_slice %266 {offsets = [0, 0], sizes = [8, 128], strides = [1, 1]} : vector<8x384xf32> to vector<8x128xf32>
    %268 = vector.extract_strided_slice %265 {offsets = [0, 0], sizes = [8, 128], strides = [1, 1]} : vector<8x384xf32> to vector<8x128xf32>
    %269 = arith.addf %267, %268 : vector<8x128xf32>
    %270 = arith.negf %269 : vector<8x128xf32>
    %271 = math.exp %270 : vector<8x128xf32>
    %cst_67 = arith.constant 1.000000e+00 : f32
    %272 = vector.broadcast %cst_67 : f32 to vector<8x128xf32>
    %273 = arith.addf %272, %271 : vector<8x128xf32>
    %274 = arith.divf %272, %273 : vector<8x128xf32>
    %275 = vector.extract_strided_slice %266 {offsets = [0, 128], sizes = [8, 128], strides = [1, 1]} : vector<8x384xf32> to vector<8x128xf32>
    %276 = vector.extract_strided_slice %265 {offsets = [0, 128], sizes = [8, 128], strides = [1, 1]} : vector<8x384xf32> to vector<8x128xf32>
    %277 = arith.addf %275, %276 : vector<8x128xf32>
    %278 = arith.negf %277 : vector<8x128xf32>
    %279 = math.exp %278 : vector<8x128xf32>
    %cst_68 = arith.constant 1.000000e+00 : f32
    %280 = vector.broadcast %cst_68 : f32 to vector<8x128xf32>
    %281 = arith.addf %280, %279 : vector<8x128xf32>
    %282 = arith.divf %280, %281 : vector<8x128xf32>
    %283 = vector.extract_strided_slice %266 {offsets = [0, 256], sizes = [8, 128], strides = [1, 1]} : vector<8x384xf32> to vector<8x128xf32>
    %284 = vector.extract_strided_slice %265 {offsets = [0, 256], sizes = [8, 128], strides = [1, 1]} : vector<8x384xf32> to vector<8x128xf32>
    %285 = arith.addf %284, %263 : vector<8x128xf32>
    %286 = arith.mulf %274, %285 : vector<8x128xf32>
    %287 = arith.addf %283, %286 : vector<8x128xf32>
    %288 = math.tanh %287 : vector<8x128xf32>
    %cst_69 = arith.constant 1.000000e+00 : f32
    %289 = vector.broadcast %cst_69 : f32 to vector<8x128xf32>
    %290 = arith.subf %289, %282 : vector<8x128xf32>
    %291 = arith.mulf %290, %288 : vector<8x128xf32>
    %292 = arith.mulf %282, %264 : vector<8x128xf32>
    %293 = arith.addf %291, %292 : vector<8x128xf32>
    %c0_70 = arith.constant 0 : index
    %c0_71 = arith.constant 0 : index
    %294 = vector.load %arg13[%c0_70, %c0_71] : memref<64x128xf32, #tpu.memory_space<vmem>>, vector<8x128xf32>
    tpu.vector_store %arg13[%c0_70, %c0_71], %293 {strides = array<i32>} : memref<64x128xf32, #tpu.memory_space<vmem>>, vector<8x128xf32>,
    %cst_72 = arith.constant dense<0.000000e+00> : vector<8x384xf32>
    %295 = tpu.matmul %293, %260, %cst_72 {dimension_numbers = #tpu.dot_dimension_numbers<[1], [0], [0], [1], [0, 0, 1, 1], [], []>} : vector<8x128xf32>, vector<128x384xf32>, vector<8x384xf32> -> vector<8x384xf32>
    %296 = vector.extract_strided_slice %259 {offsets = [8, 0], sizes = [8, 384], strides = [1, 1]} : vector<64x384xf32> to vector<8x384xf32>
    %297 = vector.extract_strided_slice %296 {offsets = [0, 0], sizes = [8, 128], strides = [1, 1]} : vector<8x384xf32> to vector<8x128xf32>
    %298 = vector.extract_strided_slice %295 {offsets = [0, 0], sizes = [8, 128], strides = [1, 1]} : vector<8x384xf32> to vector<8x128xf32>
    %299 = arith.addf %297, %298 : vector<8x128xf32>
    %300 = arith.negf %299 : vector<8x128xf32>
    %301 = math.exp %300 : vector<8x128xf32>
    %cst_73 = arith.constant 1.000000e+00 : f32
    %302 = vector.broadcast %cst_73 : f32 to vector<8x128xf32>
    %303 = arith.addf %302, %301 : vector<8x128xf32>
    %304 = arith.divf %302, %303 : vector<8x128xf32>
    %305 = vector.extract_strided_slice %296 {offsets = [0, 128], sizes = [8, 128], strides = [1, 1]} : vector<8x384xf32> to vector<8x128xf32>
    %306 = vector.extract_strided_slice %295 {offsets = [0, 128], sizes = [8, 128], strides = [1, 1]} : vector<8x384xf32> to vector<8x128xf32>
    %307 = arith.addf %305, %306 : vector<8x128xf32>
    %308 = arith.negf %307 : vector<8x128xf32>
    %309 = math.exp %308 : vector<8x128xf32>
    %cst_74 = arith.constant 1.000000e+00 : f32
    %310 = vector.broadcast %cst_74 : f32 to vector<8x128xf32>
    %311 = arith.addf %310, %309 : vector<8x128xf32>
    %312 = arith.divf %310, %311 : vector<8x128xf32>
    %313 = vector.extract_strided_slice %296 {offsets = [0, 256], sizes = [8, 128], strides = [1, 1]} : vector<8x384xf32> to vector<8x128xf32>
    %314 = vector.extract_strided_slice %295 {offsets = [0, 256], sizes = [8, 128], strides = [1, 1]} : vector<8x384xf32> to vector<8x128xf32>
    %315 = arith.addf %314, %263 : vector<8x128xf32>
    %316 = arith.mulf %304, %315 : vector<8x128xf32>
    %317 = arith.addf %313, %316 : vector<8x128xf32>
    %318 = math.tanh %317 : vector<8x128xf32>
    %cst_75 = arith.constant 1.000000e+00 : f32
    %319 = vector.broadcast %cst_75 : f32 to vector<8x128xf32>
    %320 = arith.subf %319, %312 : vector<8x128xf32>
    %321 = arith.mulf %320, %318 : vector<8x128xf32>
    %322 = arith.mulf %312, %293 : vector<8x128xf32>
    %323 = arith.addf %321, %322 : vector<8x128xf32>
    %c8_76 = arith.constant 8 : index
    %c0_77 = arith.constant 0 : index
    %324 = vector.load %arg13[%c8_76, %c0_77] : memref<64x128xf32, #tpu.memory_space<vmem>>, vector<8x128xf32>
    tpu.vector_store %arg13[%c8_76, %c0_77], %323 {strides = array<i32>} : memref<64x128xf32, #tpu.memory_space<vmem>>, vector<8x128xf32>,
    %cst_78 = arith.constant dense<0.000000e+00> : vector<8x384xf32>
    %325 = tpu.matmul %323, %260, %cst_78 {dimension_numbers = #tpu.dot_dimension_numbers<[1], [0], [0], [1], [0, 0, 1, 1], [], []>} : vector<8x128xf32>, vector<128x384xf32>, vector<8x384xf32> -> vector<8x384xf32>
    %326 = vector.extract_strided_slice %259 {offsets = [16, 0], sizes = [8, 384], strides = [1, 1]} : vector<64x384xf32> to vector<8x384xf32>
    %327 = vector.extract_strided_slice %326 {offsets = [0, 0], sizes = [8, 128], strides = [1, 1]} : vector<8x384xf32> to vector<8x128xf32>
    %328 = vector.extract_strided_slice %325 {offsets = [0, 0], sizes = [8, 128], strides = [1, 1]} : vector<8x384xf32> to vector<8x128xf32>
    %329 = arith.addf %327, %328 : vector<8x128xf32>
    %330 = arith.negf %329 : vector<8x128xf32>
    %331 = math.exp %330 : vector<8x128xf32>
    %cst_79 = arith.constant 1.000000e+00 : f32
    %332 = vector.broadcast %cst_79 : f32 to vector<8x128xf32>
    %333 = arith.addf %332, %331 : vector<8x128xf32>
    %334 = arith.divf %332, %333 : vector<8x128xf32>
    %335 = vector.extract_strided_slice %326 {offsets = [0, 128], sizes = [8, 128], strides = [1, 1]} : vector<8x384xf32> to vector<8x128xf32>
    %336 = vector.extract_strided_slice %325 {offsets = [0, 128], sizes = [8, 128], strides = [1, 1]} : vector<8x384xf32> to vector<8x128xf32>
    %337 = arith.addf %335, %336 : vector<8x128xf32>
    %338 = arith.negf %337 : vector<8x128xf32>
    %339 = math.exp %338 : vector<8x128xf32>
    %cst_80 = arith.constant 1.000000e+00 : f32
    %340 = vector.broadcast %cst_80 : f32 to vector<8x128xf32>
    %341 = arith.addf %340, %339 : vector<8x128xf32>
    %342 = arith.divf %340, %341 : vector<8x128xf32>
    %343 = vector.extract_strided_slice %326 {offsets = [0, 256], sizes = [8, 128], strides = [1, 1]} : vector<8x384xf32> to vector<8x128xf32>
    %344 = vector.extract_strided_slice %325 {offsets = [0, 256], sizes = [8, 128], strides = [1, 1]} : vector<8x384xf32> to vector<8x128xf32>
    %345 = arith.addf %344, %263 : vector<8x128xf32>
    %346 = arith.mulf %334, %345 : vector<8x128xf32>
    %347 = arith.addf %343, %346 : vector<8x128xf32>
    %348 = math.tanh %347 : vector<8x128xf32>
    %cst_81 = arith.constant 1.000000e+00 : f32
    %349 = vector.broadcast %cst_81 : f32 to vector<8x128xf32>
    %350 = arith.subf %349, %342 : vector<8x128xf32>
    %351 = arith.mulf %350, %348 : vector<8x128xf32>
    %352 = arith.mulf %342, %323 : vector<8x128xf32>
    %353 = arith.addf %351, %352 : vector<8x128xf32>
    %c16_82 = arith.constant 16 : index
    %c0_83 = arith.constant 0 : index
    %354 = vector.load %arg13[%c16_82, %c0_83] : memref<64x128xf32, #tpu.memory_space<vmem>>, vector<8x128xf32>
    tpu.vector_store %arg13[%c16_82, %c0_83], %353 {strides = array<i32>} : memref<64x128xf32, #tpu.memory_space<vmem>>, vector<8x128xf32>,
    %cst_84 = arith.constant dense<0.000000e+00> : vector<8x384xf32>
    %355 = tpu.matmul %353, %260, %cst_84 {dimension_numbers = #tpu.dot_dimension_numbers<[1], [0], [0], [1], [0, 0, 1, 1], [], []>} : vector<8x128xf32>, vector<128x384xf32>, vector<8x384xf32> -> vector<8x384xf32>
    %356 = vector.extract_strided_slice %259 {offsets = [24, 0], sizes = [8, 384], strides = [1, 1]} : vector<64x384xf32> to vector<8x384xf32>
    %357 = vector.extract_strided_slice %356 {offsets = [0, 0], sizes = [8, 128], strides = [1, 1]} : vector<8x384xf32> to vector<8x128xf32>
    %358 = vector.extract_strided_slice %355 {offsets = [0, 0], sizes = [8, 128], strides = [1, 1]} : vector<8x384xf32> to vector<8x128xf32>
    %359 = arith.addf %357, %358 : vector<8x128xf32>
    %360 = arith.negf %359 : vector<8x128xf32>
    %361 = math.exp %360 : vector<8x128xf32>
    %cst_85 = arith.constant 1.000000e+00 : f32
    %362 = vector.broadcast %cst_85 : f32 to vector<8x128xf32>
    %363 = arith.addf %362, %361 : vector<8x128xf32>
    %364 = arith.divf %362, %363 : vector<8x128xf32>
    %365 = vector.extract_strided_slice %356 {offsets = [0, 128], sizes = [8, 128], strides = [1, 1]} : vector<8x384xf32> to vector<8x128xf32>
    %366 = vector.extract_strided_slice %355 {offsets = [0, 128], sizes = [8, 128], strides = [1, 1]} : vector<8x384xf32> to vector<8x128xf32>
    %367 = arith.addf %365, %366 : vector<8x128xf32>
    %368 = arith.negf %367 : vector<8x128xf32>
    %369 = math.exp %368 : vector<8x128xf32>
    %cst_86 = arith.constant 1.000000e+00 : f32
    %370 = vector.broadcast %cst_86 : f32 to vector<8x128xf32>
    %371 = arith.addf %370, %369 : vector<8x128xf32>
    %372 = arith.divf %370, %371 : vector<8x128xf32>
    %373 = vector.extract_strided_slice %356 {offsets = [0, 256], sizes = [8, 128], strides = [1, 1]} : vector<8x384xf32> to vector<8x128xf32>
    %374 = vector.extract_strided_slice %355 {offsets = [0, 256], sizes = [8, 128], strides = [1, 1]} : vector<8x384xf32> to vector<8x128xf32>
    %375 = arith.addf %374, %263 : vector<8x128xf32>
    %376 = arith.mulf %364, %375 : vector<8x128xf32>
    %377 = arith.addf %373, %376 : vector<8x128xf32>
    %378 = math.tanh %377 : vector<8x128xf32>
    %cst_87 = arith.constant 1.000000e+00 : f32
    %379 = vector.broadcast %cst_87 : f32 to vector<8x128xf32>
    %380 = arith.subf %379, %372 : vector<8x128xf32>
    %381 = arith.mulf %380, %378 : vector<8x128xf32>
    %382 = arith.mulf %372, %353 : vector<8x128xf32>
    %383 = arith.addf %381, %382 : vector<8x128xf32>
    %c24_88 = arith.constant 24 : index
    %c0_89 = arith.constant 0 : index
    %384 = vector.load %arg13[%c24_88, %c0_89] : memref<64x128xf32, #tpu.memory_space<vmem>>, vector<8x128xf32>
    tpu.vector_store %arg13[%c24_88, %c0_89], %383 {strides = array<i32>} : memref<64x128xf32, #tpu.memory_space<vmem>>, vector<8x128xf32>,
    %cst_90 = arith.constant dense<0.000000e+00> : vector<8x384xf32>
    %385 = tpu.matmul %383, %260, %cst_90 {dimension_numbers = #tpu.dot_dimension_numbers<[1], [0], [0], [1], [0, 0, 1, 1], [], []>} : vector<8x128xf32>, vector<128x384xf32>, vector<8x384xf32> -> vector<8x384xf32>
    %386 = vector.extract_strided_slice %259 {offsets = [32, 0], sizes = [8, 384], strides = [1, 1]} : vector<64x384xf32> to vector<8x384xf32>
    %387 = vector.extract_strided_slice %386 {offsets = [0, 0], sizes = [8, 128], strides = [1, 1]} : vector<8x384xf32> to vector<8x128xf32>
    %388 = vector.extract_strided_slice %385 {offsets = [0, 0], sizes = [8, 128], strides = [1, 1]} : vector<8x384xf32> to vector<8x128xf32>
    %389 = arith.addf %387, %388 : vector<8x128xf32>
    %390 = arith.negf %389 : vector<8x128xf32>
    %391 = math.exp %390 : vector<8x128xf32>
    %cst_91 = arith.constant 1.000000e+00 : f32
    %392 = vector.broadcast %cst_91 : f32 to vector<8x128xf32>
    %393 = arith.addf %392, %391 : vector<8x128xf32>
    %394 = arith.divf %392, %393 : vector<8x128xf32>
    %395 = vector.extract_strided_slice %386 {offsets = [0, 128], sizes = [8, 128], strides = [1, 1]} : vector<8x384xf32> to vector<8x128xf32>
    %396 = vector.extract_strided_slice %385 {offsets = [0, 128], sizes = [8, 128], strides = [1, 1]} : vector<8x384xf32> to vector<8x128xf32>
    %397 = arith.addf %395, %396 : vector<8x128xf32>
    %398 = arith.negf %397 : vector<8x128xf32>
    %399 = math.exp %398 : vector<8x128xf32>
    %cst_92 = arith.constant 1.000000e+00 : f32
    %400 = vector.broadcast %cst_92 : f32 to vector<8x128xf32>
    %401 = arith.addf %400, %399 : vector<8x128xf32>
    %402 = arith.divf %400, %401 : vector<8x128xf32>
    %403 = vector.extract_strided_slice %386 {offsets = [0, 256], sizes = [8, 128], strides = [1, 1]} : vector<8x384xf32> to vector<8x128xf32>
    %404 = vector.extract_strided_slice %385 {offsets = [0, 256], sizes = [8, 128], strides = [1, 1]} : vector<8x384xf32> to vector<8x128xf32>
    %405 = arith.addf %404, %263 : vector<8x128xf32>
    %406 = arith.mulf %394, %405 : vector<8x128xf32>
    %407 = arith.addf %403, %406 : vector<8x128xf32>
    %408 = math.tanh %407 : vector<8x128xf32>
    %cst_93 = arith.constant 1.000000e+00 : f32
    %409 = vector.broadcast %cst_93 : f32 to vector<8x128xf32>
    %410 = arith.subf %409, %402 : vector<8x128xf32>
    %411 = arith.mulf %410, %408 : vector<8x128xf32>
    %412 = arith.mulf %402, %383 : vector<8x128xf32>
    %413 = arith.addf %411, %412 : vector<8x128xf32>
    %c32_94 = arith.constant 32 : index
    %c0_95 = arith.constant 0 : index
    %414 = vector.load %arg13[%c32_94, %c0_95] : memref<64x128xf32, #tpu.memory_space<vmem>>, vector<8x128xf32>
    tpu.vector_store %arg13[%c32_94, %c0_95], %413 {strides = array<i32>} : memref<64x128xf32, #tpu.memory_space<vmem>>, vector<8x128xf32>,
    %cst_96 = arith.constant dense<0.000000e+00> : vector<8x384xf32>
    %415 = tpu.matmul %413, %260, %cst_96 {dimension_numbers = #tpu.dot_dimension_numbers<[1], [0], [0], [1], [0, 0, 1, 1], [], []>} : vector<8x128xf32>, vector<128x384xf32>, vector<8x384xf32> -> vector<8x384xf32>
    %416 = vector.extract_strided_slice %259 {offsets = [40, 0], sizes = [8, 384], strides = [1, 1]} : vector<64x384xf32> to vector<8x384xf32>
    %417 = vector.extract_strided_slice %416 {offsets = [0, 0], sizes = [8, 128], strides = [1, 1]} : vector<8x384xf32> to vector<8x128xf32>
    %418 = vector.extract_strided_slice %415 {offsets = [0, 0], sizes = [8, 128], strides = [1, 1]} : vector<8x384xf32> to vector<8x128xf32>
    %419 = arith.addf %417, %418 : vector<8x128xf32>
    %420 = arith.negf %419 : vector<8x128xf32>
    %421 = math.exp %420 : vector<8x128xf32>
    %cst_97 = arith.constant 1.000000e+00 : f32
    %422 = vector.broadcast %cst_97 : f32 to vector<8x128xf32>
    %423 = arith.addf %422, %421 : vector<8x128xf32>
    %424 = arith.divf %422, %423 : vector<8x128xf32>
    %425 = vector.extract_strided_slice %416 {offsets = [0, 128], sizes = [8, 128], strides = [1, 1]} : vector<8x384xf32> to vector<8x128xf32>
    %426 = vector.extract_strided_slice %415 {offsets = [0, 128], sizes = [8, 128], strides = [1, 1]} : vector<8x384xf32> to vector<8x128xf32>
    %427 = arith.addf %425, %426 : vector<8x128xf32>
    %428 = arith.negf %427 : vector<8x128xf32>
    %429 = math.exp %428 : vector<8x128xf32>
    %cst_98 = arith.constant 1.000000e+00 : f32
    %430 = vector.broadcast %cst_98 : f32 to vector<8x128xf32>
    %431 = arith.addf %430, %429 : vector<8x128xf32>
    %432 = arith.divf %430, %431 : vector<8x128xf32>
    %433 = vector.extract_strided_slice %416 {offsets = [0, 256], sizes = [8, 128], strides = [1, 1]} : vector<8x384xf32> to vector<8x128xf32>
    %434 = vector.extract_strided_slice %415 {offsets = [0, 256], sizes = [8, 128], strides = [1, 1]} : vector<8x384xf32> to vector<8x128xf32>
    %435 = arith.addf %434, %263 : vector<8x128xf32>
    %436 = arith.mulf %424, %435 : vector<8x128xf32>
    %437 = arith.addf %433, %436 : vector<8x128xf32>
    %438 = math.tanh %437 : vector<8x128xf32>
    %cst_99 = arith.constant 1.000000e+00 : f32
    %439 = vector.broadcast %cst_99 : f32 to vector<8x128xf32>
    %440 = arith.subf %439, %432 : vector<8x128xf32>
    %441 = arith.mulf %440, %438 : vector<8x128xf32>
    %442 = arith.mulf %432, %413 : vector<8x128xf32>
    %443 = arith.addf %441, %442 : vector<8x128xf32>
    %c40_100 = arith.constant 40 : index
    %c0_101 = arith.constant 0 : index
    %444 = vector.load %arg13[%c40_100, %c0_101] : memref<64x128xf32, #tpu.memory_space<vmem>>, vector<8x128xf32>
    tpu.vector_store %arg13[%c40_100, %c0_101], %443 {strides = array<i32>} : memref<64x128xf32, #tpu.memory_space<vmem>>, vector<8x128xf32>,
    %cst_102 = arith.constant dense<0.000000e+00> : vector<8x384xf32>
    %445 = tpu.matmul %443, %260, %cst_102 {dimension_numbers = #tpu.dot_dimension_numbers<[1], [0], [0], [1], [0, 0, 1, 1], [], []>} : vector<8x128xf32>, vector<128x384xf32>, vector<8x384xf32> -> vector<8x384xf32>
    %446 = vector.extract_strided_slice %259 {offsets = [48, 0], sizes = [8, 384], strides = [1, 1]} : vector<64x384xf32> to vector<8x384xf32>
    %447 = vector.extract_strided_slice %446 {offsets = [0, 0], sizes = [8, 128], strides = [1, 1]} : vector<8x384xf32> to vector<8x128xf32>
    %448 = vector.extract_strided_slice %445 {offsets = [0, 0], sizes = [8, 128], strides = [1, 1]} : vector<8x384xf32> to vector<8x128xf32>
    %449 = arith.addf %447, %448 : vector<8x128xf32>
    %450 = arith.negf %449 : vector<8x128xf32>
    %451 = math.exp %450 : vector<8x128xf32>
    %cst_103 = arith.constant 1.000000e+00 : f32
    %452 = vector.broadcast %cst_103 : f32 to vector<8x128xf32>
    %453 = arith.addf %452, %451 : vector<8x128xf32>
    %454 = arith.divf %452, %453 : vector<8x128xf32>
    %455 = vector.extract_strided_slice %446 {offsets = [0, 128], sizes = [8, 128], strides = [1, 1]} : vector<8x384xf32> to vector<8x128xf32>
    %456 = vector.extract_strided_slice %445 {offsets = [0, 128], sizes = [8, 128], strides = [1, 1]} : vector<8x384xf32> to vector<8x128xf32>
    %457 = arith.addf %455, %456 : vector<8x128xf32>
    %458 = arith.negf %457 : vector<8x128xf32>
    %459 = math.exp %458 : vector<8x128xf32>
    %cst_104 = arith.constant 1.000000e+00 : f32
    %460 = vector.broadcast %cst_104 : f32 to vector<8x128xf32>
    %461 = arith.addf %460, %459 : vector<8x128xf32>
    %462 = arith.divf %460, %461 : vector<8x128xf32>
    %463 = vector.extract_strided_slice %446 {offsets = [0, 256], sizes = [8, 128], strides = [1, 1]} : vector<8x384xf32> to vector<8x128xf32>
    %464 = vector.extract_strided_slice %445 {offsets = [0, 256], sizes = [8, 128], strides = [1, 1]} : vector<8x384xf32> to vector<8x128xf32>
    %465 = arith.addf %464, %263 : vector<8x128xf32>
    %466 = arith.mulf %454, %465 : vector<8x128xf32>
    %467 = arith.addf %463, %466 : vector<8x128xf32>
    %468 = math.tanh %467 : vector<8x128xf32>
    %cst_105 = arith.constant 1.000000e+00 : f32
    %469 = vector.broadcast %cst_105 : f32 to vector<8x128xf32>
    %470 = arith.subf %469, %462 : vector<8x128xf32>
    %471 = arith.mulf %470, %468 : vector<8x128xf32>
    %472 = arith.mulf %462, %443 : vector<8x128xf32>
    %473 = arith.addf %471, %472 : vector<8x128xf32>
    %c48_106 = arith.constant 48 : index
    %c0_107 = arith.constant 0 : index
    %474 = vector.load %arg13[%c48_106, %c0_107] : memref<64x128xf32, #tpu.memory_space<vmem>>, vector<8x128xf32>
    tpu.vector_store %arg13[%c48_106, %c0_107], %473 {strides = array<i32>} : memref<64x128xf32, #tpu.memory_space<vmem>>, vector<8x128xf32>,
    %cst_108 = arith.constant dense<0.000000e+00> : vector<8x384xf32>
    %475 = tpu.matmul %473, %260, %cst_108 {dimension_numbers = #tpu.dot_dimension_numbers<[1], [0], [0], [1], [0, 0, 1, 1], [], []>} : vector<8x128xf32>, vector<128x384xf32>, vector<8x384xf32> -> vector<8x384xf32>
    %476 = vector.extract_strided_slice %259 {offsets = [56, 0], sizes = [8, 384], strides = [1, 1]} : vector<64x384xf32> to vector<8x384xf32>
    %477 = vector.extract_strided_slice %476 {offsets = [0, 0], sizes = [8, 128], strides = [1, 1]} : vector<8x384xf32> to vector<8x128xf32>
    %478 = vector.extract_strided_slice %475 {offsets = [0, 0], sizes = [8, 128], strides = [1, 1]} : vector<8x384xf32> to vector<8x128xf32>
    %479 = arith.addf %477, %478 : vector<8x128xf32>
    %480 = arith.negf %479 : vector<8x128xf32>
    %481 = math.exp %480 : vector<8x128xf32>
    %cst_109 = arith.constant 1.000000e+00 : f32
    %482 = vector.broadcast %cst_109 : f32 to vector<8x128xf32>
    %483 = arith.addf %482, %481 : vector<8x128xf32>
    %484 = arith.divf %482, %483 : vector<8x128xf32>
    %485 = vector.extract_strided_slice %476 {offsets = [0, 128], sizes = [8, 128], strides = [1, 1]} : vector<8x384xf32> to vector<8x128xf32>
    %486 = vector.extract_strided_slice %475 {offsets = [0, 128], sizes = [8, 128], strides = [1, 1]} : vector<8x384xf32> to vector<8x128xf32>
    %487 = arith.addf %485, %486 : vector<8x128xf32>
    %488 = arith.negf %487 : vector<8x128xf32>
    %489 = math.exp %488 : vector<8x128xf32>
    %cst_110 = arith.constant 1.000000e+00 : f32
    %490 = vector.broadcast %cst_110 : f32 to vector<8x128xf32>
    %491 = arith.addf %490, %489 : vector<8x128xf32>
    %492 = arith.divf %490, %491 : vector<8x128xf32>
    %493 = vector.extract_strided_slice %476 {offsets = [0, 256], sizes = [8, 128], strides = [1, 1]} : vector<8x384xf32> to vector<8x128xf32>
    %494 = vector.extract_strided_slice %475 {offsets = [0, 256], sizes = [8, 128], strides = [1, 1]} : vector<8x384xf32> to vector<8x128xf32>
    %495 = arith.addf %494, %263 : vector<8x128xf32>
    %496 = arith.mulf %484, %495 : vector<8x128xf32>
    %497 = arith.addf %493, %496 : vector<8x128xf32>
    %498 = math.tanh %497 : vector<8x128xf32>
    %cst_111 = arith.constant 1.000000e+00 : f32
    %499 = vector.broadcast %cst_111 : f32 to vector<8x128xf32>
    %500 = arith.subf %499, %492 : vector<8x128xf32>
    %501 = arith.mulf %500, %498 : vector<8x128xf32>
    %502 = arith.mulf %492, %473 : vector<8x128xf32>
    %503 = arith.addf %501, %502 : vector<8x128xf32>
    %c56_112 = arith.constant 56 : index
    %c0_113 = arith.constant 0 : index
    %504 = vector.load %arg13[%c56_112, %c0_113] : memref<64x128xf32, #tpu.memory_space<vmem>>, vector<8x128xf32>
    tpu.vector_store %arg13[%c56_112, %c0_113], %503 {strides = array<i32>} : memref<64x128xf32, #tpu.memory_space<vmem>>, vector<8x128xf32>,
    %c1 = arith.constant 1 : index
    %c0_114 = arith.constant 0 : index
    %c0_115 = arith.constant 0 : index
    %505 = vector.load %arg12[%c1, %c0_114, %c0_115] : memref<2x8x128xf32, #tpu.memory_space<vmem>>, vector<1x8x128xf32>
    %506 = vector.shape_cast %505 : vector<1x8x128xf32> to vector<8x128xf32>
    %507 = vector.shape_cast %503 : vector<8x128xf32> to vector<1x8x128xf32>
    tpu.vector_store %arg12[%c1, %c0_114, %c0_115], %507 {strides = array<i32>} : memref<2x8x128xf32, #tpu.memory_space<vmem>>, vector<1x8x128xf32>,
    %c0_116 = arith.constant 0 : index
    %c0_117 = arith.constant 0 : index
    %508 = vector.load %arg13[%c0_116, %c0_117] : memref<64x128xf32, #tpu.memory_space<vmem>>, vector<64x128xf32>
    %c0_118 = arith.constant 0 : index
    %c0_119 = arith.constant 0 : index
    %509 = vector.load %arg9[%c0_118, %c0_119] : memref<128x128xf32, #tpu.memory_space<vmem>>, vector<128x128xf32>
    %cst_120 = arith.constant dense<0.000000e+00> : vector<64x128xf32>
    %510 = tpu.matmul %508, %509, %cst_120 {dimension_numbers = #tpu.dot_dimension_numbers<[1], [0], [0], [1], [0, 0, 1, 1], [], []>} : vector<64x128xf32>, vector<128x128xf32>, vector<64x128xf32> -> vector<64x128xf32>
    %c0_121 = arith.constant 0 : index
    %c0_122 = arith.constant 0 : index
    %511 = vector.load %arg10[%c0_121, %c0_122] : memref<1x128xf32, #tpu.memory_space<vmem>>, vector<1x128xf32>
    %512 = vector.broadcast %511 : vector<1x128xf32> to vector<64x128xf32>
    %513 = arith.addf %510, %512 : vector<64x128xf32>
    %cst_123 = arith.constant dense<0xFF800000> : vector<64xf32>
    %514 = vector.multi_reduction <maximumf>, %513, %cst_123 [1] : vector<64x128xf32> to vector<64xf32>
    %515 = vector.shape_cast %514 : vector<64xf32> to vector<64x1xf32>
    %516 = vector.broadcast %515 : vector<64x1xf32> to vector<64x128xf32>
    %517 = arith.subf %513, %516 : vector<64x128xf32>
    %518 = math.exp %517 : vector<64x128xf32>
    %cst_124 = arith.constant dense<0.000000e+00> : vector<64xf32>
    %519 = vector.multi_reduction <add>, %518, %cst_124 [1] : vector<64x128xf32> to vector<64xf32>
    %520 = vector.shape_cast %519 : vector<64xf32> to vector<64x1xf32>
    %521 = math.log %520 : vector<64x1xf32>
    %522 = vector.broadcast %521 : vector<64x1xf32> to vector<64x128xf32>
    %523 = arith.subf %517, %522 : vector<64x128xf32>
    %c0_125 = arith.constant 0 : index
    %c0_126 = arith.constant 0 : index
    %524 = vector.load %arg11[%c0_125, %c0_126] : memref<64x128xf32, #tpu.memory_space<vmem>>, vector<64x128xf32>
    tpu.vector_store %arg11[%c0_125, %c0_126], %523 {strides = array<i32>} : memref<64x128xf32, #tpu.memory_space<vmem>>, vector<64x128xf32>,
    return
  }
}

</mosaic_0001>

<bundles_post_ra>
// kernel: gru_nn_forward.1
= control target key start
LH: loop header
LB: loop body
LE: loop exit
PB: predicated region body
PF: predicated region fallthrough
CT: control target
= control target key end

     0   :  { %18 = vsyncpa [#allocation4], 0  ;;  %s7247_s0 = inlined_call_operand.vmem [shape: f32[64,16], index: 0, kind: input, shape index: {}]   ;;  %s7248_s1 = inlined_call_operand.vmem [shape: f32[16,384], index: 1, kind: input, shape index: {}]   ;;  %s7249_s2 = inlined_call_operand.hbm [shape: f32[128,384], index: 2, kind: input, shape index: {}]   ;;  %s7250_s3 = inlined_call_operand.vmem [shape: f32[1,384], index: 3, kind: input, shape index: {}]   ;;  %s7251_s4 = inlined_call_operand.vmem [shape: f32[1,128], index: 4, kind: input, shape index: {}]   ;;  %s7252_s5 = inlined_call_operand.hbm [shape: f32[128,384], index: 5, kind: input, shape index: {}]   ;;  %s7253_s6 = inlined_call_operand.hbm [shape: f32[128,384], index: 6, kind: input, shape index: {}]   ;;  %s7254_s7 = inlined_call_operand.vmem [shape: f32[1,384], index: 7, kind: input, shape index: {}]   ;;  %s7255_s8 = inlined_call_operand.vmem [shape: f32[1,128], index: 8, kind: input, shape index: {}]   ;;  %s7256_s9 = inlined_call_operand.hbm [shape: f32[128,128], index: 9, kind: input, shape index: {}]   ;;  %s7257_s10 = inlined_call_operand.vmem [shape: f32[1,128], index: 10, kind: input, shape index: {}]   ;;  %s7258_s11 = inlined_call_operand.vmem [shape: f32[64,128], index: 11, kind: output, shape index: {0}]   ;;  %s7259_s12 = inlined_call_operand.vmem [shape: f32[2,8,128], index: 12, kind: output, shape index: {1}]  }
   0x1   :  { %19 = vsyncpa [#allocation6], 0 }
   0x2   :  { %20 = vsyncpa [#allocation9], 0  ;;  %s6040_s21 = smov [#allocation5]   ;;  %s6041_s23 = smov [#allocation3]  }
   0x3   :  { %s46_s22 = sshll.u32 %s6040_s21, 4  ;;  %s30_s24 = sshll.u32 %s6041_s23, 4  ;;  %s47_s22 = int_to_ptr.vmem [resolvable:$true] %s46_s22  ;;  %s6116_s24 = int_to_ptr.vmem [resolvable:$true] %s30_s24 }
   0x4   :  { %s5946_s27 = scalar_lea.hbm %s7252_s5, 6144 }
   0x5   :  { %p5947_p0 = scmp.ne.s32.totalorder %s7252_s5, %s5946_s27  ;;  %p5950_p1 = scmp.lt.u32.totalorder %s5946_s27, %s7252_s5 }
   0x7   :  { %p5952_p2 = pnand %p5950_p1, %p5947_p0 }
   0x9   :  { %5955 = shalt.err (!%p5952_p2)
}
   0xa   :  { %s5956_s14 = scalar_lea.vmem %s47_s22, 6144  ;;  %p5961_p4 = scmp.lt.s32.totalorder %s47_s22, %s47_s22 }
   0xb   :  { %p5957_p3 = scmp.ne.s32.totalorder %s47_s22, %s5956_s14  ;;  %p5962_p5 = scmp.lt.s32.totalorder %s5956_s14, %s5956_s14 }
   0xd   :  { %p5963_p6 = por %p5962_p5, %p5961_p4 }
   0xf   :  { %p5964_p7 = pnand %p5963_p6, %p5957_p3 }
  0x11   :  { %5967 = shalt.err (!%p5964_p7)
}
  0x12   :  { %s6042_s15 = smov 384   ;;  %s6043_s16 = smov 24  }
  0x13   :  { %52 = dma.hbm_to_vmem [thread:$0]  %s7252_s5, 6144, %s47_s22, [#allocation6], %s6042_s15, %s6042_s15, %s6043_s16  }
  0x14   :  { %s5968_s21 = scalar_lea.hbm %s7249_s2, 6144 }
  0x15   :  { %p5969_p8 = scmp.ne.s32.totalorder %s7249_s2, %s5968_s21  ;;  %p5972_p9 = scmp.lt.u32.totalorder %s5968_s21, %s7249_s2 }
  0x17   :  { %p5974_p10 = pnand %p5972_p9, %p5969_p8 }
  0x19   :  { %5977 = shalt.err (!%p5974_p10)
}
  0x1a   :  { %s5978_s28 = scalar_lea.vmem %s6116_s24, 6144  ;;  %p5983_p12 = scmp.lt.s32.totalorder %s6116_s24, %s6116_s24 }
  0x1b   :  { %p5979_p11 = scmp.ne.s32.totalorder %s6116_s24, %s5978_s28  ;;  %p5984_p13 = scmp.lt.s32.totalorder %s5978_s28, %s5978_s28 }
  0x1d   :  { %p5985_p0 = por %p5984_p13, %p5983_p12 }
  0x1f   :  { %p5986_p1 = pnand %p5985_p0, %p5979_p11 }
  0x21   :  { %5989 = shalt.err (!%p5986_p1)
}
  0x22   :  { %36 = dma.hbm_to_vmem [thread:$0]  %s7249_s2, 6144, %s6116_s24, [#allocation4], %s6042_s15, %s6042_s15, %s6043_s16  }
  0x23   :  { %s6044_s29 = smov [#allocation7]   ;;  %s6045_s13 = smov [#allocation8]  }
  0x24   :  { %s58_s30 = sshll.u32 %s6044_s29, 4  ;;  %s74_s14 = sshll.u32 %s6045_s13, 4  ;;  %s59_s30 = int_to_ptr.vmem [resolvable:$true] %s58_s30  ;;  %s6153_s14 = int_to_ptr.vmem [resolvable:$true] %s74_s14 }
  0x25   :  { %s5990_s19 = scalar_lea.hbm %s7253_s6, 6144 }
  0x26   :  { %p5991_p2 = scmp.ne.s32.totalorder %s7253_s6, %s5990_s19  ;;  %p5994_p3 = scmp.lt.u32.totalorder %s5990_s19, %s7253_s6 }
  0x28   :  { %p5996_p4 = pnand %p5994_p3, %p5991_p2 }
  0x2a   :  { %5999 = shalt.err (!%p5996_p4)
}
  0x2b   :  { %s6000_s2 = scalar_lea.vmem %s59_s30, 6144  ;;  %p6005_p6 = scmp.lt.s32.totalorder %s59_s30, %s59_s30 }
  0x2c   :  { %p6001_p5 = scmp.ne.s32.totalorder %s59_s30, %s6000_s2  ;;  %p6006_p7 = scmp.lt.s32.totalorder %s6000_s2, %s6000_s2 }
  0x2e   :  { %p6007_p8 = por %p6006_p7, %p6005_p6 }
  0x30   :  { %p6008_p9 = pnand %p6007_p8, %p6001_p5 }
  0x32   :  { %6011 = shalt.err (!%p6008_p9)
}
  0x33   :  { %64 = dma.hbm_to_vmem [thread:$0]  %s7253_s6, 6144, %s59_s30, [#allocation6], %s6042_s15, %s6042_s15, %s6043_s16  }
  0x34   :  { %s6012_s5 = scalar_lea.hbm %s7256_s9, 2048 }
  0x35   :  { %p6013_p10 = scmp.ne.s32.totalorder %s7256_s9, %s6012_s5  ;;  %p6016_p11 = scmp.lt.u32.totalorder %s6012_s5, %s7256_s9 }
  0x37   :  { %p6018_p12 = pnand %p6016_p11, %p6013_p10 }
  0x39   :  { %6021 = shalt.err (!%p6018_p12)
}
  0x3a   :  { %s6022_s18 = scalar_lea.vmem %s6153_s14, 2048  ;;  %p6027_p0 = scmp.lt.s32.totalorder %s6153_s14, %s6153_s14 }
  0x3b   :  { %p6023_p13 = scmp.ne.s32.totalorder %s6153_s14, %s6022_s18  ;;  %p6028_p1 = scmp.lt.s32.totalorder %s6022_s18, %s6022_s18 }
  0x3d   :  { %p6029_p2 = por %p6028_p1, %p6027_p0 }
  0x3f   :  { %p6030_p3 = pnand %p6029_p2, %p6023_p13 }
  0x41   :  { %6033 = shalt.err (!%p6030_p3)
}
  0x42   :  { %s6046_s6 = smov 128   ;;  %s6047_s15 = smov 8  }
  0x43   :  { %80 = dma.hbm_to_vmem [thread:$0]  %s7256_s9, 2048, %s6153_s14, [#allocation9], %s6046_s6, %s6046_s6, %s6047_s15  }
  0x44   :  { %6034 = dma.done.wait [#allocation4], 6144  }
  0x45   :  { %6035 = vsyncadd [#allocation4], 4294961152 }
  0x46   :  { %6036 = dma.done.wait [#allocation6], 12288  }
  0x47   :  { %6037 = vsyncadd [#allocation6], 4294955008 }
  0x48   :  { %6038 = dma.done.wait [#allocation9], 2048  }
  0x49   :  { %6039 = vsyncadd [#allocation9], 4294965248  ;;  %v6048_v0 = vmov 0.0   ;;  %vm126_vm0 = vcmask 130048   ;;  %v105_v1 = vld [vmem:[%s7248_s1 + $0x10] sm:$0xff]  ;;  %v108_v2 = vld [vmem:[%s7248_s1 + $0x28] sm:$0xff] }
  0x4a   :  { %215 = vmatprep.mubr.f32.mxu0 %v6048_v0  ;;  %v6197_v3 = vld [vmem:[%s7247_s0] sm:$0xff]  ;;  %v4682_v4 = vpack.c.bf16 %v108_v2, %v105_v1  ;;  %v370_v5 = vld [vmem:[#allocation3 + $0x8] sm:$0xff]  ;;  %v372_v9 = vld [vmem:[#allocation3 + $0x18] sm:$0xff]  ;;  %vm6050_vm1 = vmmov 0  }
  0x4b   :  { %4018 = vmatprep.mubr.msk.f32.mxu1 %vm126_vm0, %v6197_v3  ;;  %v373_v6 = vld [vmem:[#allocation3 + $0x20] sm:$0xff]  ;;  %v376_v10 = vld [vmem:[#allocation3 + $0x38] sm:$0xff]  ;;  %v379_v11 = vld [vmem:[#allocation3 + $0x50] sm:$0xff] }
  0x4c   :  { %v6201_v7 = vpack.c.bf16 %v373_v6, %v370_v5  ;;  %v369_v8 = vld [vmem:[#allocation3] sm:$0xff]  ;;  %4683 = vmatprep.subr.bf16.mxu1 %v4682_v4  ;;  %v6206_v12 = vld [vmem:[%s7247_s0 + $0x8] sm:$0xff]  ;;  %v6211_v14 = vpack.c.bf16 %v379_v11, %v376_v10  ;;  %v375_v15 = vld [vmem:[#allocation3 + $0x30] sm:$0xff]  ;;  %v6049_v6 = vmov 0.0|0.0  }
  0x4d   :  { %4685 = vmatpush3.bf16.msra.mxu1 %v4682_v4  ;;  %v6208_v13 = vpack.c.bf16 %v372_v9, %v369_v8  ;;  %v378_v16 = vld [vmem:[#allocation3 + $0x48] sm:$0xff]  ;;  %v385_v18 = vld [vmem:[#allocation3 + $0x80] sm:$0xff]  ;;  %v6221_v20 = vld [vmem:[%s7247_s0 + $0x10] sm:$0xff] }
  0x4e   :  { %4687 = vmatprep.subr.bf16.mxu1 %v6201_v7  ;;  %v382_v17 = vld [vmem:[#allocation3 + $0x68] sm:$0xff]  ;;  %v6216_v19 = vpack.c.bf16 %v378_v16, %v375_v15  ;;  %v6226_v21 = vld [vmem:[%s7247_s0 + $0x18] sm:$0xff]  ;;  %v381_v23 = vld [vmem:[#allocation3 + $0x60] sm:$0xff] }
  0x4f   :  { %v6229_v22 = vpack.c.bf16 %v385_v18, %v382_v17  ;;  %v384_v24 = vld [vmem:[#allocation3 + $0x78] sm:$0xff]  ;;  %v391_v26 = vld [vmem:[#allocation3 + $0xb0] sm:$0xff]  ;;  %v6236_v27 = vld [vmem:[%s7247_s0 + $0x20] sm:$0xff] }
  0x50   :  { %4019 = vmatmul.mubr.msk.f32.vlgmr.msra.gmra.mrb[0].mxu1 %vm126_vm0, %v6206_v12  ;;  %v388_v25 = vld [vmem:[#allocation3 + $0x98] sm:$0xff]  ;;  %v6243_v28 = vld [vmem:[%s7247_s0 + $0x28] sm:$0xff]  ;;  %v6246_v29 = vpack.c.bf16 %v384_v24, %v381_v23  ;;  %v107_v31 = vld [vmem:[%s7248_s1 + $0x20] sm:$0xff] }
  0x51   :  { %4689 = vmatpush1.bf16.msra.mxu1 %v6208_v13  ;;  %4021 = vmatprep.mubr.msk.f32.mxu1 %vm126_vm0, %v6221_v20  ;;  %v104_v30 = vld [vmem:[%s7248_s1 + $0x8] sm:$0xff]  ;;  %v103_v32 = vld [vmem:[%s7248_s1] sm:$0xff]  ;;  %v6260_v33 = vpack.c.bf16 %v391_v26, %v388_v25  ;;  %v387_v34 = vld [vmem:[#allocation3 + $0x90] sm:$0xff] }
  0x52   :  { %4691 = vmatprep.subr.bf16.mxu1 %v6211_v14  ;;  %v390_v35 = vld [vmem:[#allocation3 + $0xa8] sm:$0xff]  ;;  %v4678_v36 = vpack.c.bf16 %v107_v31, %v104_v30  ;;  %v106_v37 = vld [vmem:[%s7248_s1 + $0x18] sm:$0xff]  ;;  %v397_v39 = vld [vmem:[#allocation3 + $0xe0] sm:$0xff] }
  0x53   :  { %v394_v38 = vld [vmem:[#allocation3 + $0xc8] sm:$0xff]  ;;  %v4680_v40 = vpack.c.bf16 %v106_v37, %v103_v32  ;;  %v6268_v41 = vld [vmem:[%s7247_s0 + $0x30] sm:$0xff]  ;;  %v6273_v42 = vpack.c.bf16 %v390_v35, %v387_v34  ;;  %v6278_v43 = vld [vmem:[%s7247_s0 + $0x38] sm:$0xff]  ;;  %v111_v35 = vlaneseq }
  0x54   :  { %4022 = vmatmul.mubr.msk.f32.gmra.mrb[2].mxu1 %vm126_vm0, %v6226_v21  ;;  %4679 = vmatprep.subr.bf16.mxu0 %v4678_v36  ;;  %v6281_v44 = vpack.c.bf16 %v397_v39, %v394_v38  ;;  %v393_v45 = vld [vmem:[#allocation3 + $0xc0] sm:$0xff]  ;;  %v396_v46 = vld [vmem:[#allocation3 + $0xd8] sm:$0xff]  ;;  %v403_v48 = vld [vmem:[#allocation3 + $0x110] sm:$0xff] }
  0x55   :  { %4693 = vmatpush1.bf16.msra.mxu1 %v6216_v19  ;;  %4024 = vmatprep.mubr.msk.f32.mxu1 %vm126_vm0, %v6236_v27  ;;  %v400_v47 = vld [vmem:[#allocation3 + $0xf8] sm:$0xff]  ;;  %v6291_v49 = vpack.c.bf16 %v396_v46, %v393_v45  ;;  %v399_v51 = vld [vmem:[#allocation3 + $0xf0] sm:$0xff]  ;;  %v402_v52 = vld [vmem:[#allocation3 + $0x108] sm:$0xff]  ;;  %v6407_v36 = vshrl.u32 %v111_v35, 7 }
  0x56   :  { %4695 = vmatprep.subr.bf16.mxu1 %v6229_v22  ;;  %4681 = vmatpush1.bf16.msra.mxu0 %v4680_v40  ;;  %v6295_v50 = vpack.c.bf16 %v403_v48, %v400_v47  ;;  %v406_v53 = vld [vmem:[#allocation3 + $0x128] sm:$0xff]  ;;  %v409_v54 = vld [vmem:[#allocation3 + $0x140] sm:$0xff]  ;;  %v6303_v55 = vpack.c.bf16 %v402_v52, %v399_v51  ;;  %v408_v58 = vld [vmem:[#allocation3 + $0x138] sm:$0xff] }
  0x57   :  { %4743 = vmatprep.subr.bf16.mxu0 %v6201_v7  ;;  %v6307_v56 = vpack.c.bf16 %v409_v54, %v406_v53  ;;  %v405_v57 = vld [vmem:[#allocation3 + $0x120] sm:$0xff]  ;;  %v412_v59 = vld [vmem:[#allocation3 + $0x158] sm:$0xff]  ;;  %v415_v60 = vld [vmem:[#allocation3 + $0x170] sm:$0xff]  ;;  %v121_v37 = vsub.s32 2, %v6407_v36 }
  0x58   :  { %4025 = vmatmul.mubr.msk.f32.gmra.mrb[4].mxu1 %vm126_vm0, %v6243_v28  ;;  %v6314_v61 = vpack.c.bf16 %v408_v58, %v405_v57  ;;  %v6318_v62 = vpack.c.bf16 %v415_v60, %v412_v59  ;;  %v411_v63 = vld [vmem:[#allocation3 + $0x150] sm:$0xff]  ;;  %v414_v1 = vld [vmem:[#allocation3 + $0x168] sm:$0xff]  ;;  %v377_v8 = vld [vmem:[#allocation3 + $0x40] sm:$0xff] }
  0x59   :  { %4697 = vmatpush1.bf16.msra.mxu1 %v6246_v29  ;;  %4027 = vmatprep.mubr.msk.f32.mxu1 %vm126_vm0, %v6268_v41  ;;  %v6325_v2 = vpack.c.bf16 %v414_v1, %v411_v63  ;;  %v374_v4 = vld [vmem:[#allocation3 + $0x28] sm:$0xff]  ;;  %v380_v9 = vld [vmem:[#allocation3 + $0x58] sm:$0xff]  ;;  %v383_v11 = vld [vmem:[#allocation3 + $0x70] sm:$0xff] }
  0x5a   :  { %4699 = vmatprep.subr.bf16.mxu1 %v6260_v33  ;;  %3632 = vmatmul.mubr.msk.f32.vlgmr.msra.gmra.mrb[0].mxu0 %vm126_vm0, %v6197_v3  ;;  %v371_v3 = vld [vmem:[#allocation3 + $0x10] sm:$0xff]  ;;  %v6344_v10 = vpack.c.bf16 %v380_v9, %v377_v8  ;;  %v389_v16 = vld [vmem:[#allocation3 + $0xa0] sm:$0xff]  ;;  %v392_v17 = vld [vmem:[#allocation3 + $0xb8] sm:$0xff] }
  0x5b   :  { %4745 = vmatpush1.bf16.msra.mxu0 %v6208_v13  ;;  %221 = vmatprep.mubr.f32.mxu0 %v6048_v0  ;;  %v6334_v5 = vpack.c.bf16 %v374_v4, %v371_v3  ;;  %v6364_v18 = vpack.c.bf16 %v392_v17, %v389_v16  ;;  %v401_v24 = vld [vmem:[#allocation3 + $0x100] sm:$0xff]  ;;  %v404_v25 = vld [vmem:[#allocation3 + $0x118] sm:$0xff]  ;;  %v113_v3 = vsub.s32 0, %v6407_v36  ;;  %v117_v4 = vsub.s32 1, %v6407_v36 }
  0x5c   :  { %4028 = vmatmul.mubr.msk.f32.gmra.mrb[6].mxu1 %vm126_vm0, %v6278_v43  ;;  %4747 = vmatprep.subr.bf16.mxu0 %v6211_v14  ;;  %v6375_v26 = vpack.c.bf16 %v404_v25, %v401_v24  ;;  %v413_v31 = vld [vmem:[#allocation3 + $0x160] sm:$0xff]  ;;  %v416_v32 = vld [vmem:[#allocation3 + $0x178] sm:$0xff] }
  0x5d   :  { %4701 = vmatpush1.bf16.msra.mxu1 %v6273_v42  ;;  %488 = vmatprep.mubr.f32.mxu1 %v6048_v0  ;;  %v6383_v34 = vpack.c.bf16 %v416_v32, %v413_v31  ;;  %v109_v38 = vld [vmem:[%s7250_s3] sm:$0x7] }
  0x5e   :  { %4703 = vmatprep.subr.bf16.mxu1 %v6281_v44  ;;  %3633 = vmatmul.mubr.msk.f32.gmra.mrb[2].mxu0 %vm126_vm0, %v6206_v12  ;;  %v386_v12 = vld [vmem:[#allocation3 + $0x88] sm:$0xff]  ;;  %v122_v39 = vrot.slane %v109_v38, %v121_v37  ;;  %v6433_v8 = vrot.slane %v109_v38, %v113_v3  ;;  %v6437_v9 = vrot.slane %v109_v38, %v117_v4  ;;  %v6444_v32 = vld [vmem:[%s7251_s4] ss:$0 sm:$0xff] }
  0x5f   :  { %227 = vmatprep.mubr.f32.mxu0 %v6048_v0  ;;  %4749 = vmatpush1.bf16.msra.mxu0 %v6216_v19  ;;  %v6355_v15 = vpack.c.bf16 %v386_v12, %v383_v11 }
  0x60   :  { %4751 = vmatprep.subr.bf16.mxu0 %v6229_v22 }
  0x61   :  { %4705 = vmatpush1.bf16.msra.mxu1 %v6291_v49 }
  0x62   :  { %4707 = vmatprep.subr.bf16.mxu1 %v6295_v50  ;;  %3634 = vmatmul.mubr.msk.f32.gmra.mrb[4].mxu0 %vm126_vm0, %v6221_v20  ;;  %v395_v20 = vld [vmem:[#allocation3 + $0xd0] sm:$0xff] }
  0x63   :  { %233 = vmatprep.mubr.f32.mxu0 %v6048_v0  ;;  %4753 = vmatpush1.bf16.msra.mxu0 %v6246_v29 }
  0x64   :  { %4755 = vmatprep.subr.bf16.mxu0 %v6260_v33 }
  0x65   :  { %4709 = vmatpush1.bf16.msra.mxu1 %v6303_v55 }
  0x66   :  { %4711 = vmatprep.subr.bf16.mxu1 %v6307_v56  ;;  %3635 = vmatmul.mubr.msk.f32.gmra.mrb[6].mxu0 %vm126_vm0, %v6226_v21  ;;  %v398_v21 = vld [vmem:[#allocation3 + $0xe8] sm:$0xff] }
  0x67   :  { %239 = vmatprep.mubr.f32.mxu0 %v6048_v0  ;;  %4757 = vmatpush1.bf16.msra.mxu0 %v6273_v42  ;;  %v6371_v23 = vpack.c.bf16 %v398_v21, %v395_v20 }
  0x68   :  { %4759 = vmatprep.subr.bf16.mxu0 %v6281_v44 }
  0x69   :  { %4713 = vmatpush1.bf16.msra.mxu1 %v6314_v61 }
  0x6a   :  { %4715 = vmatprep.subr.bf16.mxu1 %v6318_v62  ;;  %3636 = vmatmul.mubr.msk.f32.gmra.mrb[8].mxu0 %vm126_vm0, %v6236_v27  ;;  %v407_v27 = vld [vmem:[#allocation3 + $0x130] sm:$0xff] }
  0x6b   :  { %245 = vmatprep.mubr.f32.mxu0 %v6048_v0  ;;  %4761 = vmatpush1.bf16.msra.mxu0 %v6291_v49 }
  0x6c   :  { %4763 = vmatprep.subr.bf16.mxu0 %v6295_v50 }
  0x6d   :  { %4717 = vmatpush1.bf16.msra.mxu1 %v6325_v2 }
  0x6e   :  { %4718 = vmatprep.subr.bf16.mxu1 %v6049_v6  ;;  %3637 = vmatmul.mubr.msk.f32.gmra.mrb[10].mxu0 %vm126_vm0, %v6243_v28  ;;  %v410_v28 = vld [vmem:[#allocation3 + $0x148] sm:$0xff] }
  0x6f   :  { %4765 = vmatpush1.bf16.msra.mxu0 %v6303_v55  ;;  %251 = vmatprep.mubr.f32.mxu0 %v6048_v0  ;;  %v6379_v30 = vpack.c.bf16 %v410_v28, %v407_v27 }
  0x70   :  { %489 = vmatmul.mubr.f32.vlgmr.msra.gmra.mrb[8].mxu1 %v6048_v0  ;;  %4767 = vmatprep.subr.bf16.mxu0 %v6307_v56 }
  0x71   :  { %4720 = vmatpush3.bf16.msra.mxu1 %v6334_v5  ;;  %4062 = vmatprep.mubr.msk.f32.mxu1 %vm6050_vm1, %v6048_v0 }
  0x72   :  { %4721 = vmatprep.subr.bf16.mxu1 %v6049_v6  ;;  %3638 = vmatmul.mubr.msk.f32.gmra.mrb[12].mxu0 %vm126_vm0, %v6268_v41 }
  0x73   :  { %257 = vmatprep.mubr.f32.mxu0 %v6048_v0  ;;  %4769 = vmatpush1.bf16.msra.mxu0 %v6314_v61 }
  0x74   :  { %4771 = vmatprep.subr.bf16.mxu0 %v6318_v62 }
  0x75   :  { %4723 = vmatpush3.bf16.msra.mxu1 %v6344_v10 }
  0x76   :  { %4724 = vmatprep.subr.bf16.mxu1 %v6049_v6  ;;  %3639 = vmatmul.mubr.msk.f32.gmra.mrb[14].mxu0 %vm126_vm0, %v6278_v43 }
  0x77   :  { %652 = vmatprep.mubr.f32.mxu0 %v6048_v0  ;;  %4773 = vmatpush1.bf16.msra.mxu0 %v6325_v2 }
  0x78   :  { %4799 = vmatprep.subr.bf16.mxu0 %v6201_v7 }
  0x79   :  { %4726 = vmatpush3.bf16.msra.mxu1 %v6355_v15 }
  0x7a   :  { %4727 = vmatprep.subr.bf16.mxu1 %v6049_v6 }
  0x7d   :  { %4729 = vmatpush3.bf16.msra.mxu1 %v6364_v18 }
  0x7e   :  { %4730 = vmatprep.subr.bf16.mxu1 %v6049_v6 }
  0x81   :  { %4732 = vmatpush3.bf16.msra.mxu1 %v6371_v23 }
  0x82   :  { %4733 = vmatprep.subr.bf16.mxu1 %v6049_v6 }
  0x85   :  { %4735 = vmatpush3.bf16.msra.mxu1 %v6375_v26 }
  0x86   :  { %4736 = vmatprep.subr.bf16.mxu1 %v6049_v6 }
  0x89   :  { %4738 = vmatpush3.bf16.msra.mxu1 %v6379_v30 }
  0x8a   :  { %4739 = vmatprep.subr.bf16.mxu1 %v6049_v6 }
  0x8d   :  { %4741 = vmatpush3.bf16.msra.mxu1 %v6383_v34 }
  0x8e   :  { %4774 = vmatprep.subr.bf16.mxu1 %v6049_v6 }
  0x90   :  { %4063 = vmatmul.mubr.f32.vlgmr.msra.gmra.mrb[10].mxu1 %v6048_v0 }
  0x91   :  { %4776 = vmatpush3.bf16.msra.mxu1 %v6334_v5  ;;  %4097 = vmatprep.mubr.msk.f32.mxu1 %vm6050_vm1, %v6048_v0 }
  0x92   :  { %4777 = vmatprep.subr.bf16.mxu1 %v6049_v6 }
  0x95   :  { %4779 = vmatpush3.bf16.msra.mxu1 %v6344_v10 }
  0x96   :  { %4780 = vmatprep.subr.bf16.mxu1 %v6049_v6 }
  0x99   :  { %4782 = vmatpush3.bf16.msra.mxu1 %v6355_v15 }
  0x9a   :  { %4783 = vmatprep.subr.bf16.mxu1 %v6049_v6 }
  0x9d   :  { %4785 = vmatpush3.bf16.msra.mxu1 %v6364_v18 }
  0x9e   :  { %4786 = vmatprep.subr.bf16.mxu1 %v6049_v6 }
  0xa1   :  { %4788 = vmatpush3.bf16.msra.mxu1 %v6371_v23 }
  0xa2   :  { %4789 = vmatprep.subr.bf16.mxu1 %v6049_v6 }
  0xa5   :  { %4791 = vmatpush3.bf16.msra.mxu1 %v6375_v26 }
  0xa6   :  { %4792 = vmatprep.subr.bf16.mxu1 %v6049_v6 }
  0xa9   :  { %4794 = vmatpush3.bf16.msra.mxu1 %v6379_v30 }
  0xaa   :  { %4795 = vmatprep.subr.bf16.mxu1 %v6049_v6 }
  0xad   :  { %4797 = vmatpush3.bf16.msra.mxu1 %v6383_v34 }
  0xae   :  { %4830 = vmatprep.subr.bf16.mxu1 %v6049_v6 }
 0x123   :  { %v4020_v40 = vpop.f32.mrb[0].mxu1 }
 0x124   :  { %v6415_v41 = vadd.f32 %v4020_v40, %v122_v39  ;;  %v330_v43 = vpop.f32.mrb[1].mxu1 }
 0x127   :  { %v4023_v45 = vpop.f32.mrb[2].mxu1 }
 0x128   :  { %v6417_v46 = vadd.f32 %v4023_v45, %v122_v39  ;;  %v340_v47 = vpop.f32.mrb[3].mxu1 }
 0x129   :  { %v6419_v48 = vadd.f32 %v340_v47, %v122_v39 }
 0x12b   :  { %v4026_v51 = vpop.f32.mrb[4].mxu1 }
 0x12c   :  { %v6421_v52 = vadd.f32 %v4026_v51, %v122_v39  ;;  %v350_v53 = vpop.f32.mrb[5].mxu1  ;;  %v331_v51 = vadd.f32 %v330_v43, %v122_v39 }
 0x12d   :  { %v6423_v54 = vadd.f32 %v350_v53, %v122_v39  ;;  %v217_v58 = vpop.f32.mrb[0].mxu0 }
 0x12e   :  { %v219_v63 = vpop.f32.mrb[1].mxu0  ;;  %v218_v11 = vadd.f32 %v217_v58, %v6433_v8 }
 0x12f   :  { %v4029_v57 = vpop.f32.mrb[6].mxu1  ;;  %v220_v12 = vadd.f32 %v219_v63, %v6437_v9 }
 0x130   :  { %v6425_v59 = vadd.f32 %v4029_v57, %v122_v39  ;;  %v360_v60 = vpop.f32.mrb[7].mxu1 }
 0x131   :  { %v6427_v1 = vadd.f32 %v360_v60, %v122_v39 }
 0x143   :  { %v490_v16 = vpop.f32.mrb[8].mxu1 }
 0x144   :  { %v565_v17 = vadd.f32 %v490_v16, %v218_v11  ;;  %v492_v20 = vpop.f32.mrb[9].mxu1 }
 0x145   :  { %v572_v21 = vadd.f32 %v492_v20, %v220_v12 }
 0x146   :  { %v3649_v24 = vmul.f32 -1.442695, %v565_v17 }
 0x147   :  { %v3650_v25 = vmul.f32 -1.442695, %v572_v21 }
 0x148   :  { %5753 = vpow2.f32 %v3649_v24 }
 0x149   :  { %5755 = vpow2.f32 %v3650_v25 }
 0x152   :  { %v5754_v27 = vpop.eup %5753 }
 0x153   :  { %v569_v28 = vadd.f32 1.0, %v5754_v27  ;;  %v5756_v31 = vpop.eup %5755 }
 0x154   :  { %v576_v35 = vadd.f32 1.0, %v5756_v31 }
 0x155   :  { %5757 = vrcp.f32 %v569_v28 }
 0x156   :  { %5759 = vrcp.f32 %v576_v35 }
 0x15f   :  { %v5758_v47 = vpop.eup %5757 }
 0x160   :  { %v5760_v58 = vpop.eup %5759 }
 0x161   :  { %v583_v60 = vsub.f32 1.0, %v5760_v58  ;;  %v585_v12 = vmul.f32 0.0, %v5760_v58 }
 0x163   :  { %v561_v38 = vpop.f32.mrb[10].mxu1 }
 0x164   :  { %v579_v40 = vadd.f32 %v6444_v32, %v561_v38  ;;  %v4064_v45 = vpop.f32.mrb[11].mxu1 }
 0x166   :  { %v580_v53 = vmul.f32 %v5758_v47, %v579_v40 }
 0x168   :  { %v581_v57 = vadd.f32 %v580_v53, %v331_v51 }
 0x16a   :  { %5761 = vtanh.f32 %v581_v57 }
 0x174   :  { %v5762_v63 = vpop.eup %5761 }
 0x175   :  { %v584_v11 = vmul.f32 %v5762_v63, %v583_v60 }
 0x177   :  { %v6447_v16 = vadd.f32 %v585_v12, %v584_v11 }
 0x179   :  { %653 = vmatmul.mubr.f32.vlgmr.msra.gmra.mrb[2].mxu0 %v6447_v16  ;;  %4098 = vmatmul.mubr.f32.vlgmr.msra.gmra.mrb[12].mxu1 %v6447_v16 }
 0x17a   :  { %4801 = vmatpush1.bf16.msra.mxu0 %v6208_v13  ;;  %4832 = vmatpush3.bf16.msra.mxu1 %v6334_v5 }
 0x17b   :  { %4803 = vmatprep.subr.bf16.mxu0 %v6211_v14  ;;  %4833 = vmatprep.subr.bf16.mxu1 %v6049_v6 }
 0x17c   :  { %816 = vmatprep.mubr.f32.mxu0 %v6048_v0  ;;  %4132 = vmatprep.mubr.msk.f32.mxu1 %vm6050_vm1, %v6048_v0 }
 0x17e   :  { %4805 = vmatpush1.bf16.msra.mxu0 %v6216_v19  ;;  %4835 = vmatpush3.bf16.msra.mxu1 %v6344_v10 }
 0x17f   :  { %4807 = vmatprep.subr.bf16.mxu0 %v6229_v22  ;;  %4836 = vmatprep.subr.bf16.mxu1 %v6049_v6 }
 0x182   :  { %4809 = vmatpush1.bf16.msra.mxu0 %v6246_v29  ;;  %4838 = vmatpush3.bf16.msra.mxu1 %v6355_v15 }
 0x183   :  { %4811 = vmatprep.subr.bf16.mxu0 %v6260_v33  ;;  %4839 = vmatprep.subr.bf16.mxu1 %v6049_v6 }
 0x186   :  { %4813 = vmatpush1.bf16.msra.mxu0 %v6273_v42  ;;  %4841 = vmatpush3.bf16.msra.mxu1 %v6364_v18 }
 0x187   :  { %4815 = vmatprep.subr.bf16.mxu0 %v6281_v44  ;;  %4842 = vmatprep.subr.bf16.mxu1 %v6049_v6 }
 0x18a   :  { %4817 = vmatpush1.bf16.msra.mxu0 %v6291_v49  ;;  %4844 = vmatpush3.bf16.msra.mxu1 %v6371_v23 }
 0x18b   :  { %4819 = vmatprep.subr.bf16.mxu0 %v6295_v50  ;;  %4845 = vmatprep.subr.bf16.mxu1 %v6049_v6 }
 0x18e   :  { %4821 = vmatpush1.bf16.msra.mxu0 %v6303_v55  ;;  %4847 = vmatpush3.bf16.msra.mxu1 %v6375_v26 }
 0x18f   :  { %4823 = vmatprep.subr.bf16.mxu0 %v6307_v56  ;;  %4848 = vmatprep.subr.bf16.mxu1 %v6049_v6 }
 0x192   :  { %4825 = vmatpush1.bf16.msra.mxu0 %v6314_v61  ;;  %4850 = vmatpush3.bf16.msra.mxu1 %v6379_v30 }
 0x193   :  { %4827 = vmatprep.subr.bf16.mxu0 %v6318_v62  ;;  %4851 = vmatprep.subr.bf16.mxu1 %v6049_v6 }
 0x196   :  { %4829 = vmatpush1.bf16.msra.mxu0 %v6325_v2  ;;  %4853 = vmatpush3.bf16.msra.mxu1 %v6383_v34 }
 0x197   :  { %4855 = vmatprep.subr.bf16.mxu0 %v6201_v7  ;;  %4886 = vmatprep.subr.bf16.mxu1 %v6049_v6 }
 0x24c   :  { %v654_v39 = vpop.f32.mrb[2].mxu0  ;;  %v725_v43 = vpop.f32.mrb[12].mxu1 }
 0x24d   :  { %v5682_v17 = vadd.f32 %v654_v39, %v6433_v8  ;;  %v656_v20 = vpop.f32.mrb[3].mxu0  ;;  %v4099_v21 = vpop.f32.mrb[13].mxu1  ;;  %v743_v40 = vadd.f32 %v6444_v32, %v725_v43 }
 0x24e   :  { %v5683_v25 = vadd.f32 %v656_v20, %v6437_v9 }
 0x24f   :  { %v3651_v24 = vmul.f32 -1.442695, %v5682_v17 }
 0x250   :  { %v3652_v27 = vmul.f32 -1.442695, %v5683_v25 }
 0x251   :  { %5763 = vpow2.f32 %v3651_v24 }
 0x252   :  { %5765 = vpow2.f32 %v3652_v27 }
 0x25b   :  { %v5764_v28 = vpop.eup %5763 }
 0x25c   :  { %v733_v31 = vadd.f32 1.0, %v5764_v28  ;;  %v5766_v35 = vpop.eup %5765 }
 0x25d   :  { %v740_v38 = vadd.f32 1.0, %v5766_v35 }
 0x25e   :  { %5767 = vrcp.f32 %v733_v31 }
 0x25f   :  { %5769 = vrcp.f32 %v740_v38 }
 0x268   :  { %v5768_v45 = vpop.eup %5767 }
 0x269   :  { %v744_v47 = vmul.f32 %v5768_v45, %v743_v40  ;;  %v5770_v53 = vpop.eup %5769 }
 0x26a   :  { %v747_v57 = vsub.f32 1.0, %v5770_v53  ;;  %v749_v63 = vmul.f32 %v5770_v53, %v6447_v16 }
 0x26b   :  { %v745_v51 = vadd.f32 %v744_v47, %v6415_v41 }
 0x26d   :  { %5771 = vtanh.f32 %v745_v51 }
 0x277   :  { %v5772_v58 = vpop.eup %5771 }
 0x278   :  { %v748_v60 = vmul.f32 %v5772_v58, %v747_v57 }
 0x27a   :  { %v6491_v11 = vadd.f32 %v749_v63, %v748_v60 }
 0x27c   :  { %817 = vmatmul.mubr.f32.vlgmr.msra.gmra.mrb[4].mxu0 %v6491_v11  ;;  %4133 = vmatmul.mubr.f32.vlgmr.msra.gmra.mrb[14].mxu1 %v6491_v11 }
 0x27d   :  { %4857 = vmatpush1.bf16.msra.mxu0 %v6208_v13  ;;  %4888 = vmatpush3.bf16.msra.mxu1 %v6334_v5 }
 0x27e   :  { %4859 = vmatprep.subr.bf16.mxu0 %v6211_v14  ;;  %4889 = vmatprep.subr.bf16.mxu1 %v6049_v6 }
 0x27f   :  { %980 = vmatprep.mubr.f32.mxu0 %v6048_v0  ;;  %4167 = vmatprep.mubr.msk.f32.mxu1 %vm6050_vm1, %v6048_v0 }
 0x281   :  { %4861 = vmatpush1.bf16.msra.mxu0 %v6216_v19  ;;  %4891 = vmatpush3.bf16.msra.mxu1 %v6344_v10 }
 0x282   :  { %4863 = vmatprep.subr.bf16.mxu0 %v6229_v22  ;;  %4892 = vmatprep.subr.bf16.mxu1 %v6049_v6 }
 0x285   :  { %4865 = vmatpush1.bf16.msra.mxu0 %v6246_v29  ;;  %4894 = vmatpush3.bf16.msra.mxu1 %v6355_v15 }
 0x286   :  { %4867 = vmatprep.subr.bf16.mxu0 %v6260_v33  ;;  %4895 = vmatprep.subr.bf16.mxu1 %v6049_v6 }
 0x289   :  { %4869 = vmatpush1.bf16.msra.mxu0 %v6273_v42  ;;  %4897 = vmatpush3.bf16.msra.mxu1 %v6364_v18 }
 0x28a   :  { %4871 = vmatprep.subr.bf16.mxu0 %v6281_v44  ;;  %4898 = vmatprep.subr.bf16.mxu1 %v6049_v6 }
 0x28d   :  { %4873 = vmatpush1.bf16.msra.mxu0 %v6291_v49  ;;  %4900 = vmatpush3.bf16.msra.mxu1 %v6371_v23 }
 0x28e   :  { %4875 = vmatprep.subr.bf16.mxu0 %v6295_v50  ;;  %4901 = vmatprep.subr.bf16.mxu1 %v6049_v6 }
 0x291   :  { %4877 = vmatpush1.bf16.msra.mxu0 %v6303_v55  ;;  %4903 = vmatpush3.bf16.msra.mxu1 %v6375_v26 }
 0x292   :  { %4879 = vmatprep.subr.bf16.mxu0 %v6307_v56  ;;  %4904 = vmatprep.subr.bf16.mxu1 %v6049_v6 }
 0x295   :  { %4881 = vmatpush1.bf16.msra.mxu0 %v6314_v61  ;;  %4906 = vmatpush3.bf16.msra.mxu1 %v6379_v30 }
 0x296   :  { %4883 = vmatprep.subr.bf16.mxu0 %v6318_v62  ;;  %4907 = vmatprep.subr.bf16.mxu1 %v6049_v6 }
 0x299   :  { %4885 = vmatpush1.bf16.msra.mxu0 %v6325_v2  ;;  %4909 = vmatpush3.bf16.msra.mxu1 %v6383_v34 }
 0x29a   :  { %4911 = vmatprep.subr.bf16.mxu0 %v6201_v7  ;;  %4942 = vmatprep.subr.bf16.mxu1 %v6049_v6 }
 0x34f   :  { %v818_v41 = vpop.f32.mrb[4].mxu0  ;;  %v889_v12 = vpop.f32.mrb[14].mxu1 }
 0x350   :  { %v5684_v39 = vadd.f32 %v818_v41, %v6433_v8  ;;  %v820_v43 = vpop.f32.mrb[5].mxu0  ;;  %v4134_v17 = vpop.f32.mrb[15].mxu1  ;;  %v907_v35 = vadd.f32 %v6444_v32, %v889_v12 }
 0x351   :  { %v5685_v21 = vadd.f32 %v820_v43, %v6437_v9 }
 0x352   :  { %v3653_v20 = vmul.f32 -1.442695, %v5684_v39 }
 0x353   :  { %v3654_v24 = vmul.f32 -1.442695, %v5685_v21 }
 0x354   :  { %5773 = vpow2.f32 %v3653_v20 }
 0x355   :  { %5775 = vpow2.f32 %v3654_v24 }
 0x35e   :  { %v5774_v25 = vpop.eup %5773 }
 0x35f   :  { %v897_v27 = vadd.f32 1.0, %v5774_v25  ;;  %v5776_v28 = vpop.eup %5775 }
 0x360   :  { %v904_v31 = vadd.f32 1.0, %v5776_v28 }
 0x361   :  { %5777 = vrcp.f32 %v897_v27 }
 0x362   :  { %5779 = vrcp.f32 %v904_v31 }
 0x36b   :  { %v5778_v38 = vpop.eup %5777 }
 0x36c   :  { %v908_v40 = vmul.f32 %v5778_v38, %v907_v35  ;;  %v5780_v47 = vpop.eup %5779 }
 0x36d   :  { %v911_v51 = vsub.f32 1.0, %v5780_v47  ;;  %v913_v58 = vmul.f32 %v5780_v47, %v6491_v11 }
 0x36e   :  { %v909_v45 = vadd.f32 %v908_v40, %v6419_v48 }
 0x370   :  { %5781 = vtanh.f32 %v909_v45 }
 0x37a   :  { %v5782_v53 = vpop.eup %5781 }
 0x37b   :  { %v912_v57 = vmul.f32 %v5782_v53, %v911_v51 }
 0x37d   :  { %v6535_v60 = vadd.f32 %v913_v58, %v912_v57 }
 0x37f   :  { %981 = vmatmul.mubr.f32.vlgmr.msra.gmra.mrb[6].mxu0 %v6535_v60  ;;  %4168 = vmatmul.mubr.f32.vlgmr.msra.gmra.mrb[16].mxu1 %v6535_v60 }
 0x380   :  { %4913 = vmatpush1.bf16.msra.mxu0 %v6208_v13  ;;  %4944 = vmatpush3.bf16.msra.mxu1 %v6334_v5 }
 0x381   :  { %4915 = vmatprep.subr.bf16.mxu0 %v6211_v14  ;;  %4945 = vmatprep.subr.bf16.mxu1 %v6049_v6 }
 0x382   :  { %1144 = vmatprep.mubr.f32.mxu0 %v6048_v0  ;;  %4202 = vmatprep.mubr.msk.f32.mxu1 %vm6050_vm1, %v6048_v0 }
 0x384   :  { %4917 = vmatpush1.bf16.msra.mxu0 %v6216_v19  ;;  %4947 = vmatpush3.bf16.msra.mxu1 %v6344_v10 }
 0x385   :  { %4919 = vmatprep.subr.bf16.mxu0 %v6229_v22  ;;  %4948 = vmatprep.subr.bf16.mxu1 %v6049_v6 }
 0x388   :  { %4921 = vmatpush1.bf16.msra.mxu0 %v6246_v29  ;;  %4950 = vmatpush3.bf16.msra.mxu1 %v6355_v15 }
 0x389   :  { %4923 = vmatprep.subr.bf16.mxu0 %v6260_v33  ;;  %4951 = vmatprep.subr.bf16.mxu1 %v6049_v6 }
 0x38c   :  { %4925 = vmatpush1.bf16.msra.mxu0 %v6273_v42  ;;  %4953 = vmatpush3.bf16.msra.mxu1 %v6364_v18 }
 0x38d   :  { %4927 = vmatprep.subr.bf16.mxu0 %v6281_v44  ;;  %4954 = vmatprep.subr.bf16.mxu1 %v6049_v6 }
 0x390   :  { %4929 = vmatpush1.bf16.msra.mxu0 %v6291_v49  ;;  %4956 = vmatpush3.bf16.msra.mxu1 %v6371_v23 }
 0x391   :  { %4931 = vmatprep.subr.bf16.mxu0 %v6295_v50  ;;  %4957 = vmatprep.subr.bf16.mxu1 %v6049_v6 }
 0x394   :  { %4933 = vmatpush1.bf16.msra.mxu0 %v6303_v55  ;;  %4959 = vmatpush3.bf16.msra.mxu1 %v6375_v26 }
 0x395   :  { %4935 = vmatprep.subr.bf16.mxu0 %v6307_v56  ;;  %4960 = vmatprep.subr.bf16.mxu1 %v6049_v6 }
 0x398   :  { %4937 = vmatpush1.bf16.msra.mxu0 %v6314_v61  ;;  %4962 = vmatpush3.bf16.msra.mxu1 %v6379_v30 }
 0x399   :  { %4939 = vmatprep.subr.bf16.mxu0 %v6318_v62  ;;  %4963 = vmatprep.subr.bf16.mxu1 %v6049_v6 }
 0x39c   :  { %4941 = vmatpush1.bf16.msra.mxu0 %v6325_v2  ;;  %4965 = vmatpush3.bf16.msra.mxu1 %v6383_v34 }
 0x39d   :  { %4967 = vmatprep.subr.bf16.mxu0 %v6201_v7  ;;  %4998 = vmatprep.subr.bf16.mxu1 %v6049_v6 }
 0x452   :  { %v982_v48 = vpop.f32.mrb[6].mxu0  ;;  %v1053_v63 = vpop.f32.mrb[16].mxu1 }
 0x453   :  { %v5686_v41 = vadd.f32 %v982_v48, %v6433_v8  ;;  %v984_v12 = vpop.f32.mrb[7].mxu0  ;;  %v4169_v39 = vpop.f32.mrb[17].mxu1  ;;  %v1071_v28 = vadd.f32 %v6444_v32, %v1053_v63 }
 0x454   :  { %v5687_v17 = vadd.f32 %v984_v12, %v6437_v9 }
 0x455   :  { %v3655_v43 = vmul.f32 -1.442695, %v5686_v41 }
 0x456   :  { %v3656_v20 = vmul.f32 -1.442695, %v5687_v17 }
 0x457   :  { %5783 = vpow2.f32 %v3655_v43 }
 0x458   :  { %5785 = vpow2.f32 %v3656_v20 }
 0x461   :  { %v5784_v21 = vpop.eup %5783 }
 0x462   :  { %v1061_v24 = vadd.f32 1.0, %v5784_v21  ;;  %v5786_v25 = vpop.eup %5785 }
 0x463   :  { %v1068_v27 = vadd.f32 1.0, %v5786_v25 }
 0x464   :  { %5787 = vrcp.f32 %v1061_v24 }
 0x465   :  { %5789 = vrcp.f32 %v1068_v27 }
 0x46e   :  { %v5788_v31 = vpop.eup %5787 }
 0x46f   :  { %v1072_v35 = vmul.f32 %v5788_v31, %v1071_v28  ;;  %v5790_v40 = vpop.eup %5789 }
 0x470   :  { %v1075_v45 = vsub.f32 1.0, %v5790_v40  ;;  %v1077_v53 = vmul.f32 %v5790_v40, %v6535_v60 }
 0x471   :  { %v1073_v38 = vadd.f32 %v1072_v35, %v6417_v46 }
 0x473   :  { %5791 = vtanh.f32 %v1073_v38 }
 0x47d   :  { %v5792_v47 = vpop.eup %5791 }
 0x47e   :  { %v1076_v51 = vmul.f32 %v5792_v47, %v1075_v45 }
 0x480   :  { %v6579_v57 = vadd.f32 %v1077_v53, %v1076_v51 }
 0x482   :  { %1145 = vmatmul.mubr.f32.vlgmr.msra.gmra.mrb[8].mxu0 %v6579_v57  ;;  %4203 = vmatmul.mubr.f32.vlgmr.msra.gmra.mrb[18].mxu1 %v6579_v57 }
 0x483   :  { %4969 = vmatpush1.bf16.msra.mxu0 %v6208_v13  ;;  %5000 = vmatpush3.bf16.msra.mxu1 %v6334_v5 }
 0x484   :  { %4971 = vmatprep.subr.bf16.mxu0 %v6211_v14  ;;  %5001 = vmatprep.subr.bf16.mxu1 %v6049_v6 }
 0x485   :  { %1308 = vmatprep.mubr.f32.mxu0 %v6048_v0  ;;  %4237 = vmatprep.mubr.msk.f32.mxu1 %vm6050_vm1, %v6048_v0 }
 0x487   :  { %4973 = vmatpush1.bf16.msra.mxu0 %v6216_v19  ;;  %5003 = vmatpush3.bf16.msra.mxu1 %v6344_v10 }
 0x488   :  { %4975 = vmatprep.subr.bf16.mxu0 %v6229_v22  ;;  %5004 = vmatprep.subr.bf16.mxu1 %v6049_v6 }
 0x48b   :  { %4977 = vmatpush1.bf16.msra.mxu0 %v6246_v29  ;;  %5006 = vmatpush3.bf16.msra.mxu1 %v6355_v15 }
 0x48c   :  { %4979 = vmatprep.subr.bf16.mxu0 %v6260_v33  ;;  %5007 = vmatprep.subr.bf16.mxu1 %v6049_v6 }
 0x48f   :  { %4981 = vmatpush1.bf16.msra.mxu0 %v6273_v42  ;;  %5009 = vmatpush3.bf16.msra.mxu1 %v6364_v18 }
 0x490   :  { %4983 = vmatprep.subr.bf16.mxu0 %v6281_v44  ;;  %5010 = vmatprep.subr.bf16.mxu1 %v6049_v6 }
 0x493   :  { %4985 = vmatpush1.bf16.msra.mxu0 %v6291_v49  ;;  %5012 = vmatpush3.bf16.msra.mxu1 %v6371_v23 }
 0x494   :  { %4987 = vmatprep.subr.bf16.mxu0 %v6295_v50  ;;  %5013 = vmatprep.subr.bf16.mxu1 %v6049_v6 }
 0x497   :  { %4989 = vmatpush1.bf16.msra.mxu0 %v6303_v55  ;;  %5015 = vmatpush3.bf16.msra.mxu1 %v6375_v26 }
 0x498   :  { %4991 = vmatprep.subr.bf16.mxu0 %v6307_v56  ;;  %5016 = vmatprep.subr.bf16.mxu1 %v6049_v6 }
 0x49b   :  { %4993 = vmatpush1.bf16.msra.mxu0 %v6314_v61  ;;  %5018 = vmatpush3.bf16.msra.mxu1 %v6379_v30 }
 0x49c   :  { %4995 = vmatprep.subr.bf16.mxu0 %v6318_v62  ;;  %5019 = vmatprep.subr.bf16.mxu1 %v6049_v6 }
 0x49f   :  { %4997 = vmatpush1.bf16.msra.mxu0 %v6325_v2  ;;  %5021 = vmatpush3.bf16.msra.mxu1 %v6383_v34 }
 0x4a0   :  { %5023 = vmatprep.subr.bf16.mxu0 %v6201_v7  ;;  %5054 = vmatprep.subr.bf16.mxu1 %v6049_v6 }
 0x555   :  { %v1146_v46 = vpop.f32.mrb[8].mxu0  ;;  %v1217_v58 = vpop.f32.mrb[18].mxu1 }
 0x556   :  { %v5688_v48 = vadd.f32 %v1146_v46, %v6433_v8  ;;  %v1148_v63 = vpop.f32.mrb[9].mxu0  ;;  %v4204_v41 = vpop.f32.mrb[19].mxu1  ;;  %v1235_v25 = vadd.f32 %v6444_v32, %v1217_v58 }
 0x557   :  { %v5689_v39 = vadd.f32 %v1148_v63, %v6437_v9 }
 0x558   :  { %v3657_v12 = vmul.f32 -1.442695, %v5688_v48 }
 0x559   :  { %v3658_v43 = vmul.f32 -1.442695, %v5689_v39 }
 0x55a   :  { %5793 = vpow2.f32 %v3657_v12 }
 0x55b   :  { %5795 = vpow2.f32 %v3658_v43 }
 0x564   :  { %v5794_v17 = vpop.eup %5793 }
 0x565   :  { %v1225_v20 = vadd.f32 1.0, %v5794_v17  ;;  %v5796_v21 = vpop.eup %5795 }
 0x566   :  { %v1232_v24 = vadd.f32 1.0, %v5796_v21 }
 0x567   :  { %5797 = vrcp.f32 %v1225_v20 }
 0x568   :  { %5799 = vrcp.f32 %v1232_v24 }
 0x571   :  { %v5798_v27 = vpop.eup %5797 }
 0x572   :  { %v1236_v28 = vmul.f32 %v5798_v27, %v1235_v25  ;;  %v5800_v35 = vpop.eup %5799 }
 0x573   :  { %v1239_v38 = vsub.f32 1.0, %v5800_v35  ;;  %v1241_v47 = vmul.f32 %v5800_v35, %v6579_v57 }
 0x574   :  { %v1237_v31 = vadd.f32 %v1236_v28, %v6423_v54 }
 0x576   :  { %5801 = vtanh.f32 %v1237_v31 }
 0x580   :  { %v5802_v40 = vpop.eup %5801 }
 0x581   :  { %v1240_v45 = vmul.f32 %v5802_v40, %v1239_v38 }
 0x583   :  { %v6623_v51 = vadd.f32 %v1241_v47, %v1240_v45  ;;  %v1745_v45 = vld [vmem:[#allocation5] sm:$0xff]  ;;  %v1748_v47 = vld [vmem:[#allocation5 + $0x18] sm:$0xff] }
 0x585   :  { %1309 = vmatmul.mubr.f32.vlgmr.msra.gmra.mrb[10].mxu0 %v6623_v51  ;;  %4238 = vmatmul.mubr.f32.vlgmr.msra.gmra.mrb[20].mxu1 %v6623_v51 }
 0x586   :  { %5025 = vmatpush1.bf16.msra.mxu0 %v6208_v13  ;;  %5056 = vmatpush3.bf16.msra.mxu1 %v6334_v5 }
 0x587   :  { %5027 = vmatprep.subr.bf16.mxu0 %v6211_v14  ;;  %5057 = vmatprep.subr.bf16.mxu1 %v6049_v6 }
 0x588   :  { %1472 = vmatprep.mubr.f32.mxu0 %v6048_v0  ;;  %4272 = vmatprep.mubr.msk.f32.mxu1 %vm6050_vm1, %v6048_v0 }
 0x58a   :  { %5029 = vmatpush1.bf16.msra.mxu0 %v6216_v19  ;;  %5059 = vmatpush3.bf16.msra.mxu1 %v6344_v10 }
 0x58b   :  { %5031 = vmatprep.subr.bf16.mxu0 %v6229_v22  ;;  %5060 = vmatprep.subr.bf16.mxu1 %v6049_v6 }
 0x58e   :  { %5033 = vmatpush1.bf16.msra.mxu0 %v6246_v29  ;;  %5062 = vmatpush3.bf16.msra.mxu1 %v6355_v15 }
 0x58f   :  { %5035 = vmatprep.subr.bf16.mxu0 %v6260_v33  ;;  %5063 = vmatprep.subr.bf16.mxu1 %v6049_v6 }
 0x592   :  { %5037 = vmatpush1.bf16.msra.mxu0 %v6273_v42  ;;  %5065 = vmatpush3.bf16.msra.mxu1 %v6364_v18 }
 0x593   :  { %5039 = vmatprep.subr.bf16.mxu0 %v6281_v44  ;;  %5066 = vmatprep.subr.bf16.mxu1 %v6049_v6 }
 0x596   :  { %5041 = vmatpush1.bf16.msra.mxu0 %v6291_v49  ;;  %5068 = vmatpush3.bf16.msra.mxu1 %v6371_v23 }
 0x597   :  { %5043 = vmatprep.subr.bf16.mxu0 %v6295_v50  ;;  %5069 = vmatprep.subr.bf16.mxu1 %v6049_v6 }
 0x59a   :  { %5045 = vmatpush1.bf16.msra.mxu0 %v6303_v55  ;;  %5071 = vmatpush3.bf16.msra.mxu1 %v6375_v26 }
 0x59b   :  { %5047 = vmatprep.subr.bf16.mxu0 %v6307_v56  ;;  %5072 = vmatprep.subr.bf16.mxu1 %v6049_v6 }
 0x59e   :  { %5049 = vmatpush1.bf16.msra.mxu0 %v6314_v61  ;;  %5074 = vmatpush3.bf16.msra.mxu1 %v6379_v30 }
 0x59f   :  { %5051 = vmatprep.subr.bf16.mxu0 %v6318_v62  ;;  %5075 = vmatprep.subr.bf16.mxu1 %v6049_v6 }
 0x5a2   :  { %5053 = vmatpush1.bf16.msra.mxu0 %v6325_v2  ;;  %5077 = vmatpush3.bf16.msra.mxu1 %v6383_v34 }
 0x5a3   :  { %5079 = vmatprep.subr.bf16.mxu0 %v6201_v7  ;;  %5110 = vmatprep.subr.bf16.mxu1 %v6049_v6 }
 0x658   :  { %v1310_v54 = vpop.f32.mrb[10].mxu0  ;;  %v1381_v53 = vpop.f32.mrb[20].mxu1 }
 0x659   :  { %v5690_v46 = vadd.f32 %v1310_v54, %v6433_v8  ;;  %v1312_v58 = vpop.f32.mrb[11].mxu0  ;;  %v4239_v48 = vpop.f32.mrb[21].mxu1  ;;  %v1399_v7 = vadd.f32 %v6444_v32, %v1381_v53  ;;  %v1752_v53 = vld [vmem:[#allocation5 + $0x38] sm:$0xff] }
 0x65a   :  { %v5691_v41 = vadd.f32 %v1312_v58, %v6437_v9 }
 0x65b   :  { %v3659_v63 = vmul.f32 -1.442695, %v5690_v46  ;;  %v1755_v46 = vld [vmem:[#allocation5 + $0x50] sm:$0xff] }
 0x65c   :  { %v3660_v12 = vmul.f32 -1.442695, %v5691_v41  ;;  %v1756_v41 = vld [vmem:[#allocation5 + $0x58] sm:$0xff] }
 0x65d   :  { %5803 = vpow2.f32 %v3659_v63  ;;  %v1753_v63 = vld [vmem:[#allocation5 + $0x40] sm:$0xff] }
 0x65e   :  { %5805 = vpow2.f32 %v3660_v12  ;;  %v5136_v12 = vpack.c.bf16 %v1748_v47, %v1745_v45  ;;  %v1775_v45 = vld [vmem:[#allocation5 + $0xf0] sm:$0xff]  ;;  %v1778_v47 = vld [vmem:[#allocation5 + $0x108] sm:$0xff] }
 0x667   :  { %v5804_v39 = vpop.eup %5803 }
 0x668   :  { %v1389_v43 = vadd.f32 1.0, %v5804_v39  ;;  %v5806_v17 = vpop.eup %5805  ;;  %v5138_v39 = vpack.c.bf16 %v1755_v46, %v1752_v53  ;;  %v1785_v53 = vld [vmem:[#allocation5 + $0x140] sm:$0xff]  ;;  %v1783_v46 = vld [vmem:[#allocation5 + $0x130] sm:$0xff] }
 0x669   :  { %v1396_v20 = vadd.f32 1.0, %v5806_v17  ;;  %v1754_v17 = vld [vmem:[#allocation5 + $0x48] sm:$0xff] }
 0x66a   :  { %5807 = vrcp.f32 %v1389_v43  ;;  %v1751_v43 = vld [vmem:[#allocation5 + $0x30] sm:$0xff] }
 0x66b   :  { %5809 = vrcp.f32 %v1396_v20  ;;  %v5170_v20 = vpack.c.bf16 %v1756_v41, %v1753_v63 }
 0x674   :  { %v5808_v21 = vpop.eup %5807 }
 0x675   :  { %v1400_v24 = vmul.f32 %v5808_v21, %v1399_v7  ;;  %v5810_v27 = vpop.eup %5809  ;;  %v1761_v7 = vld [vmem:[#allocation5 + $0x80] sm:$0xff]  ;;  %v1759_v21 = vld [vmem:[#allocation5 + $0x70] sm:$0xff] }
 0x676   :  { %v1403_v28 = vsub.f32 1.0, %v5810_v27  ;;  %v1405_v38 = vmul.f32 %v5810_v27, %v6623_v51 }
 0x677   :  { %v1401_v25 = vadd.f32 %v1400_v24, %v6421_v52  ;;  %v1762_v24 = vld [vmem:[#allocation5 + $0x88] sm:$0xff] }
 0x679   :  { %5811 = vtanh.f32 %v1401_v25  ;;  %v5140_v25 = vpack.c.bf16 %v1754_v17, %v1751_v43  ;;  %v1788_v43 = vld [vmem:[#allocation5 + $0x158] sm:$0xff]  ;;  %v1791_v17 = vld [vmem:[#allocation5 + $0x170] sm:$0xff] }
 0x683   :  { %v5812_v31 = vpop.eup %5811 }
 0x684   :  { %v1404_v35 = vmul.f32 %v5812_v31, %v1403_v28  ;;  %v5174_v28 = vpack.c.bf16 %v1762_v24, %v1759_v21  ;;  %v1757_v31 = vld [vmem:[#allocation5 + $0x60] sm:$0xff]  ;;  %v5162_v21 = vpack.c.bf16 %v1791_v17, %v1788_v43  ;;  %v2071_v17 = vld [vmem:[#allocation7 + $0x158] sm:$0xff] }
 0x686   :  { %v6667_v40 = vadd.f32 %v1405_v38, %v1404_v35  ;;  %v1760_v35 = vld [vmem:[#allocation5 + $0x78] sm:$0xff] }
 0x687   :  { %v1764_v38 = vld [vmem:[#allocation5 + $0x98] sm:$0xff] }
 0x688   :  { %1473 = vmatmul.mubr.f32.vlgmr.msra.gmra.mrb[12].mxu0 %v6667_v40  ;;  %4273 = vmatmul.mubr.f32.vlgmr.msra.gmra.mrb[22].mxu1 %v6667_v40 }
 0x689   :  { %5081 = vmatpush1.bf16.msra.mxu0 %v6208_v13  ;;  %5112 = vmatpush3.bf16.msra.mxu1 %v6334_v5  ;;  %v1746_v13 = vld [vmem:[#allocation5 + $0x8] sm:$0xff] }
 0x68a   :  { %5083 = vmatprep.subr.bf16.mxu0 %v6211_v14  ;;  %5113 = vmatprep.subr.bf16.mxu1 %v6049_v6  ;;  %v1749_v14 = vld [vmem:[#allocation5 + $0x20] sm:$0xff] }
 0x68b   :  { %1636 = vmatprep.mubr.f32.mxu0 %v6048_v0  ;;  %4307 = vmatprep.mubr.msk.f32.mxu1 %vm6050_vm1, %v6048_v0 }
 0x68d   :  { %5085 = vmatpush1.bf16.msra.mxu0 %v6216_v19  ;;  %5115 = vmatpush3.bf16.msra.mxu1 %v6344_v10  ;;  %v1747_v19 = vld [vmem:[#allocation5 + $0x10] sm:$0xff] }
 0x68e   :  { %5087 = vmatprep.subr.bf16.mxu0 %v6229_v22  ;;  %5116 = vmatprep.subr.bf16.mxu1 %v6049_v6  ;;  %v5134_v22 = vpack.c.bf16 %v1749_v14, %v1746_v13  ;;  %v1767_v13 = vld [vmem:[#allocation5 + $0xb0] sm:$0xff]  ;;  %v1765_v14 = vld [vmem:[#allocation5 + $0xa0] sm:$0xff] }
 0x691   :  { %5089 = vmatpush1.bf16.msra.mxu0 %v6246_v29  ;;  %5118 = vmatpush3.bf16.msra.mxu1 %v6355_v15  ;;  %v1750_v29 = vld [vmem:[#allocation5 + $0x28] sm:$0xff] }
 0x692   :  { %5091 = vmatprep.subr.bf16.mxu0 %v6260_v33  ;;  %5119 = vmatprep.subr.bf16.mxu1 %v6049_v6  ;;  %v5166_v33 = vpack.c.bf16 %v1750_v29, %v1747_v19  ;;  %v1768_v19 = vld [vmem:[#allocation5 + $0xb8] sm:$0xff]  ;;  %v5146_v29 = vpack.c.bf16 %v1767_v13, %v1764_v38  ;;  %v2034_v13 = vld [vmem:[#allocation7 + $0x30] sm:$0xff] }
 0x695   :  { %5093 = vmatpush1.bf16.msra.mxu0 %v6273_v42  ;;  %5121 = vmatpush3.bf16.msra.mxu1 %v6364_v18 }
 0x696   :  { %5095 = vmatprep.subr.bf16.mxu0 %v6281_v44  ;;  %5122 = vmatprep.subr.bf16.mxu1 %v6049_v6 }
 0x699   :  { %5097 = vmatpush1.bf16.msra.mxu0 %v6291_v49  ;;  %5124 = vmatpush3.bf16.msra.mxu1 %v6371_v23 }
 0x69a   :  { %5099 = vmatprep.subr.bf16.mxu0 %v6295_v50  ;;  %5125 = vmatprep.subr.bf16.mxu1 %v6049_v6 }
 0x69d   :  { %5101 = vmatpush1.bf16.msra.mxu0 %v6303_v55  ;;  %5127 = vmatpush3.bf16.msra.mxu1 %v6375_v26 }
 0x69e   :  { %5103 = vmatprep.subr.bf16.mxu0 %v6307_v56  ;;  %5128 = vmatprep.subr.bf16.mxu1 %v6049_v6 }
 0x6a1   :  { %5105 = vmatpush1.bf16.msra.mxu0 %v6314_v61  ;;  %5130 = vmatpush3.bf16.msra.mxu1 %v6379_v30 }
 0x6a2   :  { %5107 = vmatprep.subr.bf16.mxu0 %v6318_v62  ;;  %5131 = vmatprep.subr.bf16.mxu1 %v6049_v6 }
 0x6a5   :  { %5109 = vmatpush1.bf16.msra.mxu0 %v6325_v2  ;;  %5133 = vmatpush3.bf16.msra.mxu1 %v6383_v34 }
 0x6a6   :  { %5135 = vmatprep.subr.bf16.mxu0 %v5134_v22  ;;  %5167 = vmatprep.subr.bf16.mxu1 %v5166_v33  ;;  %v5144_v22 = vpack.c.bf16 %v1760_v35, %v1757_v31  ;;  %v2028_v31 = vld [vmem:[#allocation7] sm:$0xff] }
 0x75b   :  { %v1474_v42 = vpop.f32.mrb[12].mxu0  ;;  %v1545_v44 = vpop.f32.mrb[22].mxu1 }
 0x75c   :  { %v5692_v49 = vadd.f32 %v1474_v42, %v6433_v8  ;;  %v1476_v50 = vpop.f32.mrb[13].mxu0  ;;  %v4274_v55 = vpop.f32.mrb[23].mxu1  ;;  %v1563_v18 = vadd.f32 %v6444_v32, %v1545_v44  ;;  %v1763_v42 = vld [vmem:[#allocation5 + $0x90] sm:$0xff]  ;;  %v1766_v44 = vld [vmem:[#allocation5 + $0xa8] sm:$0xff] }
 0x75d   :  { %v5693_v61 = vadd.f32 %v1476_v50, %v6437_v9  ;;  %v1773_v50 = vld [vmem:[#allocation5 + $0xe0] sm:$0xff]  ;;  %v1771_v55 = vld [vmem:[#allocation5 + $0xd0] sm:$0xff] }
 0x75e   :  { %v3661_v56 = vmul.f32 -1.442695, %v5692_v49  ;;  %v1770_v49 = vld [vmem:[#allocation5 + $0xc8] sm:$0xff] }
 0x75f   :  { %v3662_v62 = vmul.f32 -1.442695, %v5693_v61  ;;  %v5148_v61 = vpack.c.bf16 %v1766_v44, %v1763_v42  ;;  %v2040_v42 = vld [vmem:[#allocation7 + $0x60] sm:$0xff]  ;;  %v2043_v44 = vld [vmem:[#allocation7 + $0x78] sm:$0xff] }
 0x760   :  { %5813 = vpow2.f32 %v3661_v56  ;;  %v1774_v56 = vld [vmem:[#allocation5 + $0xe8] sm:$0xff] }
 0x761   :  { %5815 = vpow2.f32 %v3662_v62  ;;  %v5150_v62 = vpack.c.bf16 %v1773_v50, %v1770_v49  ;;  %v6750_v49 = vpack.c.bf16 %v2043_v44, %v2040_v42  ;;  %v2047_v50 = vld [vmem:[#allocation7 + $0x98] sm:$0xff] }
 0x762   :  { %v2063_v42 = vld [vmem:[#allocation7 + $0x118] sm:$0xff] }
 0x76a   :  { %v5814_v2 = vpop.eup %5813 }
 0x76b   :  { %v1553_v5 = vadd.f32 1.0, %v5814_v2  ;;  %v5816_v10 = vpop.eup %5815  ;;  %v5182_v2 = vpack.c.bf16 %v1774_v56, %v1771_v55  ;;  %v2050_v55 = vld [vmem:[#allocation7 + $0xb0] sm:$0xff] }
 0x76c   :  { %v1560_v15 = vadd.f32 1.0, %v5816_v10  ;;  %v1772_v10 = vld [vmem:[#allocation5 + $0xd8] sm:$0xff]  ;;  %v6754_v56 = vpack.c.bf16 %v2050_v55, %v2047_v50  ;;  %v2066_v50 = vld [vmem:[#allocation7 + $0x130] sm:$0xff]  ;;  %v2069_v55 = vld [vmem:[#allocation7 + $0x148] sm:$0xff] }
 0x76d   :  { %5817 = vrcp.f32 %v1553_v5  ;;  %v1769_v5 = vld [vmem:[#allocation5 + $0xc0] sm:$0xff] }
 0x76e   :  { %5819 = vrcp.f32 %v1560_v15  ;;  %v1776_v15 = vld [vmem:[#allocation5 + $0xf8] sm:$0xff] }
 0x777   :  { %v5818_v23 = vpop.eup %5817 }
 0x778   :  { %v1564_v26 = vmul.f32 %v5818_v23, %v1563_v18  ;;  %v5820_v34 = vpop.eup %5819  ;;  %v1779_v18 = vld [vmem:[#allocation5 + $0x110] sm:$0xff]  ;;  %v1777_v23 = vld [vmem:[#allocation5 + $0x100] sm:$0xff] }
 0x779   :  { %v1567_v52 = vsub.f32 1.0, %v5820_v34  ;;  %v1569_v48 = vmul.f32 %v5820_v34, %v6667_v40  ;;  %v5154_v34 = vpack.c.bf16 %v1779_v18, %v1776_v15  ;;  %v2052_v18 = vld [vmem:[#allocation7 + $0xc0] sm:$0xff] }
 0x77a   :  { %v1565_v30 = vadd.f32 %v1564_v26, %v6427_v1  ;;  %v1758_v1 = vld [vmem:[#allocation5 + $0x68] sm:$0xff]  ;;  %v1780_v26 = vld [vmem:[#allocation5 + $0x118] sm:$0xff] }
 0x77b   :  { %v5142_v27 = vpack.c.bf16 %v1761_v7, %v1758_v1  ;;  %v1789_v1 = vld [vmem:[#allocation5 + $0x160] sm:$0xff] }
 0x77c   :  { %5821 = vtanh.f32 %v1565_v30  ;;  %v5152_v30 = vpack.c.bf16 %v1772_v10, %v1769_v5  ;;  %v2053_v5 = vld [vmem:[#allocation7 + $0xc8] sm:$0xff]  ;;  %v2056_v10 = vld [vmem:[#allocation7 + $0xe0] sm:$0xff] }
 0x77d   :  { %v6760_v15 = vpack.c.bf16 %v2056_v10, %v2053_v5  ;;  %v2075_v5 = vld [vmem:[#allocation7 + $0x178] sm:$0xff] }
 0x786   :  { %v5822_v54 = vpop.eup %5821 }
 0x787   :  { %v1568_v58 = vmul.f32 %v5822_v54, %v1567_v52  ;;  %v5186_v52 = vpack.c.bf16 %v1780_v26, %v1777_v23  ;;  %v1782_v54 = vld [vmem:[#allocation5 + $0x128] sm:$0xff]  ;;  %v2055_v23 = vld [vmem:[#allocation7 + $0xd8] sm:$0xff] }
 0x788   :  { %v5158_v63 = vpack.c.bf16 %v1785_v53, %v1782_v54  ;;  %v6762_v26 = vpack.c.bf16 %v2055_v23, %v2052_v18  ;;  %v2065_v53 = vld [vmem:[#allocation7 + $0x128] sm:$0xff] }
 0x789   :  { %v6709_v32 = vadd.f32 %v1569_v48, %v1568_v58  ;;  %v1786_v58 = vld [vmem:[#allocation5 + $0x148] sm:$0xff]  ;;  %v5156_v48 = vpack.c.bf16 %v1778_v47, %v1775_v45  ;;  %v2058_v45 = vld [vmem:[#allocation7 + $0xf0] sm:$0xff] }
 0x78a   :  { %v5190_v41 = vpack.c.bf16 %v1786_v58, %v1783_v46  ;;  %v2061_v47 = vld [vmem:[#allocation7 + $0x108] sm:$0xff]  ;;  %v2068_v46 = vld [vmem:[#allocation7 + $0x140] sm:$0xff] }
 0x78b   :  { %1637 = vmatmul.mubr.f32.vlgmr.msra.gmra.mrb[14].mxu0 %v6709_v32  ;;  %4308 = vmatmul.mubr.f32.vlgmr.msra.gmra.mrb[24].mxu1 %v6709_v32  ;;  %v6768_v54 = vpack.c.bf16 %v2061_v47, %v2058_v45  ;;  %v2064_v58 = vld [vmem:[#allocation7 + $0x120] sm:$0xff] }
 0x78c   :  { %5137 = vmatpush1.bf16.msra.mxu0 %v5136_v12  ;;  %5169 = vmatpush3.bf16.msra.mxu1 %v5166_v33  ;;  %v5178_v33 = vpack.c.bf16 %v1768_v19, %v1765_v14  ;;  %v1781_v12 = vld [vmem:[#allocation5 + $0x120] sm:$0xff]  ;;  %v2037_v14 = vld [vmem:[#allocation7 + $0x48] sm:$0xff] }
 0x78d   :  { %4342 = vmatprep.mubr.f32.mxu1 %v6447_v16  ;;  %5139 = vmatprep.subr.bf16.mxu0 %v5138_v39  ;;  %v1784_v39 = vld [vmem:[#allocation5 + $0x138] sm:$0xff]  ;;  %v6744_v19 = vpack.c.bf16 %v2037_v14, %v2034_v13  ;;  %v2054_v13 = vld [vmem:[#allocation7 + $0xd0] sm:$0xff]  ;;  %v2057_v14 = vld [vmem:[#allocation7 + $0xe8] sm:$0xff] }
 0x78e   :  { %5171 = vmatprep.subr.bf16.mxu1 %v5170_v20  ;;  %1874 = vmatprep.mubr.f32.mxu0 %v6048_v0  ;;  %v5160_v7 = vpack.c.bf16 %v1784_v39, %v1781_v12  ;;  %v2033_v12 = vld [vmem:[#allocation7 + $0x28] sm:$0xff] }
 0x790   :  { %5141 = vmatpush1.bf16.msra.mxu0 %v5140_v25  ;;  %5173 = vmatpush3.bf16.msra.mxu1 %v5170_v20  ;;  %v1792_v20 = vld [vmem:[#allocation5 + $0x178] sm:$0xff]  ;;  %v1787_v25 = vld [vmem:[#allocation5 + $0x150] sm:$0xff] }
 0x791   :  { %5143 = vmatprep.subr.bf16.mxu0 %v5142_v27  ;;  %5175 = vmatprep.subr.bf16.mxu1 %v5174_v28  ;;  %v5194_v24 = vpack.c.bf16 %v1792_v20, %v1789_v1  ;;  %v1790_v27 = vld [vmem:[#allocation5 + $0x168] sm:$0xff]  ;;  %v2074_v1 = vld [vmem:[#allocation7 + $0x170] sm:$0xff] }
 0x792   :  { %v6779_v20 = vpack.c.bf16 %v2074_v1, %v2071_v17  ;;  %v5945_v17 = vld [vmem:[%s7251_s4] ss:$0 sm:$0xff] }
 0x794   :  { %5145 = vmatpush1.bf16.msra.mxu0 %v5144_v22  ;;  %5177 = vmatpush3.bf16.msra.mxu1 %v5174_v28  ;;  %v5164_v28 = vpack.c.bf16 %v1790_v27, %v1787_v25  ;;  %v2041_v22 = vld [vmem:[#allocation7 + $0x68] sm:$0xff]  ;;  %v2036_v25 = vld [vmem:[#allocation7 + $0x40] sm:$0xff]  ;;  %v2039_v27 = vld [vmem:[#allocation7 + $0x58] sm:$0xff] }
 0x795   :  { %5147 = vmatprep.subr.bf16.mxu0 %v5146_v29  ;;  %5179 = vmatprep.subr.bf16.mxu1 %v5178_v33  ;;  %v2044_v29 = vld [vmem:[#allocation7 + $0x80] sm:$0xff] }
 0x798   :  { %5149 = vmatpush1.bf16.msra.mxu0 %v5148_v61  ;;  %5181 = vmatpush3.bf16.msra.mxu1 %v5178_v33  ;;  %v6748_v33 = vpack.c.bf16 %v2044_v29, %v2041_v22  ;;  %v2046_v61 = vld [vmem:[#allocation7 + $0x90] sm:$0xff]  ;;  %v6800_v22 = vpack.c.bf16 %v2057_v14, %v2054_v13  ;;  %v2060_v29 = vld [vmem:[#allocation7 + $0x100] sm:$0xff] }
 0x799   :  { %5151 = vmatprep.subr.bf16.mxu0 %v5150_v62  ;;  %5183 = vmatprep.subr.bf16.mxu1 %v5182_v2  ;;  %v2049_v62 = vld [vmem:[#allocation7 + $0xa8] sm:$0xff]  ;;  %v6804_v44 = vpack.c.bf16 %v2063_v42, %v2060_v29 }
 0x79c   :  { %5153 = vmatpush1.bf16.msra.mxu0 %v5152_v30  ;;  %5185 = vmatpush3.bf16.msra.mxu1 %v5182_v2  ;;  %v6756_v2 = vpack.c.bf16 %v2049_v62, %v2046_v61  ;;  %v2059_v30 = vld [vmem:[#allocation7 + $0xf8] sm:$0xff]  ;;  %v6808_v61 = vpack.c.bf16 %v2069_v55, %v2066_v50  ;;  %v2072_v62 = vld [vmem:[#allocation7 + $0x160] sm:$0xff] }
 0x79d   :  { %5155 = vmatprep.subr.bf16.mxu0 %v5154_v34  ;;  %5187 = vmatprep.subr.bf16.mxu1 %v5186_v52  ;;  %v2062_v34 = vld [vmem:[#allocation7 + $0x110] sm:$0xff]  ;;  %v6812_v10 = vpack.c.bf16 %v2075_v5, %v2072_v62 }
 0x7a0   :  { %5157 = vmatpush1.bf16.msra.mxu0 %v5156_v48  ;;  %5189 = vmatpush3.bf16.msra.mxu1 %v5186_v52  ;;  %v6766_v52 = vpack.c.bf16 %v2062_v34, %v2059_v30  ;;  %v6772_v48 = vpack.c.bf16 %v2068_v46, %v2065_v53 }
 0x7a1   :  { %5159 = vmatprep.subr.bf16.mxu0 %v5158_v63  ;;  %5191 = vmatprep.subr.bf16.mxu1 %v5190_v41  ;;  %v2067_v63 = vld [vmem:[#allocation7 + $0x138] sm:$0xff] }
 0x7a2   :  { %v6774_v39 = vpack.c.bf16 %v2067_v63, %v2064_v58 }
 0x7a4   :  { %5161 = vmatpush1.bf16.msra.mxu0 %v5160_v7  ;;  %5193 = vmatpush3.bf16.msra.mxu1 %v5190_v41  ;;  %v2030_v41 = vld [vmem:[#allocation7 + $0x10] sm:$0xff] }
 0x7a5   :  { %5163 = vmatprep.subr.bf16.mxu0 %v5162_v21  ;;  %5195 = vmatprep.subr.bf16.mxu1 %v5194_v24  ;;  %v6776_v43 = vpack.c.bf16 %v2033_v12, %v2030_v41  ;;  %v2070_v7 = vld [vmem:[#allocation7 + $0x150] sm:$0xff]  ;;  %v2073_v21 = vld [vmem:[#allocation7 + $0x168] sm:$0xff] }
 0x7a8   :  { %5165 = vmatpush1.bf16.msra.mxu0 %v5164_v28  ;;  %5197 = vmatpush3.bf16.msra.mxu1 %v5194_v24  ;;  %v6785_v24 = vpack.c.bf16 %v2073_v21, %v2070_v7  ;;  %v6787_v28 = vpack.c.bf16 %v2039_v27, %v2036_v25 }
 0x7a9   :  { %5230 = vmatprep.subr.bf16.mxu1 %v6049_v6 }
 0x7ab   :  { %1875 = vmatmul.mubr.f32.vlgmr.msra.gmra.mrb[16].mxu0 %v6447_v16  ;;  %4343 = vmatmul.mubr.f32.vlgmr.msra.gmra.mrb[26].mxu1 %v6491_v11  ;;  %v2029_v16 = vld [vmem:[#allocation7 + $0x8] sm:$0xff] }
 0x7ac   :  { %4345 = vmatprep.mubr.f32.mxu1 %v6535_v60  ;;  %1880 = vmatprep.mubr.f32.mxu0 %v6048_v0 }
 0x7ad   :  { %5232 = vmatpush3.bf16.msra.mxu1 %v6776_v43 }
 0x7ae   :  { %5233 = vmatprep.subr.bf16.mxu1 %v6049_v6 }
 0x7af   :  { %1881 = vmatmul.mubr.f32.gmra.mrb[18].mxu0 %v6491_v11  ;;  %4346 = vmatmul.mubr.f32.gmra.mrb[28].mxu1 %v6579_v57  ;;  %v2032_v11 = vld [vmem:[#allocation7 + $0x20] sm:$0xff] }
 0x7b0   :  { %4348 = vmatprep.mubr.f32.mxu1 %v6623_v51  ;;  %1886 = vmatprep.mubr.f32.mxu0 %v6048_v0 }
 0x7b1   :  { %5235 = vmatpush3.bf16.msra.mxu1 %v6787_v28 }
 0x7b2   :  { %5236 = vmatprep.subr.bf16.mxu1 %v6049_v6 }
 0x7b3   :  { %1887 = vmatmul.mubr.f32.gmra.mrb[20].mxu0 %v6535_v60  ;;  %4349 = vmatmul.mubr.f32.gmra.mrb[30].mxu1 %v6667_v40  ;;  %v6736_v60 = vpack.c.bf16 %v2032_v11, %v2029_v16  ;;  %v2042_v16 = vld [vmem:[#allocation7 + $0x70] sm:$0xff]  ;;  %v2045_v11 = vld [vmem:[#allocation7 + $0x88] sm:$0xff] }
 0x7b4   :  { %4351 = vmatprep.mubr.f32.mxu1 %v6709_v32  ;;  %1892 = vmatprep.mubr.f32.mxu0 %v6048_v0 }
 0x7b5   :  { %5199 = vmatprep.subr.bf16.mxu0 %v6736_v60 }
 0x7b7   :  { %1893 = vmatmul.mubr.f32.gmra.mrb[22].mxu0 %v6579_v57  ;;  %v2031_v57 = vld [vmem:[#allocation7 + $0x18] sm:$0xff] }
 0x7b8   :  { %1898 = vmatprep.mubr.f32.mxu0 %v6048_v0  ;;  %v6738_v35 = vpack.c.bf16 %v2031_v57, %v2028_v31  ;;  %v2048_v31 = vld [vmem:[#allocation7 + $0xa0] sm:$0xff]  ;;  %v6793_v57 = vpack.c.bf16 %v2045_v11, %v2042_v16 }
 0x7ba   :  { %5201 = vmatpush1.bf16.msra.mxu0 %v6738_v35  ;;  %5238 = vmatpush3.bf16.msra.mxu1 %v6793_v57 }
 0x7bb   :  { %1899 = vmatmul.mubr.f32.gmra.mrb[24].mxu0 %v6623_v51  ;;  %v2035_v51 = vld [vmem:[#allocation7 + $0x38] sm:$0xff]  ;;  %5239 = vmatprep.subr.bf16.mxu1 %v6049_v6 }
 0x7bc   :  { %1904 = vmatprep.mubr.f32.mxu0 %v6048_v0 }
 0x7bf   :  { %1905 = vmatmul.mubr.f32.gmra.mrb[26].mxu0 %v6667_v40  ;;  %v2038_v40 = vld [vmem:[#allocation7 + $0x50] sm:$0xff] }
 0x7c0   :  { %1910 = vmatprep.mubr.f32.mxu0 %v6048_v0  ;;  %v6742_v38 = vpack.c.bf16 %v2038_v40, %v2035_v51  ;;  %v2051_v51 = vld [vmem:[#allocation7 + $0xb8] sm:$0xff] }
 0x7c1   :  { %v6796_v40 = vpack.c.bf16 %v2051_v51, %v2048_v31 }
 0x7c2   :  { %5203 = vmatprep.subr.bf16.mxu0 %v6742_v38 }
 0x7c3   :  { %1911 = vmatmul.mubr.f32.gmra.mrb[28].mxu0 %v6709_v32  ;;  %5241 = vmatpush3.bf16.msra.mxu1 %v6796_v40 }
 0x7c4   :  { %1916 = vmatprep.mubr.f32.mxu0 %v6048_v0  ;;  %5205 = vmatpush1.bf16.msra.mxu0 %v6744_v19 }
 0x7c5   :  { %5207 = vmatprep.subr.bf16.mxu0 %v6748_v33  ;;  %5242 = vmatprep.subr.bf16.mxu1 %v6049_v6 }
 0x7c7   :  { %5244 = vmatpush3.bf16.msra.mxu1 %v6800_v22 }
 0x7c8   :  { %5209 = vmatpush1.bf16.msra.mxu0 %v6750_v49  ;;  %5245 = vmatprep.subr.bf16.mxu1 %v6049_v6 }
 0x7c9   :  { %5211 = vmatprep.subr.bf16.mxu0 %v6754_v56 }
 0x7cb   :  { %5247 = vmatpush3.bf16.msra.mxu1 %v6804_v44 }
 0x7cc   :  { %5213 = vmatpush1.bf16.msra.mxu0 %v6756_v2  ;;  %5248 = vmatprep.subr.bf16.mxu1 %v6049_v6 }
 0x7cd   :  { %5215 = vmatprep.subr.bf16.mxu0 %v6760_v15 }
 0x7cf   :  { %5250 = vmatpush3.bf16.msra.mxu1 %v6808_v61 }
 0x7d0   :  { %5217 = vmatpush1.bf16.msra.mxu0 %v6762_v26  ;;  %5251 = vmatprep.subr.bf16.mxu1 %v6049_v6 }
 0x7d1   :  { %5219 = vmatprep.subr.bf16.mxu0 %v6766_v52 }
 0x7d3   :  { %5253 = vmatpush3.bf16.msra.mxu1 %v6812_v10 }
 0x7d4   :  { %5221 = vmatpush1.bf16.msra.mxu0 %v6768_v54  ;;  %5286 = vmatprep.subr.bf16.mxu1 %v6049_v6 }
 0x7d5   :  { %5223 = vmatprep.subr.bf16.mxu0 %v6772_v48 }
 0x7d8   :  { %5225 = vmatpush1.bf16.msra.mxu0 %v6774_v39 }
 0x7d9   :  { %5227 = vmatprep.subr.bf16.mxu0 %v6779_v20 }
 0x7dc   :  { %5229 = vmatpush1.bf16.msra.mxu0 %v6785_v24 }
 0x7dd   :  { %5255 = vmatprep.subr.bf16.mxu0 %v6736_v60 }
 0x85e   :  { %v1638_v18 = vpop.f32.mrb[14].mxu0  ;;  %v1709_v23 = vpop.f32.mrb[24].mxu1 }
 0x85f   :  { %v5694_v30 = vadd.f32 %v1638_v18, %v6433_v8  ;;  %v1640_v34 = vpop.f32.mrb[15].mxu0  ;;  %v4309_v45 = vpop.f32.mrb[25].mxu1  ;;  %v1727_v1 = vadd.f32 %v5945_v17, %v1709_v23 }
 0x860   :  { %v5695_v53 = vadd.f32 %v1640_v34, %v6437_v9 }
 0x861   :  { %v3663_v47 = vmul.f32 -1.442695, %v5694_v30 }
 0x862   :  { %v3664_v46 = vmul.f32 -1.442695, %v5695_v53 }
 0x863   :  { %5823 = vpow2.f32 %v3663_v47 }
 0x864   :  { %5825 = vpow2.f32 %v3664_v46 }
 0x86d   :  { %v5824_v58 = vpop.eup %5823 }
 0x86e   :  { %v1717_v63 = vadd.f32 1.0, %v5824_v58  ;;  %v5826_v41 = vpop.eup %5825 }
 0x86f   :  { %v1724_v12 = vadd.f32 1.0, %v5826_v41 }
 0x870   :  { %5827 = vrcp.f32 %v1717_v63 }
 0x871   :  { %5829 = vrcp.f32 %v1724_v12 }
 0x87a   :  { %v5828_v7 = vpop.eup %5827 }
 0x87b   :  { %v1728_v8 = vmul.f32 %v5828_v7, %v1727_v1  ;;  %v5830_v11 = vpop.eup %5829 }
 0x87c   :  { %v1731_v13 = vsub.f32 1.0, %v5830_v11  ;;  %v1733_v42 = vmul.f32 %v5830_v11, %v6709_v32  ;;  %v1793_v32 = vld [vmem:[%s7254_s7] sm:$0x7] }
 0x87d   :  { %v1729_v21 = vadd.f32 %v1728_v8, %v6425_v59  ;;  %v6888_v62 = vrot.slane %v1793_v32, %v113_v3  ;;  %v6892_v18 = vrot.slane %v1793_v32, %v117_v4  ;;  %v6899_v4 = vld [vmem:[%s7255_s8] ss:$0 sm:$0xff]  ;;  %v6903_v41 = vrot.slane %v1793_v32, %v121_v37 }
 0x87e   :  { %v6823_v25 = vpop.f32.mrb[26].mxu1 }
 0x87f   :  { %5831 = vtanh.f32 %v1729_v21  ;;  %v6825_v9 = vpop.f32.mrb[27].mxu1 }
 0x880   :  { %v1990_v7 = vadd.f32 %v6825_v9, %v6903_v41 }
 0x882   :  { %v6827_v27 = vpop.f32.mrb[28].mxu1 }
 0x883   :  { %v6829_v16 = vpop.f32.mrb[29].mxu1 }
 0x886   :  { %v6831_v31 = vpop.f32.mrb[30].mxu1 }
 0x887   :  { %v6833_v51 = vpop.f32.mrb[31].mxu1 }
 0x889   :  { %v5832_v14 = vpop.eup %5831 }
 0x88a   :  { %v1732_v29 = vmul.f32 %v5832_v14, %v1731_v13 }
 0x88c   :  { %v1734_v59 = vadd.f32 %v1733_v42, %v1732_v29 }
 0x88e   :  { %1736 = vst [vmem:[%s7259_s12] sm:$0xff] %v1734_v59  ;;  %1917 = vmatmul.mubr.f32.gmra.mrb[30].mxu0 %v1734_v59  ;;  %4352 = vmatmul.mubr.f32.gmra.mrb[32].mxu1 %v1734_v59 }
 0x88f   :  { %2147 = vmatprep.mubr.f32.mxu0 %v6048_v0  ;;  %4386 = vmatprep.mubr.msk.f32.mxu1 %vm6050_vm1, %v6048_v0 }
 0x892   :  { %2148 = vmatmul.mubr.f32.vlgmr.msra.gmra.mrb[16].mxu0 %v6048_v0  ;;  %4387 = vmatmul.mubr.f32.vlgmr.msra.gmra.mrb[34].mxu1 %v6048_v0 }
 0x893   :  { %5257 = vmatpush1.bf16.msra.mxu0 %v6738_v35  ;;  %5288 = vmatpush3.bf16.msra.mxu1 %v6776_v43 }
 0x894   :  { %5259 = vmatprep.subr.bf16.mxu0 %v6742_v38  ;;  %5289 = vmatprep.subr.bf16.mxu1 %v6049_v6 }
 0x895   :  { %2311 = vmatprep.mubr.f32.mxu0 %v6048_v0  ;;  %4421 = vmatprep.mubr.msk.f32.mxu1 %vm6050_vm1, %v6048_v0 }
 0x897   :  { %5261 = vmatpush1.bf16.msra.mxu0 %v6744_v19  ;;  %5291 = vmatpush3.bf16.msra.mxu1 %v6787_v28 }
 0x898   :  { %5263 = vmatprep.subr.bf16.mxu0 %v6748_v33  ;;  %5292 = vmatprep.subr.bf16.mxu1 %v6049_v6 }
 0x89b   :  { %5265 = vmatpush1.bf16.msra.mxu0 %v6750_v49  ;;  %5294 = vmatpush3.bf16.msra.mxu1 %v6793_v57 }
 0x89c   :  { %5267 = vmatprep.subr.bf16.mxu0 %v6754_v56  ;;  %5295 = vmatprep.subr.bf16.mxu1 %v6049_v6 }
 0x89f   :  { %5269 = vmatpush1.bf16.msra.mxu0 %v6756_v2  ;;  %5297 = vmatpush3.bf16.msra.mxu1 %v6796_v40 }
 0x8a0   :  { %5271 = vmatprep.subr.bf16.mxu0 %v6760_v15  ;;  %5298 = vmatprep.subr.bf16.mxu1 %v6049_v6 }
 0x8a3   :  { %5273 = vmatpush1.bf16.msra.mxu0 %v6762_v26  ;;  %5300 = vmatpush3.bf16.msra.mxu1 %v6800_v22 }
 0x8a4   :  { %5275 = vmatprep.subr.bf16.mxu0 %v6766_v52  ;;  %5301 = vmatprep.subr.bf16.mxu1 %v6049_v6 }
 0x8a7   :  { %5277 = vmatpush1.bf16.msra.mxu0 %v6768_v54  ;;  %5303 = vmatpush3.bf16.msra.mxu1 %v6804_v44 }
 0x8a8   :  { %5279 = vmatprep.subr.bf16.mxu0 %v6772_v48  ;;  %5304 = vmatprep.subr.bf16.mxu1 %v6049_v6 }
 0x8ab   :  { %5281 = vmatpush1.bf16.msra.mxu0 %v6774_v39  ;;  %5306 = vmatpush3.bf16.msra.mxu1 %v6808_v61 }
 0x8ac   :  { %5283 = vmatprep.subr.bf16.mxu0 %v6779_v20  ;;  %5307 = vmatprep.subr.bf16.mxu1 %v6049_v6 }
 0x8af   :  { %5285 = vmatpush1.bf16.msra.mxu0 %v6785_v24  ;;  %5309 = vmatpush3.bf16.msra.mxu1 %v6812_v10 }
 0x8b0   :  { %5311 = vmatprep.subr.bf16.mxu0 %v6736_v60  ;;  %5342 = vmatprep.subr.bf16.mxu1 %v6049_v6 }
 0x961   :  { %v6882_v50 = vpop.f32.mrb[32].mxu1 }
 0x962   :  { %v6884_v55 = vpop.f32.mrb[33].mxu1 }
 0x965   :  { %v2149_v5 = vpop.f32.mrb[16].mxu0  ;;  %v2220_v23 = vpop.f32.mrb[34].mxu1 }
 0x966   :  { %v5696_v30 = vadd.f32 %v2149_v5, %v6888_v62  ;;  %v2151_v34 = vpop.f32.mrb[17].mxu0  ;;  %v4388_v45 = vpop.f32.mrb[35].mxu1  ;;  %v2238_v17 = vadd.f32 %v6899_v4, %v2220_v23 }
 0x967   :  { %v5697_v53 = vadd.f32 %v2151_v34, %v6892_v18 }
 0x968   :  { %v3666_v47 = vmul.f32 -1.442695, %v5696_v30 }
 0x969   :  { %v3667_v46 = vmul.f32 -1.442695, %v5697_v53 }
 0x96a   :  { %5833 = vpow2.f32 %v3666_v47 }
 0x96b   :  { %5835 = vpow2.f32 %v3667_v46 }
 0x974   :  { %v5834_v58 = vpop.eup %5833 }
 0x975   :  { %v2228_v63 = vadd.f32 1.0, %v5834_v58  ;;  %v5836_v3 = vpop.eup %5835 }
 0x976   :  { %v2235_v12 = vadd.f32 1.0, %v5836_v3  ;;  %v1995_v3 = vadd.f32 %v6823_v25, %v6903_v41 }
 0x977   :  { %5837 = vrcp.f32 %v2228_v63 }
 0x978   :  { %5839 = vrcp.f32 %v2235_v12 }
 0x981   :  { %v5838_v1 = vpop.eup %5837 }
 0x982   :  { %v2239_v8 = vmul.f32 %v5838_v1, %v2238_v17  ;;  %v5840_v11 = vpop.eup %5839 }
 0x983   :  { %v2242_v13 = vsub.f32 1.0, %v5840_v11  ;;  %v2244_v42 = vmul.f32 0.0, %v5840_v11 }
 0x984   :  { %v2240_v21 = vadd.f32 %v2239_v8, %v1990_v7 }
 0x986   :  { %5841 = vtanh.f32 %v2240_v21 }
 0x990   :  { %v5842_v14 = vpop.eup %5841 }
 0x991   :  { %v2243_v29 = vmul.f32 %v5842_v14, %v2242_v13 }
 0x993   :  { %v6908_v59 = vadd.f32 %v2244_v42, %v2243_v29 }
 0x995   :  { %2312 = vmatmul.mubr.f32.vlgmr.msra.gmra.mrb[18].mxu0 %v6908_v59  ;;  %4422 = vmatmul.mubr.f32.vlgmr.msra.gmra.mrb[36].mxu1 %v6908_v59 }
 0x996   :  { %5313 = vmatpush1.bf16.msra.mxu0 %v6738_v35  ;;  %5344 = vmatpush3.bf16.msra.mxu1 %v6776_v43 }
 0x997   :  { %5315 = vmatprep.subr.bf16.mxu0 %v6742_v38  ;;  %5345 = vmatprep.subr.bf16.mxu1 %v6049_v6 }
 0x998   :  { %2475 = vmatprep.mubr.f32.mxu0 %v6048_v0  ;;  %4456 = vmatprep.mubr.msk.f32.mxu1 %vm6050_vm1, %v6048_v0 }
 0x99a   :  { %5317 = vmatpush1.bf16.msra.mxu0 %v6744_v19  ;;  %5347 = vmatpush3.bf16.msra.mxu1 %v6787_v28 }
 0x99b   :  { %5319 = vmatprep.subr.bf16.mxu0 %v6748_v33  ;;  %5348 = vmatprep.subr.bf16.mxu1 %v6049_v6 }
 0x99e   :  { %5321 = vmatpush1.bf16.msra.mxu0 %v6750_v49  ;;  %5350 = vmatpush3.bf16.msra.mxu1 %v6793_v57 }
 0x99f   :  { %5323 = vmatprep.subr.bf16.mxu0 %v6754_v56  ;;  %5351 = vmatprep.subr.bf16.mxu1 %v6049_v6 }
 0x9a2   :  { %5325 = vmatpush1.bf16.msra.mxu0 %v6756_v2  ;;  %5353 = vmatpush3.bf16.msra.mxu1 %v6796_v40 }
 0x9a3   :  { %5327 = vmatprep.subr.bf16.mxu0 %v6760_v15  ;;  %5354 = vmatprep.subr.bf16.mxu1 %v6049_v6 }
 0x9a6   :  { %5329 = vmatpush1.bf16.msra.mxu0 %v6762_v26  ;;  %5356 = vmatpush3.bf16.msra.mxu1 %v6800_v22 }
 0x9a7   :  { %5331 = vmatprep.subr.bf16.mxu0 %v6766_v52  ;;  %5357 = vmatprep.subr.bf16.mxu1 %v6049_v6 }
 0x9aa   :  { %5333 = vmatpush1.bf16.msra.mxu0 %v6768_v54  ;;  %5359 = vmatpush3.bf16.msra.mxu1 %v6804_v44 }
 0x9ab   :  { %5335 = vmatprep.subr.bf16.mxu0 %v6772_v48  ;;  %5360 = vmatprep.subr.bf16.mxu1 %v6049_v6 }
 0x9ae   :  { %5337 = vmatpush1.bf16.msra.mxu0 %v6774_v39  ;;  %5362 = vmatpush3.bf16.msra.mxu1 %v6808_v61 }
 0x9af   :  { %5339 = vmatprep.subr.bf16.mxu0 %v6779_v20  ;;  %5363 = vmatprep.subr.bf16.mxu1 %v6049_v6 }
 0x9b2   :  { %5341 = vmatpush1.bf16.msra.mxu0 %v6785_v24  ;;  %5365 = vmatpush3.bf16.msra.mxu1 %v6812_v10 }
 0x9b3   :  { %5367 = vmatprep.subr.bf16.mxu0 %v6736_v60  ;;  %5398 = vmatprep.subr.bf16.mxu1 %v6049_v6 }
 0xa68   :  { %v2313_v36 = vpop.f32.mrb[18].mxu0  ;;  %v2384_v37 = vpop.f32.mrb[36].mxu1 }
 0xa69   :  { %v5698_v9 = vadd.f32 %v2313_v36, %v6888_v62  ;;  %v2315_v32 = vpop.f32.mrb[19].mxu0  ;;  %v4423_v5 = vpop.f32.mrb[37].mxu1  ;;  %v2402_v58 = vadd.f32 %v6899_v4, %v2384_v37 }
 0xa6a   :  { %v5699_v30 = vadd.f32 %v2315_v32, %v6892_v18 }
 0xa6b   :  { %v3668_v23 = vmul.f32 -1.442695, %v5698_v9 }
 0xa6c   :  { %v3669_v34 = vmul.f32 -1.442695, %v5699_v30 }
 0xa6d   :  { %5843 = vpow2.f32 %v3668_v23 }
 0xa6e   :  { %5845 = vpow2.f32 %v3669_v34 }
 0xa77   :  { %v5844_v45 = vpop.eup %5843 }
 0xa78   :  { %v2392_v47 = vadd.f32 1.0, %v5844_v45  ;;  %v5846_v53 = vpop.eup %5845 }
 0xa79   :  { %v2399_v46 = vadd.f32 1.0, %v5846_v53  ;;  %v2000_v53 = vadd.f32 %v6829_v16, %v6903_v41 }
 0xa7a   :  { %5847 = vrcp.f32 %v2392_v47 }
 0xa7b   :  { %5849 = vrcp.f32 %v2399_v46 }
 0xa84   :  { %v5848_v63 = vpop.eup %5847 }
 0xa85   :  { %v2403_v12 = vmul.f32 %v5848_v63, %v2402_v58  ;;  %v5850_v1 = vpop.eup %5849 }
 0xa86   :  { %v2406_v7 = vsub.f32 1.0, %v5850_v1  ;;  %v2408_v11 = vmul.f32 %v5850_v1, %v6908_v59 }
 0xa87   :  { %v2404_v17 = vadd.f32 %v2403_v12, %v1995_v3 }
 0xa89   :  { %5851 = vtanh.f32 %v2404_v17 }
 0xa93   :  { %v5852_v8 = vpop.eup %5851 }
 0xa94   :  { %v2407_v21 = vmul.f32 %v5852_v8, %v2406_v7 }
 0xa96   :  { %v6953_v13 = vadd.f32 %v2408_v11, %v2407_v21 }
 0xa98   :  { %2476 = vmatmul.mubr.f32.vlgmr.msra.gmra.mrb[20].mxu0 %v6953_v13  ;;  %4457 = vmatmul.mubr.f32.vlgmr.msra.gmra.mrb[38].mxu1 %v6953_v13 }
 0xa99   :  { %5369 = vmatpush1.bf16.msra.mxu0 %v6738_v35  ;;  %5400 = vmatpush3.bf16.msra.mxu1 %v6776_v43 }
 0xa9a   :  { %5371 = vmatprep.subr.bf16.mxu0 %v6742_v38  ;;  %5401 = vmatprep.subr.bf16.mxu1 %v6049_v6 }
 0xa9b   :  { %2639 = vmatprep.mubr.f32.mxu0 %v6048_v0  ;;  %4491 = vmatprep.mubr.msk.f32.mxu1 %vm6050_vm1, %v6048_v0 }
 0xa9d   :  { %5373 = vmatpush1.bf16.msra.mxu0 %v6744_v19  ;;  %5403 = vmatpush3.bf16.msra.mxu1 %v6787_v28 }
 0xa9e   :  { %5375 = vmatprep.subr.bf16.mxu0 %v6748_v33  ;;  %5404 = vmatprep.subr.bf16.mxu1 %v6049_v6 }
 0xaa1   :  { %5377 = vmatpush1.bf16.msra.mxu0 %v6750_v49  ;;  %5406 = vmatpush3.bf16.msra.mxu1 %v6793_v57 }
 0xaa2   :  { %5379 = vmatprep.subr.bf16.mxu0 %v6754_v56  ;;  %5407 = vmatprep.subr.bf16.mxu1 %v6049_v6 }
 0xaa5   :  { %5381 = vmatpush1.bf16.msra.mxu0 %v6756_v2  ;;  %5409 = vmatpush3.bf16.msra.mxu1 %v6796_v40 }
 0xaa6   :  { %5383 = vmatprep.subr.bf16.mxu0 %v6760_v15  ;;  %5410 = vmatprep.subr.bf16.mxu1 %v6049_v6 }
 0xaa9   :  { %5385 = vmatpush1.bf16.msra.mxu0 %v6762_v26  ;;  %5412 = vmatpush3.bf16.msra.mxu1 %v6800_v22 }
 0xaaa   :  { %5387 = vmatprep.subr.bf16.mxu0 %v6766_v52  ;;  %5413 = vmatprep.subr.bf16.mxu1 %v6049_v6 }
 0xaad   :  { %5389 = vmatpush1.bf16.msra.mxu0 %v6768_v54  ;;  %5415 = vmatpush3.bf16.msra.mxu1 %v6804_v44 }
 0xaae   :  { %5391 = vmatprep.subr.bf16.mxu0 %v6772_v48  ;;  %5416 = vmatprep.subr.bf16.mxu1 %v6049_v6 }
 0xab1   :  { %5393 = vmatpush1.bf16.msra.mxu0 %v6774_v39  ;;  %5418 = vmatpush3.bf16.msra.mxu1 %v6808_v61 }
 0xab2   :  { %5395 = vmatprep.subr.bf16.mxu0 %v6779_v20  ;;  %5419 = vmatprep.subr.bf16.mxu1 %v6049_v6 }
 0xab5   :  { %5397 = vmatpush1.bf16.msra.mxu0 %v6785_v24  ;;  %5421 = vmatpush3.bf16.msra.mxu1 %v6812_v10 }
 0xab6   :  { %5423 = vmatprep.subr.bf16.mxu0 %v6736_v60  ;;  %5454 = vmatprep.subr.bf16.mxu1 %v6049_v6 }
 0xb6b   :  { %v2477_v25 = vpop.f32.mrb[20].mxu0  ;;  %v2548_v14 = vpop.f32.mrb[38].mxu1 }
 0xb6c   :  { %v5700_v29 = vadd.f32 %v2477_v25, %v6888_v62  ;;  %v2479_v42 = vpop.f32.mrb[21].mxu0  ;;  %v4458_v36 = vpop.f32.mrb[39].mxu1  ;;  %v2566_v45 = vadd.f32 %v6899_v4, %v2548_v14 }
 0xb6d   :  { %v5701_v9 = vadd.f32 %v2479_v42, %v6892_v18 }
 0xb6e   :  { %v3670_v37 = vmul.f32 -1.442695, %v5700_v29 }
 0xb6f   :  { %v3671_v32 = vmul.f32 -1.442695, %v5701_v9 }
 0xb70   :  { %5853 = vpow2.f32 %v3670_v37 }
 0xb71   :  { %5855 = vpow2.f32 %v3671_v32 }
 0xb7a   :  { %v5854_v5 = vpop.eup %5853 }
 0xb7b   :  { %v2556_v23 = vadd.f32 1.0, %v5854_v5  ;;  %v5856_v30 = vpop.eup %5855 }
 0xb7c   :  { %v2563_v34 = vadd.f32 1.0, %v5856_v30  ;;  %v2005_v30 = vadd.f32 %v6827_v27, %v6903_v41 }
 0xb7d   :  { %5857 = vrcp.f32 %v2556_v23 }
 0xb7e   :  { %5859 = vrcp.f32 %v2563_v34 }
 0xb87   :  { %v5858_v47 = vpop.eup %5857 }
 0xb88   :  { %v2567_v46 = vmul.f32 %v5858_v47, %v2566_v45  ;;  %v5860_v63 = vpop.eup %5859 }
 0xb89   :  { %v2570_v3 = vsub.f32 1.0, %v5860_v63  ;;  %v2572_v1 = vmul.f32 %v5860_v63, %v6953_v13 }
 0xb8a   :  { %v2568_v58 = vadd.f32 %v2567_v46, %v2000_v53 }
 0xb8c   :  { %5861 = vtanh.f32 %v2568_v58 }
 0xb96   :  { %v5862_v12 = vpop.eup %5861 }
 0xb97   :  { %v2571_v17 = vmul.f32 %v5862_v12, %v2570_v3 }
 0xb99   :  { %v6998_v7 = vadd.f32 %v2572_v1, %v2571_v17 }
 0xb9b   :  { %2640 = vmatmul.mubr.f32.vlgmr.msra.gmra.mrb[22].mxu0 %v6998_v7  ;;  %4492 = vmatmul.mubr.f32.vlgmr.msra.gmra.mrb[40].mxu1 %v6998_v7 }
 0xb9c   :  { %5425 = vmatpush1.bf16.msra.mxu0 %v6738_v35  ;;  %5456 = vmatpush3.bf16.msra.mxu1 %v6776_v43 }
 0xb9d   :  { %5427 = vmatprep.subr.bf16.mxu0 %v6742_v38  ;;  %5457 = vmatprep.subr.bf16.mxu1 %v6049_v6 }
 0xb9e   :  { %2803 = vmatprep.mubr.f32.mxu0 %v6048_v0  ;;  %4526 = vmatprep.mubr.msk.f32.mxu1 %vm6050_vm1, %v6048_v0 }
 0xba0   :  { %5429 = vmatpush1.bf16.msra.mxu0 %v6744_v19  ;;  %5459 = vmatpush3.bf16.msra.mxu1 %v6787_v28 }
 0xba1   :  { %5431 = vmatprep.subr.bf16.mxu0 %v6748_v33  ;;  %5460 = vmatprep.subr.bf16.mxu1 %v6049_v6 }
 0xba4   :  { %5433 = vmatpush1.bf16.msra.mxu0 %v6750_v49  ;;  %5462 = vmatpush3.bf16.msra.mxu1 %v6793_v57 }
 0xba5   :  { %5435 = vmatprep.subr.bf16.mxu0 %v6754_v56  ;;  %5463 = vmatprep.subr.bf16.mxu1 %v6049_v6 }
 0xba8   :  { %5437 = vmatpush1.bf16.msra.mxu0 %v6756_v2  ;;  %5465 = vmatpush3.bf16.msra.mxu1 %v6796_v40 }
 0xba9   :  { %5439 = vmatprep.subr.bf16.mxu0 %v6760_v15  ;;  %5466 = vmatprep.subr.bf16.mxu1 %v6049_v6 }
 0xbac   :  { %5441 = vmatpush1.bf16.msra.mxu0 %v6762_v26  ;;  %5468 = vmatpush3.bf16.msra.mxu1 %v6800_v22 }
 0xbad   :  { %5443 = vmatprep.subr.bf16.mxu0 %v6766_v52  ;;  %5469 = vmatprep.subr.bf16.mxu1 %v6049_v6 }
 0xbb0   :  { %5445 = vmatpush1.bf16.msra.mxu0 %v6768_v54  ;;  %5471 = vmatpush3.bf16.msra.mxu1 %v6804_v44 }
 0xbb1   :  { %5447 = vmatprep.subr.bf16.mxu0 %v6772_v48  ;;  %5472 = vmatprep.subr.bf16.mxu1 %v6049_v6 }
 0xbb4   :  { %5449 = vmatpush1.bf16.msra.mxu0 %v6774_v39  ;;  %5474 = vmatpush3.bf16.msra.mxu1 %v6808_v61 }
 0xbb5   :  { %5451 = vmatprep.subr.bf16.mxu0 %v6779_v20  ;;  %5475 = vmatprep.subr.bf16.mxu1 %v6049_v6 }
 0xbb8   :  { %5453 = vmatpush1.bf16.msra.mxu0 %v6785_v24  ;;  %5477 = vmatpush3.bf16.msra.mxu1 %v6812_v10 }
 0xbb9   :  { %5479 = vmatprep.subr.bf16.mxu0 %v6736_v60  ;;  %5510 = vmatprep.subr.bf16.mxu1 %v6049_v6 }
 0xc6e   :  { %v2641_v16 = vpop.f32.mrb[22].mxu0  ;;  %v2712_v8 = vpop.f32.mrb[40].mxu1 }
 0xc6f   :  { %v5702_v21 = vadd.f32 %v2641_v16, %v6888_v62  ;;  %v2643_v11 = vpop.f32.mrb[23].mxu0  ;;  %v4493_v25 = vpop.f32.mrb[41].mxu1  ;;  %v2730_v5 = vadd.f32 %v6899_v4, %v2712_v8 }
 0xc70   :  { %v5703_v29 = vadd.f32 %v2643_v11, %v6892_v18 }
 0xc71   :  { %v3672_v14 = vmul.f32 -1.442695, %v5702_v21 }
 0xc72   :  { %v3673_v42 = vmul.f32 -1.442695, %v5703_v29 }
 0xc73   :  { %5863 = vpow2.f32 %v3672_v14 }
 0xc74   :  { %5865 = vpow2.f32 %v3673_v42 }
 0xc7d   :  { %v5864_v36 = vpop.eup %5863 }
 0xc7e   :  { %v2720_v37 = vadd.f32 1.0, %v5864_v36  ;;  %v5866_v9 = vpop.eup %5865 }
 0xc7f   :  { %v2727_v32 = vadd.f32 1.0, %v5866_v9  ;;  %v2010_v9 = vadd.f32 %v6833_v51, %v6903_v41 }
 0xc80   :  { %5867 = vrcp.f32 %v2720_v37 }
 0xc81   :  { %5869 = vrcp.f32 %v2727_v32 }
 0xc8a   :  { %v5868_v23 = vpop.eup %5867 }
 0xc8b   :  { %v2731_v34 = vmul.f32 %v5868_v23, %v2730_v5  ;;  %v5870_v47 = vpop.eup %5869 }
 0xc8c   :  { %v2734_v53 = vsub.f32 1.0, %v5870_v47  ;;  %v2736_v63 = vmul.f32 %v5870_v47, %v6998_v7 }
 0xc8d   :  { %v2732_v45 = vadd.f32 %v2731_v34, %v2005_v30 }
 0xc8f   :  { %5871 = vtanh.f32 %v2732_v45 }
 0xc99   :  { %v5872_v46 = vpop.eup %5871 }
 0xc9a   :  { %v2735_v58 = vmul.f32 %v5872_v46, %v2734_v53 }
 0xc9c   :  { %v7043_v3 = vadd.f32 %v2736_v63, %v2735_v58 }
 0xc9e   :  { %2804 = vmatmul.mubr.f32.vlgmr.msra.gmra.mrb[24].mxu0 %v7043_v3  ;;  %4527 = vmatmul.mubr.f32.vlgmr.msra.gmra.mrb[42].mxu1 %v7043_v3 }
 0xc9f   :  { %5481 = vmatpush1.bf16.msra.mxu0 %v6738_v35  ;;  %5512 = vmatpush3.bf16.msra.mxu1 %v6776_v43 }
 0xca0   :  { %5483 = vmatprep.subr.bf16.mxu0 %v6742_v38  ;;  %5513 = vmatprep.subr.bf16.mxu1 %v6049_v6 }
 0xca1   :  { %2967 = vmatprep.mubr.f32.mxu0 %v6048_v0  ;;  %4561 = vmatprep.mubr.msk.f32.mxu1 %vm6050_vm1, %v6048_v0 }
 0xca3   :  { %5485 = vmatpush1.bf16.msra.mxu0 %v6744_v19  ;;  %5515 = vmatpush3.bf16.msra.mxu1 %v6787_v28 }
 0xca4   :  { %5487 = vmatprep.subr.bf16.mxu0 %v6748_v33  ;;  %5516 = vmatprep.subr.bf16.mxu1 %v6049_v6 }
 0xca7   :  { %5489 = vmatpush1.bf16.msra.mxu0 %v6750_v49  ;;  %5518 = vmatpush3.bf16.msra.mxu1 %v6793_v57 }
 0xca8   :  { %5491 = vmatprep.subr.bf16.mxu0 %v6754_v56  ;;  %5519 = vmatprep.subr.bf16.mxu1 %v6049_v6 }
 0xcab   :  { %5493 = vmatpush1.bf16.msra.mxu0 %v6756_v2  ;;  %5521 = vmatpush3.bf16.msra.mxu1 %v6796_v40 }
 0xcac   :  { %5495 = vmatprep.subr.bf16.mxu0 %v6760_v15  ;;  %5522 = vmatprep.subr.bf16.mxu1 %v6049_v6 }
 0xcaf   :  { %5497 = vmatpush1.bf16.msra.mxu0 %v6762_v26  ;;  %5524 = vmatpush3.bf16.msra.mxu1 %v6800_v22 }
 0xcb0   :  { %5499 = vmatprep.subr.bf16.mxu0 %v6766_v52  ;;  %5525 = vmatprep.subr.bf16.mxu1 %v6049_v6 }
 0xcb3   :  { %5501 = vmatpush1.bf16.msra.mxu0 %v6768_v54  ;;  %5527 = vmatpush3.bf16.msra.mxu1 %v6804_v44 }
 0xcb4   :  { %5503 = vmatprep.subr.bf16.mxu0 %v6772_v48  ;;  %5528 = vmatprep.subr.bf16.mxu1 %v6049_v6 }
 0xcb7   :  { %5505 = vmatpush1.bf16.msra.mxu0 %v6774_v39  ;;  %5530 = vmatpush3.bf16.msra.mxu1 %v6808_v61 }
 0xcb8   :  { %5507 = vmatprep.subr.bf16.mxu0 %v6779_v20  ;;  %5531 = vmatprep.subr.bf16.mxu1 %v6049_v6 }
 0xcbb   :  { %5509 = vmatpush1.bf16.msra.mxu0 %v6785_v24  ;;  %5533 = vmatpush3.bf16.msra.mxu1 %v6812_v10 }
 0xcbc   :  { %5535 = vmatprep.subr.bf16.mxu0 %v6736_v60  ;;  %5566 = vmatprep.subr.bf16.mxu1 %v6049_v6 }
 0xd71   :  { %v2805_v27 = vpop.f32.mrb[24].mxu0  ;;  %v2876_v12 = vpop.f32.mrb[42].mxu1 }
 0xd72   :  { %v5704_v17 = vadd.f32 %v2805_v27, %v6888_v62  ;;  %v2807_v1 = vpop.f32.mrb[25].mxu0  ;;  %v4528_v16 = vpop.f32.mrb[43].mxu1  ;;  %v2894_v36 = vadd.f32 %v6899_v4, %v2876_v12 }
 0xd73   :  { %v5705_v21 = vadd.f32 %v2807_v1, %v6892_v18 }
 0xd74   :  { %v3674_v8 = vmul.f32 -1.442695, %v5704_v17 }
 0xd75   :  { %v3675_v11 = vmul.f32 -1.442695, %v5705_v21 }
 0xd76   :  { %5873 = vpow2.f32 %v3674_v8 }
 0xd77   :  { %5875 = vpow2.f32 %v3675_v11 }
 0xd80   :  { %v5874_v25 = vpop.eup %5873 }
 0xd81   :  { %v2884_v14 = vadd.f32 1.0, %v5874_v25  ;;  %v5876_v29 = vpop.eup %5875 }
 0xd82   :  { %v2891_v42 = vadd.f32 1.0, %v5876_v29 }
 0xd83   :  { %5877 = vrcp.f32 %v2884_v14  ;;  %v2015_v14 = vadd.f32 %v6831_v31, %v6903_v41 }
 0xd84   :  { %5879 = vrcp.f32 %v2891_v42 }
 0xd8d   :  { %v5878_v37 = vpop.eup %5877 }
 0xd8e   :  { %v2895_v32 = vmul.f32 %v5878_v37, %v2894_v36  ;;  %v5880_v23 = vpop.eup %5879 }
 0xd8f   :  { %v2898_v30 = vsub.f32 1.0, %v5880_v23  ;;  %v2900_v47 = vmul.f32 %v5880_v23, %v7043_v3 }
 0xd90   :  { %v2896_v5 = vadd.f32 %v2895_v32, %v2010_v9 }
 0xd92   :  { %5881 = vtanh.f32 %v2896_v5 }
 0xd9c   :  { %v5882_v34 = vpop.eup %5881 }
 0xd9d   :  { %v2899_v45 = vmul.f32 %v5882_v34, %v2898_v30 }
 0xd9f   :  { %v7088_v53 = vadd.f32 %v2900_v47, %v2899_v45  ;;  %v3409_v47 = vld [vmem:[#allocation8 + $0x20] sm:$0xff] }
 0xda1   :  { %2968 = vmatmul.mubr.f32.vlgmr.msra.gmra.mrb[26].mxu0 %v7088_v53  ;;  %4562 = vmatmul.mubr.f32.vlgmr.msra.gmra.mrb[44].mxu1 %v7088_v53 }
 0xda2   :  { %5537 = vmatpush1.bf16.msra.mxu0 %v6738_v35  ;;  %5568 = vmatpush3.bf16.msra.mxu1 %v6776_v43 }
 0xda3   :  { %5539 = vmatprep.subr.bf16.mxu0 %v6742_v38  ;;  %5569 = vmatprep.subr.bf16.mxu1 %v6049_v6 }
 0xda4   :  { %3131 = vmatprep.mubr.f32.mxu0 %v6048_v0  ;;  %4596 = vmatprep.mubr.msk.f32.mxu1 %vm6050_vm1, %v6048_v0 }
 0xda6   :  { %5541 = vmatpush1.bf16.msra.mxu0 %v6744_v19  ;;  %5571 = vmatpush3.bf16.msra.mxu1 %v6787_v28 }
 0xda7   :  { %5543 = vmatprep.subr.bf16.mxu0 %v6748_v33  ;;  %5572 = vmatprep.subr.bf16.mxu1 %v6049_v6 }
 0xdaa   :  { %5545 = vmatpush1.bf16.msra.mxu0 %v6750_v49  ;;  %5574 = vmatpush3.bf16.msra.mxu1 %v6793_v57 }
 0xdab   :  { %5547 = vmatprep.subr.bf16.mxu0 %v6754_v56  ;;  %5575 = vmatprep.subr.bf16.mxu1 %v6049_v6 }
 0xdae   :  { %5549 = vmatpush1.bf16.msra.mxu0 %v6756_v2  ;;  %5577 = vmatpush3.bf16.msra.mxu1 %v6796_v40 }
 0xdaf   :  { %5551 = vmatprep.subr.bf16.mxu0 %v6760_v15  ;;  %5578 = vmatprep.subr.bf16.mxu1 %v6049_v6 }
 0xdb2   :  { %5553 = vmatpush1.bf16.msra.mxu0 %v6762_v26  ;;  %5580 = vmatpush3.bf16.msra.mxu1 %v6800_v22 }
 0xdb3   :  { %5555 = vmatprep.subr.bf16.mxu0 %v6766_v52  ;;  %5581 = vmatprep.subr.bf16.mxu1 %v6049_v6 }
 0xdb6   :  { %5557 = vmatpush1.bf16.msra.mxu0 %v6768_v54  ;;  %5583 = vmatpush3.bf16.msra.mxu1 %v6804_v44 }
 0xdb7   :  { %5559 = vmatprep.subr.bf16.mxu0 %v6772_v48  ;;  %5584 = vmatprep.subr.bf16.mxu1 %v6049_v6 }
 0xdba   :  { %5561 = vmatpush1.bf16.msra.mxu0 %v6774_v39  ;;  %5586 = vmatpush3.bf16.msra.mxu1 %v6808_v61 }
 0xdbb   :  { %5563 = vmatprep.subr.bf16.mxu0 %v6779_v20  ;;  %5587 = vmatprep.subr.bf16.mxu1 %v6049_v6 }
 0xdbe   :  { %5565 = vmatpush1.bf16.msra.mxu0 %v6785_v24  ;;  %5589 = vmatpush3.bf16.msra.mxu1 %v6812_v10 }
 0xdbf   :  { %5591 = vmatprep.subr.bf16.mxu0 %v6736_v60  ;;  %5622 = vmatprep.subr.bf16.mxu1 %v6049_v6 }
 0xe74   :  { %v2969_v51 = vpop.f32.mrb[26].mxu0  ;;  %v3040_v46 = vpop.f32.mrb[44].mxu1 }
 0xe75   :  { %v5706_v58 = vadd.f32 %v2969_v51, %v6888_v62  ;;  %v2971_v63 = vpop.f32.mrb[27].mxu0  ;;  %v4563_v27 = vpop.f32.mrb[45].mxu1  ;;  %v3058_v60 = vadd.f32 %v6899_v4, %v3040_v46  ;;  %v3410_v51 = vld [vmem:[#allocation8 + $0x28] sm:$0xff]  ;;  %v3411_v46 = vld [vmem:[#allocation8 + $0x30] sm:$0xff] }
 0xe76   :  { %v5707_v17 = vadd.f32 %v2971_v63, %v6892_v18  ;;  %v3413_v27 = vld [vmem:[#allocation8 + $0x40] sm:$0xff] }
 0xe77   :  { %v3676_v12 = vmul.f32 -1.442695, %v5706_v58  ;;  %v3412_v58 = vld [vmem:[#allocation8 + $0x38] sm:$0xff] }
 0xe78   :  { %v3677_v1 = vmul.f32 -1.442695, %v5707_v17  ;;  %v5658_v63 = vpack.c.bf16 %v3412_v58, %v3411_v46 }
 0xe79   :  { %5883 = vpow2.f32 %v3676_v12  ;;  %v3414_v12 = vld [vmem:[#allocation8 + $0x48] sm:$0xff] }
 0xe7a   :  { %5885 = vpow2.f32 %v3677_v1  ;;  %v5662_v17 = vpack.c.bf16 %v3414_v12, %v3413_v27  ;;  %v3415_v1 = vld [vmem:[#allocation8 + $0x50] sm:$0xff] }
 0xe83   :  { %v5884_v16 = vpop.eup %5883 }
 0xe84   :  { %v3048_v8 = vadd.f32 1.0, %v5884_v16  ;;  %v5886_v21 = vpop.eup %5885  ;;  %v3416_v16 = vld [vmem:[#allocation8 + $0x58] sm:$0xff] }
 0xe85   :  { %v3055_v11 = vadd.f32 1.0, %v5886_v21  ;;  %v3417_v21 = vld [vmem:[#allocation8 + $0x60] sm:$0xff] }
 0xe86   :  { %5887 = vrcp.f32 %v3048_v8  ;;  %v5666_v8 = vpack.c.bf16 %v3416_v16, %v3415_v1 }
 0xe87   :  { %5889 = vrcp.f32 %v3055_v11  ;;  %v3418_v11 = vld [vmem:[#allocation8 + $0x68] sm:$0xff] }
 0xe90   :  { %v5888_v25 = vpop.eup %5887 }
 0xe91   :  { %v3059_v29 = vmul.f32 %v5888_v25, %v3058_v60  ;;  %v5890_v36 = vpop.eup %5889  ;;  %v3419_v60 = vld [vmem:[#allocation8 + $0x70] sm:$0xff]  ;;  %v3420_v25 = vld [vmem:[#allocation8 + $0x78] sm:$0xff] }
 0xe92   :  { %v3062_v37 = vsub.f32 1.0, %v5890_v36  ;;  %v3064_v5 = vmul.f32 %v5890_v36, %v7088_v53 }
 0xe93   :  { %v3060_v42 = vadd.f32 %v3059_v29, %v2015_v14  ;;  %v5674_v14 = vpack.c.bf16 %v3420_v25, %v3419_v60 }
 0xe95   :  { %5891 = vtanh.f32 %v3060_v42 }
 0xe9f   :  { %v5892_v9 = vpop.eup %5891 }
 0xea0   :  { %v3063_v32 = vmul.f32 %v5892_v9, %v3062_v37 }
 0xea2   :  { %v7133_v23 = vadd.f32 %v3064_v5, %v3063_v32 }
 0xea4   :  { %3132 = vmatmul.mubr.f32.vlgmr.msra.gmra.mrb[28].mxu0 %v7133_v23  ;;  %4597 = vmatmul.mubr.f32.vlgmr.msra.gmra.mrb[46].mxu1 %v7133_v23 }
 0xea5   :  { %5593 = vmatpush1.bf16.msra.mxu0 %v6738_v35  ;;  %5624 = vmatpush3.bf16.msra.mxu1 %v6776_v43  ;;  %v3406_v35 = vld [vmem:[#allocation8 + $0x8] sm:$0xff] }
 0xea6   :  { %5595 = vmatprep.subr.bf16.mxu0 %v6742_v38  ;;  %5625 = vmatprep.subr.bf16.mxu1 %v6049_v6 }
 0xea7   :  { %3295 = vmatprep.mubr.f32.mxu0 %v6048_v0  ;;  %4631 = vmatprep.mubr.msk.f32.mxu1 %vm6050_vm1, %v6048_v0  ;;  %v3405_v0 = vld [vmem:[#allocation8] sm:$0xff] }
 0xea8   :  { %v5646_v38 = vpack.c.bf16 %v3406_v35, %v3405_v0 }
 0xea9   :  { %5597 = vmatpush1.bf16.msra.mxu0 %v6744_v19  ;;  %5627 = vmatpush3.bf16.msra.mxu1 %v6787_v28 }
 0xeaa   :  { %5599 = vmatprep.subr.bf16.mxu0 %v6748_v33  ;;  %5628 = vmatprep.subr.bf16.mxu1 %v6049_v6 }
 0xead   :  { %5601 = vmatpush1.bf16.msra.mxu0 %v6750_v49  ;;  %5630 = vmatpush3.bf16.msra.mxu1 %v6793_v57 }
 0xeae   :  { %5603 = vmatprep.subr.bf16.mxu0 %v6754_v56  ;;  %5631 = vmatprep.subr.bf16.mxu1 %v6049_v6 }
 0xeb1   :  { %5605 = vmatpush1.bf16.msra.mxu0 %v6756_v2  ;;  %5633 = vmatpush3.bf16.msra.mxu1 %v6796_v40 }
 0xeb2   :  { %5607 = vmatprep.subr.bf16.mxu0 %v6760_v15  ;;  %5634 = vmatprep.subr.bf16.mxu1 %v6049_v6 }
 0xeb5   :  { %5609 = vmatpush1.bf16.msra.mxu0 %v6762_v26  ;;  %5636 = vmatpush3.bf16.msra.mxu1 %v6800_v22 }
 0xeb6   :  { %5611 = vmatprep.subr.bf16.mxu0 %v6766_v52  ;;  %5637 = vmatprep.subr.bf16.mxu1 %v6049_v6 }
 0xeb9   :  { %5613 = vmatpush1.bf16.msra.mxu0 %v6768_v54  ;;  %5639 = vmatpush3.bf16.msra.mxu1 %v6804_v44 }
 0xeba   :  { %5615 = vmatprep.subr.bf16.mxu0 %v6772_v48  ;;  %5640 = vmatprep.subr.bf16.mxu1 %v6049_v6 }
 0xebd   :  { %5617 = vmatpush1.bf16.msra.mxu0 %v6774_v39  ;;  %5642 = vmatpush3.bf16.msra.mxu1 %v6808_v61  ;;  %v3407_v61 = vld [vmem:[#allocation8 + $0x10] sm:$0xff] }
 0xebe   :  { %5619 = vmatprep.subr.bf16.mxu0 %v6779_v20  ;;  %5643 = vmatprep.subr.bf16.mxu1 %v6049_v6 }
 0xec1   :  { %5621 = vmatpush1.bf16.msra.mxu0 %v6785_v24  ;;  %5645 = vmatpush3.bf16.msra.mxu1 %v6812_v10  ;;  %v2020_v24 = vadd.f32 %v6884_v55, %v6903_v41  ;;  %v3408_v10 = vld [vmem:[#allocation8 + $0x18] sm:$0xff]  ;;  %v5654_v55 = vpack.c.bf16 %v3410_v51, %v3409_v47 }
 0xec2   :  { %5647 = vmatprep.subr.bf16.mxu0 %v5646_v38  ;;  %v5650_v45 = vpack.c.bf16 %v3408_v10, %v3407_v61 }
 0xf77   :  { %v3133_v19 = vpop.f32.mrb[28].mxu0  ;;  %v3204_v33 = vpop.f32.mrb[46].mxu1 }
 0xf78   :  { %v5708_v49 = vadd.f32 %v3133_v19, %v6888_v62  ;;  %v3135_v56 = vpop.f32.mrb[29].mxu0  ;;  %v4598_v2 = vpop.f32.mrb[47].mxu1  ;;  %v3222_v43 = vadd.f32 %v6899_v4, %v3204_v33 }
 0xf79   :  { %v5709_v26 = vadd.f32 %v3135_v56, %v6892_v18 }
 0xf7a   :  { %v3678_v15 = vmul.f32 -1.442695, %v5708_v49 }
 0xf7b   :  { %v3679_v52 = vmul.f32 -1.442695, %v5709_v26 }
 0xf7c   :  { %5893 = vpow2.f32 %v3678_v15 }
 0xf7d   :  { %5895 = vpow2.f32 %v3679_v52 }
 0xf86   :  { %v5894_v6 = vpop.eup %5893 }
 0xf87   :  { %v3212_v54 = vadd.f32 1.0, %v5894_v6  ;;  %v5896_v48 = vpop.eup %5895 }
 0xf88   :  { %v3219_v39 = vadd.f32 1.0, %v5896_v48 }
 0xf89   :  { %5897 = vrcp.f32 %v3212_v54 }
 0xf8a   :  { %5899 = vrcp.f32 %v3219_v39 }
 0xf93   :  { %v5898_v20 = vpop.eup %5897 }
 0xf94   :  { %v3223_v28 = vmul.f32 %v5898_v20, %v3222_v43  ;;  %v5900_v40 = vpop.eup %5899 }
 0xf95   :  { %v3226_v22 = vsub.f32 1.0, %v5900_v40  ;;  %v3228_v30 = vmul.f32 %v5900_v40, %v7133_v23 }
 0xf96   :  { %v3224_v57 = vadd.f32 %v3223_v28, %v2020_v24 }
 0xf98   :  { %5901 = vtanh.f32 %v3224_v57 }
 0xfa2   :  { %v5902_v44 = vpop.eup %5901 }
 0xfa3   :  { %v3227_v31 = vmul.f32 %v5902_v44, %v3226_v22 }
 0xfa5   :  { %v7176_v34 = vadd.f32 %v3228_v30, %v3227_v31 }
 0xfa7   :  { %3296 = vmatmul.mubr.f32.vlgmr.msra.gmra.mrb[30].mxu0 %v7176_v34  ;;  %4632 = vmatmul.mubr.f32.vlgmr.msra.gmra.mrb[48].mxu1 %v7176_v34 }
 0xfa8   :  { %5649 = vmatpush3.bf16.msra.mxu0 %v5646_v38  ;;  %4666 = vmatprep.mubr.f32.mxu0 %v6908_v59  ;;  %v5670_v59 = vpack.c.bf16 %v3418_v11, %v3417_v21  ;;  %v2025_v38 = vadd.f32 %v6882_v50, %v6903_v41 }
 0xfa9   :  { %5651 = vmatprep.subr.bf16.mxu0 %v5650_v45 }
 0xfac   :  { %5653 = vmatpush3.bf16.msra.mxu0 %v5650_v45 }
 0xfad   :  { %5655 = vmatprep.subr.bf16.mxu0 %v5654_v55 }
 0xfb0   :  { %5657 = vmatpush3.bf16.msra.mxu0 %v5654_v55 }
 0xfb1   :  { %5659 = vmatprep.subr.bf16.mxu0 %v5658_v63 }
 0xfb4   :  { %5661 = vmatpush3.bf16.msra.mxu0 %v5658_v63 }
 0xfb5   :  { %5663 = vmatprep.subr.bf16.mxu0 %v5662_v17 }
 0xfb8   :  { %5665 = vmatpush3.bf16.msra.mxu0 %v5662_v17 }
 0xfb9   :  { %5667 = vmatprep.subr.bf16.mxu0 %v5666_v8 }
 0xfbc   :  { %5669 = vmatpush3.bf16.msra.mxu0 %v5666_v8 }
 0xfbd   :  { %5671 = vmatprep.subr.bf16.mxu0 %v5670_v59 }
 0xfc0   :  { %5673 = vmatpush3.bf16.msra.mxu0 %v5670_v59 }
 0xfc1   :  { %5675 = vmatprep.subr.bf16.mxu0 %v5674_v14 }
 0xfc4   :  { %5677 = vmatpush3.bf16.msra.mxu0 %v5674_v14 }
 0xfc7   :  { %4667 = vmatmul.mubr.f32.vlgmr.msra.gmra.mrb[32].mxu0 %v6953_v13 }
 0xfc8   :  { %4669 = vmatprep.mubr.f32.mxu0 %v6998_v7 }
 0xfcb   :  { %4670 = vmatmul.mubr.f32.gmra.mrb[34].mxu0 %v7043_v3 }
 0xfcc   :  { %4672 = vmatprep.mubr.f32.mxu0 %v7088_v53 }
 0xfcf   :  { %4673 = vmatmul.mubr.f32.gmra.mrb[36].mxu0 %v7133_v23 }
 0xfd0   :  { %4675 = vmatprep.mubr.f32.mxu0 %v7176_v34 }
0x107a   :  { %v3297_v29 = vpop.f32.mrb[30].mxu0  ;;  %v3368_v42 = vpop.f32.mrb[48].mxu1 }
0x107b   :  { %v5710_v36 = vadd.f32 %v3297_v29, %v6888_v62  ;;  %v3299_v37 = vpop.f32.mrb[31].mxu0  ;;  %v4633_v9 = vpop.f32.mrb[49].mxu1  ;;  %v3386_v23 = vadd.f32 %v6899_v4, %v3368_v42 }
0x107c   :  { %v5711_v5 = vadd.f32 %v3299_v37, %v6892_v18  ;;  %v3683_v18 = vld [vmem:[%s7257_s10] ss:$0 sm:$0xff] }
0x107d   :  { %v3680_v32 = vmul.f32 -1.442695, %v5710_v36 }
0x107e   :  { %v3681_v13 = vmul.f32 -1.442695, %v5711_v5 }
0x107f   :  { %5903 = vpow2.f32 %v3680_v32 }
0x1080   :  { %5905 = vpow2.f32 %v3681_v13 }
0x1089   :  { %v5904_v7 = vpop.eup %5903 }
0x108a   :  { %v3376_v3 = vadd.f32 1.0, %v5904_v7  ;;  %v5906_v53 = vpop.eup %5905 }
0x108b   :  { %v3383_v0 = vadd.f32 1.0, %v5906_v53 }
0x108c   :  { %5907 = vrcp.f32 %v3376_v3 }
0x108d   :  { %5909 = vrcp.f32 %v3383_v0 }
0x1096   :  { %v5908_v35 = vpop.eup %5907 }
0x1097   :  { %v3387_v62 = vmul.f32 %v5908_v35, %v3386_v23  ;;  %v5910_v52 = vpop.eup %5909 }
0x1098   :  { %v3390_v48 = vsub.f32 1.0, %v5910_v52  ;;  %v3392_v20 = vmul.f32 %v5910_v52, %v7176_v34 }
0x1099   :  { %v3388_v19 = vadd.f32 %v3387_v62, %v2025_v38 }
0x109a   :  { %v4668_v33 = vpop.f32.mrb[32].mxu0 }
0x109b   :  { %5911 = vtanh.f32 %v3388_v19  ;;  %v3500_v49 = vadd.f32 %v4668_v33, %v3683_v18  ;;  %v3494_v56 = vpop.f32.mrb[33].mxu0 }
0x109c   :  { %v3495_v15 = vadd.f32 %v3683_v18, %v3494_v56 }
0x109d   :  { %3535 = vmax.xlane.f32.xlu0 %v3500_v49 }
0x109e   :  { %v4671_v2 = vpop.f32.mrb[34].mxu0 }
0x109f   :  { %v3510_v26 = vadd.f32 %v4671_v2, %v3683_v18  ;;  %v3504_v4 = vpop.f32.mrb[35].mxu0 }
0x10a0   :  { %v3505_v41 = vadd.f32 %v3683_v18, %v3504_v4 }
0x10a1   :  { %3539 = vmax.xlane.f32.xlu1 %v3510_v26  ;;  %3533 = vmax.xlane.f32.xlu0 %v3495_v15 }
0x10a2   :  { %v4674_v50 = vpop.f32.mrb[36].mxu0 }
0x10a3   :  { %v3514_v6 = vpop.f32.mrb[37].mxu0  ;;  %v3520_v24 = vadd.f32 %v4674_v50, %v3683_v18 }
0x10a4   :  { %v3515_v54 = vadd.f32 %v3683_v18, %v3514_v6 }
0x10a5   :  { %v5912_v39 = vpop.eup %5911  ;;  %3537 = vmax.xlane.f32.xlu1 %v3505_v41 }
0x10a6   :  { %3541 = vmax.xlane.f32.xlu0 %v3515_v54  ;;  %v3391_v43 = vmul.f32 %v5912_v39, %v3390_v48 }
0x10a8   :  { %v3393_v28 = vadd.f32 %v3392_v20, %v3391_v43 }
0x10a9   :  { %3543 = vmax.xlane.f32.xlu1 %v3520_v24 }
0x10aa   :  { %3682 = vst [vmem:[%s7259_s12 + $0x8] sm:$0xff] %v3393_v28  ;;  %4676 = vmatmul.mubr.f32.gmra.mrb[38].mxu0 %v3393_v28 }
0x112a   :  { %v3536_v57 = vpop.xlane.xlu0 %3535 }
0x112b   :  { %v7199_v61 = vsub.f32 %v3500_v49, %v3536_v57 }
0x112d   :  { %v3559_v31 = vmul.f32 1.442695, %v7199_v61 }
0x112e   :  { %v3540_v40 = vpop.xlane.xlu1 %3539  ;;  %v3534_v22 = vpop.xlane.xlu0 %3533 }
0x112f   :  { %v7201_v10 = vsub.f32 %v3495_v15, %v3534_v22  ;;  %v7204_v30 = vsub.f32 %v3510_v26, %v3540_v40  ;;  %5913 = vpow2.f32 %v3559_v31 }
0x1131   :  { %v3557_v34 = vmul.f32 1.442695, %v7201_v10  ;;  %v3563_v55 = vmul.f32 1.442695, %v7204_v30 }
0x1132   :  { %v3538_v44 = vpop.xlane.xlu1 %3537 }
0x1133   :  { %v7207_v45 = vsub.f32 %v3505_v41, %v3538_v44  ;;  %v3542_v51 = vpop.xlane.xlu0 %3541  ;;  %5915 = vpow2.f32 %v3557_v34 }
0x1134   :  { %v7213_v63 = vsub.f32 %v3515_v54, %v3542_v51  ;;  %5917 = vpow2.f32 %v3563_v55 }
0x1135   :  { %v3561_v58 = vmul.f32 1.442695, %v7207_v45 }
0x1136   :  { %v3544_v47 = vpop.xlane.xlu1 %3543  ;;  %v3565_v17 = vmul.f32 1.442695, %v7213_v63 }
0x1137   :  { %v7210_v46 = vsub.f32 %v3520_v24, %v3544_v47  ;;  %5919 = vpow2.f32 %v3561_v58 }
0x1139   :  { %v3567_v27 = vmul.f32 1.442695, %v7210_v46  ;;  %v5914_v21 = vpop.eup %5913 }
0x113b   :  { %5921 = vpow2.f32 %v3567_v27 }
0x113c   :  { %5923 = vpow2.f32 %v3565_v17 }
0x113d   :  { %v5916_v11 = vpop.eup %5915 }
0x113e   :  { %v5918_v59 = vpop.eup %5917 }
0x1141   :  { %v5920_v60 = vpop.eup %5919 }
0x1145   :  { %v5922_v25 = vpop.eup %5921 }
0x1146   :  { %v5924_v14 = vpop.eup %5923 }
0x117d   :  { %v4677_v12 = vpop.f32.mrb[38].mxu0 }
0x117e   :  { %v3530_v1 = vadd.f32 %v4677_v12, %v3683_v18  ;;  %v3524_v16 = vpop.f32.mrb[39].mxu0 }
0x117f   :  { %v3525_v8 = vadd.f32 %v3683_v18, %v3524_v16 }
0x1180   :  { %3547 = vmax.xlane.f32.xlu1 %v3530_v1 }
0x1181   :  { %3545 = vmax.xlane.f32.xlu0 %v3525_v8 }
0x1184   :  { %3575 = vadd.xlane.f32.xlu1 %v5914_v21 }
0x1185   :  { %3573 = vadd.xlane.f32.xlu0 %v5916_v11 }
0x1188   :  { %3579 = vadd.xlane.f32.xlu1 %v5918_v59 }
0x1189   :  { %3577 = vadd.xlane.f32.xlu0 %v5920_v60 }
0x118c   :  { %3583 = vadd.xlane.f32.xlu1 %v5922_v25 }
0x118d   :  { %3581 = vadd.xlane.f32.xlu0 %v5924_v14 }
0x120d   :  { %v3548_v29 = vpop.xlane.xlu1 %3547 }
0x120e   :  { %v3556_v42 = vsub.f32 %v3530_v1, %v3548_v29  ;;  %v3546_v36 = vpop.xlane.xlu0 %3545 }
0x120f   :  { %v3555_v37 = vsub.f32 %v3525_v8, %v3546_v36 }
0x1210   :  { %v3571_v9 = vmul.f32 1.442695, %v3556_v42 }
0x1211   :  { %v3569_v32 = vmul.f32 1.442695, %v3555_v37  ;;  %v3576_v5 = vpop.xlane.xlu1 %3575 }
0x1212   :  { %5925 = vpow2.f32 %v3571_v9  ;;  %v3574_v13 = vpop.xlane.xlu0 %3573 }
0x1213   :  { %5927 = vpow2.f32 %v3569_v32 }
0x1214   :  { %5929 = vlog2.f32 %v3576_v5 }
0x1215   :  { %5931 = vlog2.f32 %v3574_v13  ;;  %v3580_v7 = vpop.xlane.xlu1 %3579 }
0x1216   :  { %5933 = vlog2.f32 %v3580_v7  ;;  %v3578_v3 = vpop.xlane.xlu0 %3577 }
0x1217   :  { %5935 = vlog2.f32 %v3578_v3 }
0x1219   :  { %v3584_v53 = vpop.xlane.xlu1 %3583 }
0x121a   :  { %5937 = vlog2.f32 %v3584_v53  ;;  %v3582_v0 = vpop.xlane.xlu0 %3581 }
0x121b   :  { %5939 = vlog2.f32 %v3582_v0 }
0x121c   :  { %v5926_v23 = vpop.eup %5925 }
0x121d   :  { %v5928_v35 = vpop.eup %5927  ;;  %3587 = vadd.xlane.f32.xlu1 %v5926_v23 }
0x121e   :  { %v5930_v38 = vpop.eup %5929  ;;  %3585 = vadd.xlane.f32.xlu0 %v5928_v35 }
0x121f   :  { %v5932_v62 = vpop.eup %5931  ;;  %v3592_v18 = vmul.f32 0.6931472, %v5930_v38 }
0x1220   :  { %v5934_v19 = vpop.eup %5933  ;;  %v3590_v33 = vmul.f32 0.6931472, %v5932_v62 }
0x1221   :  { %v5936_v49 = vpop.eup %5935  ;;  %v3606_v56 = vsub.f32 %v7199_v61, %v3592_v18  ;;  %v3596_v2 = vmul.f32 0.6931472, %v5934_v19 }
0x1222   :  { %v3605_v15 = vsub.f32 %v7201_v10, %v3590_v33  ;;  %v3594_v26 = vmul.f32 0.6931472, %v5936_v49 }
0x1223   :  { %3614 = vst [vmem:[%s7258_s11 + $0x8] sm:$0xff] %v3606_v56  ;;  %v3608_v4 = vsub.f32 %v7204_v30, %v3596_v2 }
0x1224   :  { %v5938_v52 = vpop.eup %5937  ;;  %3613 = vst [vmem:[%s7258_s11] sm:$0xff] %v3605_v15  ;;  %v3607_v50 = vsub.f32 %v7207_v45, %v3594_v26 }
0x1225   :  { %v5940_v41 = vpop.eup %5939  ;;  %3616 = vst [vmem:[%s7258_s11 + $0x18] sm:$0xff] %v3608_v4  ;;  %v3600_v6 = vmul.f32 0.6931472, %v5938_v52 }
0x1226   :  { %3615 = vst [vmem:[%s7258_s11 + $0x10] sm:$0xff] %v3607_v50  ;;  %v3598_v54 = vmul.f32 0.6931472, %v5940_v41 }
0x1227   :  { %v3610_v48 = vsub.f32 %v7210_v46, %v3600_v6 }
0x1228   :  { %v3609_v39 = vsub.f32 %v7213_v63, %v3598_v54 }
0x1229   :  { %3618 = vst [vmem:[%s7258_s11 + $0x28] sm:$0xff] %v3610_v48 }
0x122a   :  { %3617 = vst [vmem:[%s7258_s11 + $0x20] sm:$0xff] %v3609_v39 }
0x12aa   :  { %v3588_v43 = vpop.xlane.xlu1 %3587 }
0x12ab   :  { %5941 = vlog2.f32 %v3588_v43  ;;  %v3586_v20 = vpop.xlane.xlu0 %3585 }
0x12ac   :  { %5943 = vlog2.f32 %v3586_v20 }
0x12b5   :  { %v5942_v24 = vpop.eup %5941 }
0x12b6   :  { %v5944_v28 = vpop.eup %5943  ;;  %v3604_v57 = vmul.f32 0.6931472, %v5942_v24 }
0x12b7   :  { %v3602_v40 = vmul.f32 0.6931472, %v5944_v28 }
0x12b8   :  { %v3612_v22 = vsub.f32 %v3556_v42, %v3604_v57 }
0x12b9   :  { %v3611_v44 = vsub.f32 %v3555_v37, %v3602_v40 }
0x12ba   :  { %3620 = vst [vmem:[%s7258_s11 + $0x38] sm:$0xff] %v3612_v22 }
0x12bb   :  { %3619 = vst [vmem:[%s7258_s11 + $0x30] sm:$0xff] %v3611_v44 }
0x12bc   :  { %3629 = vsyncpa [#allocation4], 1 }
0x12bd   :  { %3630 = vsyncpa [#allocation6], 1 }
0x12be   :  { %3631 = vsyncpa [#allocation9], 1 }

</bundles_post_ra>
